<compile_context>
chip_gen: v5e
topology: v5e:2x2
jax: 0.10.0
libtpu: 0.0.40
codegen_flags: <defaults>
</compile_context>

<pallas_src>
import functools

import jax
import jax.numpy as jnp
from jax.experimental import pallas as pl
from jax.experimental.pallas import tpu as pltpu


# ----------------------------------------------------------------------------
# Pallas kernel
# ----------------------------------------------------------------------------
def _disc_block_kernel(*refs, H, W, Cin, Cout, Bt, downsample, sc_conv):
    it = iter(refs)
    x_ref = next(it)
    w1_ref = next(it); b1_ref = next(it)
    w2_ref = next(it); b2_ref = next(it)
    if sc_conv:
        w0_ref = next(it); b0_ref = next(it)
    out_ref = next(it)
    xp_ref = next(it)          # (R, W*Cin)  bf16: flat, vertically padded relu(x)
    hp_ref = next(it)          # (R, W*Cout) bf16: flat, vertically padded relu(conv1)

    WCi = W * Cin
    WCo = W * Cout
    No = w2_ref.shape[-1]                    # Wo*Cout if downsample else W*Cout
    Ho = H // 2 if downsample else H
    Hp = H + 2                               # per-image row stride in the scratch
    M = (Bt - 1) * Hp + H                    # matmul rows (valid + inter-image slack)

    x = x_ref[...]                           # (Bt, H, W*Cin) bf16
    xr = jnp.maximum(x, 0)                   # relu (relu(0)=0 commutes with padding)

    # ---- build the vertically padded, batch-flattened conv_1 input.
    # Layout: row 0 = shared top zero pad; image b occupies rows
    # [1 + b*Hp, 1 + b*Hp + H) followed by two zero rows.  Zero rows are
    # refreshed every step (cheap) so "parallel" core-sharding stays safe.
    z_i = jnp.zeros((2, WCi), jnp.bfloat16)
    z_o = jnp.zeros((2, WCo), jnp.bfloat16)
    xp_ref[pl.ds(0, 1), :] = z_i[0:1]
    for b in range(Bt):
        xp_ref[pl.ds(1 + b * Hp, H), :] = xr[b]
        xp_ref[pl.ds(1 + b * Hp + H, 2), :] = z_i

    # ---- conv_1: 3 banded matmuls (dy = 0,1,2).  The slabs are direct 2-D
    # ref slices (no reshape => no relayout copy); bias added once at the end.
    # TODO(synk): fold the 3 dy taps into K (im2col lane-concat) for the
    # 256-deep v6e/v7x MXUs once sub-128-lane concat lowering is validated.
    acc1 = jnp.dot(xp_ref[pl.ds(0, M), :], w1_ref[0],
                   preferred_element_type=jnp.float32)
    for dy in (1, 2):
        acc1 = acc1 + jnp.dot(xp_ref[pl.ds(dy, M), :], w1_ref[dy],
                              preferred_element_type=jnp.float32)
    acc1 = acc1 + b1_ref[...]                # (M, W*Cout) f32
    h1 = jnp.maximum(acc1, 0.0).astype(jnp.bfloat16)

    # ---- hand conv_1 output to conv_2's padded scratch: one bulk store, then
    # the inter-image garbage rows are overwritten with the zero padding.
    hp_ref[pl.ds(1, M), :] = h1
    hp_ref[pl.ds(0, 1), :] = z_o[0:1]
    for b in range(Bt):
        hp_ref[pl.ds(1 + b * Hp + H, 2), :] = z_o

    # ---- conv_2 (the W-average half of AvgPool2d(2) is pre-folded into
    # w2/b2 when downsampling, so its output width is already Wo*Cout).
    acc2 = jnp.dot(hp_ref[pl.ds(0, M), :], w2_ref[0],
                   preferred_element_type=jnp.float32)
    for dy in (1, 2):
        acc2 = acc2 + jnp.dot(hp_ref[pl.ds(dy, M), :], w2_ref[dy],
                              preferred_element_type=jnp.float32)
    acc2 = acc2 + b2_ref[...]                # (M, No) f32

    # ---- shortcut: 1x1 conv as block-diag matmul (W-pool folded) or identity,
    # computed in the compact (Bt*H, .) layout (the shortcut sees x pre-relu).
    x2d = x.reshape(Bt * H, WCi)             # contiguous leading-dim merge: free
    if sc_conv:
        sc = jnp.dot(x2d, w0_ref[...],
                     preferred_element_type=jnp.float32) + b0_ref[...]
    else:
        sc = x2d.astype(jnp.float32)         # Cin == Cout and no downsample

    # ---- per-image epilogue: pick the valid rows out of the padded-layout
    # acc2, add the shortcut, do the remaining H-average of AvgPool2d(2) as a
    # pairwise row add (no pooling matmul / per-step iota), and store.
    # TODO(synk): lane-dense flat (Bt, Ho*Wo*Cout) output store (review item)
    # needs a sublane->lane relayout reshape that is risky at Wo*Cout < 128;
    # keeping the proven (Bt, Ho, Wo*Cout) store for guaranteed clean lowering.
    for b in range(Bt):
        s_b = acc2[b * Hp:b * Hp + H, :] + sc[b * H:(b + 1) * H, :]   # (H, No)
        if downsample:
            s_b = s_b.reshape(Ho, 2, No)
            s_b = (s_b[:, 0, :] + s_b[:, 1, :]) * 0.5                 # (Ho, No)
        out_ref[b] = s_b.astype(out_ref.dtype)


# ----------------------------------------------------------------------------
# Host-side weight preparation (banded matrices, pooling fold, bf16 cast)
# ----------------------------------------------------------------------------
def _banded_conv_mats(w_hwio, W):
    """Per-dy banded matrices: a 3x3 pad=1 conv row becomes slab @ B[dy].

    B has shape (3, W*Ci, W*Co) with
      B[dy, w_in*Ci + ci, w_out*Co + co] = w[dy, w_in - w_out + 1, ci, co]
    for |w_in - w_out| <= 1 (horizontal zero padding folded into the band);
    vertical padding is handled by zero rows in the VMEM scratch.
    """
    kh, kw, Ci, Co = w_hwio.shape
    w_in = jnp.arange(W)
    w_out = jnp.arange(W)
    dx = w_in[:, None] - w_out[None, :] + 1               # (W, W)
    valid = (dx >= 0) & (dx < kw)
    dxc = jnp.clip(dx, 0, kw - 1)
    mats = []
    for dy in range(kh):
        taps = w_hwio[dy][dxc]                            # (W, W, Ci, Co)
        taps = jnp.where(valid[:, :, None, None], taps, 0.0)
        mats.append(jnp.transpose(taps, (0, 2, 1, 3)).reshape(W * Ci, W * Co))
    return jnp.stack(mats, axis=0)


def _wpool_matrix(W, C):
    """(W*C, (W//2)*C) matrix averaging adjacent column pairs per channel."""
    Wo = W // 2
    pw = (jnp.arange(W)[:, None] // 2 == jnp.arange(Wo)[None, :])
    pw = pw.astype(jnp.float32) * 0.5
    return jnp.kron(pw, jnp.eye(C, dtype=jnp.float32))


def prepare_disc_block_params(w1_hwio, b1, w2_hwio, b2, w0_mat=None, b0=None, *,
                              W, downsample):
    Cin, Cout = w1_hwio.shape[2], w1_hwio.shape[3]
    sc_conv = downsample or (Cin != Cout)
    if sc_conv:
        assert w0_mat is not None and b0 is not None

    B1 = _banded_conv_mats(w1_hwio, W)                    # (3, W*Cin, W*Cout)
    B2 = _banded_conv_mats(w2_hwio, W)                    # (3, W*Cout, W*Cout)
    b1f = jnp.tile(b1, W)[None, :].astype(jnp.float32)    # (1, W*Cout)
    b2f = jnp.tile(b2, W)[None, :].astype(jnp.float32)
    w0b = (jnp.kron(jnp.eye(W, dtype=jnp.float32), w0_mat) if sc_conv else None)
    b0f = jnp.tile(b0, W)[None, :].astype(jnp.float32) if sc_conv else None

    if downsample:
        # Fold the W-average half of AvgPool2d(2) into the linear ops that
        # precede it: conv_2, the 1x1 shortcut conv, and their biases.
        PW = _wpool_matrix(W, Cout)                       # (W*Cout, Wo*Cout)
        B2 = jnp.einsum('dkn,nm->dkm', B2, PW)
        b2f = b2f @ PW
        w0b = w0b @ PW
        b0f = b0f @ PW

    kparams = {
        "w1": B1.astype(jnp.bfloat16), "b1": b1f,
        "w2": B2.astype(jnp.bfloat16), "b2": b2f,
    }
    if sc_conv:
        kparams["w0"] = w0b.astype(jnp.bfloat16)
        kparams["b0"] = b0f
    return kparams


# ----------------------------------------------------------------------------
# Wrapper
# ----------------------------------------------------------------------------
def _auto_block_batch(N, H):
    """Pick Bt so Bt*H fills the MXU rows (>=128) with the smallest Bt that
    still leaves >= 2 grid steps (feeds both v7x TensorCores)."""
    cands = [bt for bt in range(1, N + 1) if N % bt == 0]

    def score(bt):
        rows = bt * H
        return (0 if N // bt >= 2 else 1,
                0 if rows >= 128 else 1,
                rows)

    return min(cands, key=score)


def disc_block_forward(x_nhwc, kparams, *, downsample=True, block_batch=None,
                       out_dtype=None):
    N, H, W, Cin = x_nhwc.shape
    Cout = kparams["w1"].shape[-1] // W
    No = kparams["w2"].shape[-1]
    sc_conv = "w0" in kparams
    if downsample:
        assert H % 2 == 0 and W % 2 == 0
    Ho = H // 2 if downsample else H
    Wo = W // 2 if downsample else W
    assert No == Wo * Cout
    Bt = block_batch if block_batch is not None else _auto_block_batch(N, H)
    assert N % Bt == 0
    out_dtype = out_dtype or x_nhwc.dtype
    R = 1 + Bt * (H + 2)                 # rows of the flat padded scratches

    # bf16 activation DMA: halves HBM read bytes, and the MXU wants bf16 anyway.
    xf = x_nhwc.reshape(N, H, W * Cin).astype(jnp.bfloat16)

    kernel = functools.partial(
        _disc_block_kernel, H=H, W=W, Cin=Cin, Cout=Cout, Bt=Bt,
        downsample=downsample, sc_conv=sc_conv)

    def rep(arr):
        # Whole-array resident operand (constant index map -> fetched once).
        # TODO(synk): single-buffer these (pipeline_mode=pl.Buffered(1)) once
        # validated; matters for v7x's 64 MiB VMEM at production W*C sizes.
        nd = arr.ndim
        return pl.BlockSpec(arr.shape, lambda n, _nd=nd: (0,) * _nd)

    in_specs = [pl.BlockSpec((Bt, H, W * Cin), lambda n: (n, 0, 0)),
                rep(kparams["w1"]), rep(kparams["b1"]),
                rep(kparams["w2"]), rep(kparams["b2"])]
    args = [xf, kparams["w1"], kparams["b1"], kparams["w2"], kparams["b2"]]
    if sc_conv:
        in_specs += [rep(kparams["w0"]), rep(kparams["b0"])]
        args += [kparams["w0"], kparams["b0"]]

    # Explicit per-step VMEM budget: double-buffered x/out blocks, (currently
    # double-buffered) resident weights, both padded scratches, plus headroom.
    bytes_resident = sum(int(v.size) * v.dtype.itemsize for v in kparams.values())
    bytes_blocks = (2 * Bt * H * W * Cin * 2
                    + 2 * Bt * Ho * No * jnp.dtype(out_dtype).itemsize
                    + R * (W * Cin + W * Cout) * 2)
    vmem_limit = int(min(48 * 1024 * 1024,
                         max(32 * 1024 * 1024,
                             4 * (bytes_blocks + 2 * bytes_resident))))

    out = pl.pallas_call(
        kernel,
        out_shape=jax.ShapeDtypeStruct((N, Ho, No), out_dtype),
        grid=(N // Bt,),
        in_specs=in_specs,
        out_specs=pl.BlockSpec((Bt, Ho, No), lambda n: (n, 0, 0)),
        scratch_shapes=[pltpu.VMEM((R, W * Cin), jnp.bfloat16),
                        pltpu.VMEM((R, W * Cout), jnp.bfloat16)],
        compiler_params=pltpu.CompilerParams(
            dimension_semantics=("parallel",),
            vmem_limit_bytes=vmem_limit),
    )(*args)
    return out.reshape(N, Ho, Wo, Cout)


# ----------------------------------------------------------------------------
# Parameter setup glue (plain JAX): torch spectral_norm forward math
# ----------------------------------------------------------------------------
def _spectral_normalize(w_oihw, key, n_power_iterations=1, eps=1e-12):
    out_c = w_oihw.shape[0]
    wmat = w_oihw.reshape(out_c, -1)
    u = jax.random.normal(key, (out_c,), jnp.float32)
    u = u / (jnp.linalg.norm(u) + eps)
    v = None
    for _ in range(n_power_iterations):
        v = wmat.T @ u
        v = v / (jnp.linalg.norm(v) + eps)
        u = wmat @ v
        u = u / (jnp.linalg.norm(u) + eps)
    sigma = u @ (wmat @ v)
    return w_oihw / sigma


# ----------------------------------------------------------------------------
# Pure-JAX reference (correctness check only)
# ----------------------------------------------------------------------------
def _reference_forward(x, params, downsample=True):
    def conv(h, w, b, pad):
        y = jax.lax.conv_general_dilated(
            h, w, window_strides=(1, 1), padding=pad,
            dimension_numbers=("NHWC", "HWIO", "NHWC"))
        return y + b

    def avgpool2(h):
        s = jax.lax.reduce_window(h, 0.0, jax.lax.add,
                                  (1, 2, 2, 1), (1, 2, 2, 1), "VALID")
        return s * 0.25

    Cin, Cout = x.shape[-1], params["w1"].shape[-1]
    x0 = x
    h = jnp.maximum(x, 0.0)
    h = conv(h, params["w1"], params["b1"], ((1, 1), (1, 1)))
    h = jnp.maximum(h, 0.0)
    h = conv(h, params["w2"], params["b2"], ((1, 1), (1, 1)))
    if downsample:
        h = avgpool2(h)
    if downsample or Cin != Cout:
        x0 = conv(x0, params["w0"].reshape(1, 1, Cin, Cout),
                  params["b0"], ((0, 0), (0, 0)))
        if downsample:
            x0 = avgpool2(x0)
    return h + x0


# ----------------------------------------------------------------------------
if __name__ == "__main__":
    rb = lambda a: a.astype(jnp.bfloat16).astype(jnp.float32)

    # ---- config 1: downsample + channel mismatch (conv shortcut), Bt = 8 ----
    N, Cin, H, W, Cout = 16, 4, 16, 16, 8
    ks = jax.random.split(jax.random.PRNGKey(0), 10)
    x_nchw = rb(jax.random.normal(ks[0], (N, Cin, H, W), jnp.float32))
    w1 = 0.2 * jax.random.normal(ks[1], (Cout, Cin, 3, 3), jnp.float32)
    w2 = 0.2 * jax.random.normal(ks[2], (Cout, Cout, 3, 3), jnp.float32)
    w0 = 0.2 * jax.random.normal(ks[3], (Cout, Cin, 1, 1), jnp.float32)
    b1 = 0.05 * jax.random.normal(ks[4], (Cout,), jnp.float32)
    b2 = 0.05 * jax.random.normal(ks[5], (Cout,), jnp.float32)
    b0 = 0.05 * jax.random.normal(ks[6], (Cout,), jnp.float32)
    w1 = rb(_spectral_normalize(w1, ks[7]))
    w2 = rb(_spectral_normalize(w2, ks[8]))
    w0 = rb(_spectral_normalize(w0, ks[9]))

    w1_hwio = jnp.transpose(w1, (2, 3, 1, 0))
    w2_hwio = jnp.transpose(w2, (2, 3, 1, 0))
    w0_mat = jnp.transpose(w0, (2, 3, 1, 0)).reshape(Cin, Cout)
    x_nhwc = jnp.transpose(x_nchw, (0, 2, 3, 1))

    kp = prepare_disc_block_params(w1_hwio, b1, w2_hwio, b2, w0_mat, b0,
                                   W=W, downsample=True)
    # Bt=8 -> matmul M = Bt*H (+ slack) >= 128 rows, grid = 2 (both v7x cores).
    out = jax.block_until_ready(
        disc_block_forward(x_nhwc, kp, downsample=True, block_batch=8))
    ref = _reference_forward(
        x_nhwc, {"w1": w1_hwio, "b1": b1, "w2": w2_hwio, "b2": b2,
                 "w0": w0_mat, "b0": b0}, downsample=True)
    assert out.shape == (N, H // 2, W // 2, Cout), out.shape
    err = float(jnp.max(jnp.abs(out - ref)))
    scale = float(jnp.max(jnp.abs(ref)))
    assert err < 2e-2 + 2e-2 * scale, f"config1 mismatch: {err} (scale {scale})"

    # ---- config 2: identity-shortcut branch (Cin == Cout, no downsample) ----
    N2, C2 = 2, 8
    ks2 = jax.random.split(jax.random.PRNGKey(1), 7)
    x2_nchw = rb(jax.random.normal(ks2[0], (N2, C2, H, W), jnp.float32))
    w1b = rb(_spectral_normalize(
        0.2 * jax.random.normal(ks2[1], (C2, C2, 3, 3), jnp.float32), ks2[3]))
    w2b = rb(_spectral_normalize(
        0.2 * jax.random.normal(ks2[2], (C2, C2, 3, 3), jnp.float32), ks2[4]))
    b1b = 0.05 * jax.random.normal(ks2[5], (C2,), jnp.float32)
    b2b = 0.05 * jax.random.normal(ks2[6], (C2,), jnp.float32)
    w1b_hwio = jnp.transpose(w1b, (2, 3, 1, 0))
    w2b_hwio = jnp.transpose(w2b, (2, 3, 1, 0))
    x2_nhwc = jnp.transpose(x2_nchw, (0, 2, 3, 1))

    kp2 = prepare_disc_block_params(w1b_hwio, b1b, w2b_hwio, b2b,
                                    W=W, downsample=False)
    out2 = jax.block_until_ready(
        disc_block_forward(x2_nhwc, kp2, downsample=False))
    ref2 = _reference_forward(
        x2_nhwc, {"w1": w1b_hwio, "b1": b1b, "w2": w2b_hwio, "b2": b2b},
        downsample=False)
    assert out2.shape == (N2, H, W, C2), out2.shape
    err2 = float(jnp.max(jnp.abs(out2 - ref2)))
    scale2 = float(jnp.max(jnp.abs(ref2)))
    assert err2 < 2e-2 + 2e-2 * scale2, f"config2 mismatch: {err2} (scale {scale2})"

    print("KERNEL_OK")
</pallas_src>

<mosaic_0001>
module attributes {stable_mosaic.version = 11 : i64} {
  func.func @_disc_block_kernel(%arg0: i32, %arg1: memref<8x16x64xbf16, #tpu.memory_space<vmem>>, %arg2: memref<3x64x128xbf16, #tpu.memory_space<vmem>>, %arg3: memref<1x128xf32, #tpu.memory_space<vmem>>, %arg4: memref<3x128x64xbf16, #tpu.memory_space<vmem>>, %arg5: memref<1x64xf32, #tpu.memory_space<vmem>>, %arg6: memref<64x64xbf16, #tpu.memory_space<vmem>>, %arg7: memref<1x64xf32, #tpu.memory_space<vmem>>, %arg8: memref<8x8x64xf32, #tpu.memory_space<vmem>>, %arg9: memref<145x64xbf16, #tpu.memory_space<vmem>>, %arg10: memref<145x128xbf16, #tpu.memory_space<vmem>>) attributes {dimension_semantics = [#tpu.dimension_semantics<parallel>], iteration_bounds = array<i64: 2>, scalar_prefetch = 0 : i64, scratch_operands = 2 : i64, tpu.core_type = #tpu.core_type<tc>, window_params = [{transform_indices = @transform_0, window_bounds = array<i64: 8, 16, 64>}, {pipeline_mode = #tpu.pipeline_mode<synchronous>, transform_indices = @transform_1, window_bounds = array<i64: 3, 64, 128>}, {pipeline_mode = #tpu.pipeline_mode<synchronous>, transform_indices = @transform_2, window_bounds = array<i64: 1, 128>}, {pipeline_mode = #tpu.pipeline_mode<synchronous>, transform_indices = @transform_3, window_bounds = array<i64: 3, 128, 64>}, {pipeline_mode = #tpu.pipeline_mode<synchronous>, transform_indices = @transform_4, window_bounds = array<i64: 1, 64>}, {pipeline_mode = #tpu.pipeline_mode<synchronous>, transform_indices = @transform_5, window_bounds = array<i64: 64, 64>}, {pipeline_mode = #tpu.pipeline_mode<synchronous>, transform_indices = @transform_6, window_bounds = array<i64: 1, 64>}, {transform_indices = @transform_7, window_bounds = array<i64: 8, 8, 64>}]} {
    %c0 = arith.constant 0 : index
    %c0_0 = arith.constant 0 : index
    %c0_1 = arith.constant 0 : index
    %0 = vector.load %arg1[%c0, %c0_0, %c0_1] : memref<8x16x64xbf16, #tpu.memory_space<vmem>>, vector<8x16x64xbf16>
    %cst = arith.constant 0.000000e+00 : bf16
    %1 = vector.broadcast %cst : bf16 to vector<8x16x64xbf16>
    %2 = arith.maximumf %0, %1 : vector<8x16x64xbf16>
    %cst_2 = arith.constant 0.000000e+00 : bf16
    %3 = vector.broadcast %cst_2 : bf16 to vector<2x64xbf16>
    %cst_3 = arith.constant 0.000000e+00 : bf16
    %4 = vector.broadcast %cst_3 : bf16 to vector<2x128xbf16>
    %5 = vector.extract_strided_slice %3 {offsets = [0, 0], sizes = [1, 64], strides = [1, 1]} : vector<2x64xbf16> to vector<1x64xbf16>
    %c0_4 = arith.constant 0 : index
    %c0_5 = arith.constant 0 : index
    %6 = vector.load %arg9[%c0_4, %c0_5] : memref<145x64xbf16, #tpu.memory_space<vmem>>, vector<1x64xbf16>
    tpu.vector_store %arg9[%c0_4, %c0_5], %5 {strides = array<i32>} : memref<145x64xbf16, #tpu.memory_space<vmem>>, vector<1x64xbf16>,
    %7 = vector.extract_strided_slice %2 {offsets = [0, 0, 0], sizes = [1, 16, 64], strides = [1, 1, 1]} : vector<8x16x64xbf16> to vector<1x16x64xbf16>
    %8 = vector.shape_cast %7 : vector<1x16x64xbf16> to vector<16x64xbf16>
    %c1 = arith.constant 1 : index
    %c0_6 = arith.constant 0 : index
    %9 = vector.load %arg9[%c1, %c0_6] : memref<145x64xbf16, #tpu.memory_space<vmem>>, vector<16x64xbf16>
    tpu.vector_store %arg9[%c1, %c0_6], %8 {strides = array<i32>} : memref<145x64xbf16, #tpu.memory_space<vmem>>, vector<16x64xbf16>,
    %c17 = arith.constant 17 : index
    %c0_7 = arith.constant 0 : index
    %10 = vector.load %arg9[%c17, %c0_7] : memref<145x64xbf16, #tpu.memory_space<vmem>>, vector<2x64xbf16>
    tpu.vector_store %arg9[%c17, %c0_7], %3 {strides = array<i32>} : memref<145x64xbf16, #tpu.memory_space<vmem>>, vector<2x64xbf16>,
    %11 = vector.extract_strided_slice %2 {offsets = [1, 0, 0], sizes = [1, 16, 64], strides = [1, 1, 1]} : vector<8x16x64xbf16> to vector<1x16x64xbf16>
    %12 = vector.shape_cast %11 : vector<1x16x64xbf16> to vector<16x64xbf16>
    %c19 = arith.constant 19 : index
    %c0_8 = arith.constant 0 : index
    %13 = vector.load %arg9[%c19, %c0_8] : memref<145x64xbf16, #tpu.memory_space<vmem>>, vector<16x64xbf16>
    tpu.vector_store %arg9[%c19, %c0_8], %12 {strides = array<i32>} : memref<145x64xbf16, #tpu.memory_space<vmem>>, vector<16x64xbf16>,
    %c35 = arith.constant 35 : index
    %c0_9 = arith.constant 0 : index
    %14 = vector.load %arg9[%c35, %c0_9] : memref<145x64xbf16, #tpu.memory_space<vmem>>, vector<2x64xbf16>
    tpu.vector_store %arg9[%c35, %c0_9], %3 {strides = array<i32>} : memref<145x64xbf16, #tpu.memory_space<vmem>>, vector<2x64xbf16>,
    %15 = vector.extract_strided_slice %2 {offsets = [2, 0, 0], sizes = [1, 16, 64], strides = [1, 1, 1]} : vector<8x16x64xbf16> to vector<1x16x64xbf16>
    %16 = vector.shape_cast %15 : vector<1x16x64xbf16> to vector<16x64xbf16>
    %c37 = arith.constant 37 : index
    %c0_10 = arith.constant 0 : index
    %17 = vector.load %arg9[%c37, %c0_10] : memref<145x64xbf16, #tpu.memory_space<vmem>>, vector<16x64xbf16>
    tpu.vector_store %arg9[%c37, %c0_10], %16 {strides = array<i32>} : memref<145x64xbf16, #tpu.memory_space<vmem>>, vector<16x64xbf16>,
    %c53 = arith.constant 53 : index
    %c0_11 = arith.constant 0 : index
    %18 = vector.load %arg9[%c53, %c0_11] : memref<145x64xbf16, #tpu.memory_space<vmem>>, vector<2x64xbf16>
    tpu.vector_store %arg9[%c53, %c0_11], %3 {strides = array<i32>} : memref<145x64xbf16, #tpu.memory_space<vmem>>, vector<2x64xbf16>,
    %19 = vector.extract_strided_slice %2 {offsets = [3, 0, 0], sizes = [1, 16, 64], strides = [1, 1, 1]} : vector<8x16x64xbf16> to vector<1x16x64xbf16>
    %20 = vector.shape_cast %19 : vector<1x16x64xbf16> to vector<16x64xbf16>
    %c55 = arith.constant 55 : index
    %c0_12 = arith.constant 0 : index
    %21 = vector.load %arg9[%c55, %c0_12] : memref<145x64xbf16, #tpu.memory_space<vmem>>, vector<16x64xbf16>
    tpu.vector_store %arg9[%c55, %c0_12], %20 {strides = array<i32>} : memref<145x64xbf16, #tpu.memory_space<vmem>>, vector<16x64xbf16>,
    %c71 = arith.constant 71 : index
    %c0_13 = arith.constant 0 : index
    %22 = vector.load %arg9[%c71, %c0_13] : memref<145x64xbf16, #tpu.memory_space<vmem>>, vector<2x64xbf16>
    tpu.vector_store %arg9[%c71, %c0_13], %3 {strides = array<i32>} : memref<145x64xbf16, #tpu.memory_space<vmem>>, vector<2x64xbf16>,
    %23 = vector.extract_strided_slice %2 {offsets = [4, 0, 0], sizes = [1, 16, 64], strides = [1, 1, 1]} : vector<8x16x64xbf16> to vector<1x16x64xbf16>
    %24 = vector.shape_cast %23 : vector<1x16x64xbf16> to vector<16x64xbf16>
    %c73 = arith.constant 73 : index
    %c0_14 = arith.constant 0 : index
    %25 = vector.load %arg9[%c73, %c0_14] : memref<145x64xbf16, #tpu.memory_space<vmem>>, vector<16x64xbf16>
    tpu.vector_store %arg9[%c73, %c0_14], %24 {strides = array<i32>} : memref<145x64xbf16, #tpu.memory_space<vmem>>, vector<16x64xbf16>,
    %c89 = arith.constant 89 : index
    %c0_15 = arith.constant 0 : index
    %26 = vector.load %arg9[%c89, %c0_15] : memref<145x64xbf16, #tpu.memory_space<vmem>>, vector<2x64xbf16>
    tpu.vector_store %arg9[%c89, %c0_15], %3 {strides = array<i32>} : memref<145x64xbf16, #tpu.memory_space<vmem>>, vector<2x64xbf16>,
    %27 = vector.extract_strided_slice %2 {offsets = [5, 0, 0], sizes = [1, 16, 64], strides = [1, 1, 1]} : vector<8x16x64xbf16> to vector<1x16x64xbf16>
    %28 = vector.shape_cast %27 : vector<1x16x64xbf16> to vector<16x64xbf16>
    %c91 = arith.constant 91 : index
    %c0_16 = arith.constant 0 : index
    %29 = vector.load %arg9[%c91, %c0_16] : memref<145x64xbf16, #tpu.memory_space<vmem>>, vector<16x64xbf16>
    tpu.vector_store %arg9[%c91, %c0_16], %28 {strides = array<i32>} : memref<145x64xbf16, #tpu.memory_space<vmem>>, vector<16x64xbf16>,
    %c107 = arith.constant 107 : index
    %c0_17 = arith.constant 0 : index
    %30 = vector.load %arg9[%c107, %c0_17] : memref<145x64xbf16, #tpu.memory_space<vmem>>, vector<2x64xbf16>
    tpu.vector_store %arg9[%c107, %c0_17], %3 {strides = array<i32>} : memref<145x64xbf16, #tpu.memory_space<vmem>>, vector<2x64xbf16>,
    %31 = vector.extract_strided_slice %2 {offsets = [6, 0, 0], sizes = [1, 16, 64], strides = [1, 1, 1]} : vector<8x16x64xbf16> to vector<1x16x64xbf16>
    %32 = vector.shape_cast %31 : vector<1x16x64xbf16> to vector<16x64xbf16>
    %c109 = arith.constant 109 : index
    %c0_18 = arith.constant 0 : index
    %33 = vector.load %arg9[%c109, %c0_18] : memref<145x64xbf16, #tpu.memory_space<vmem>>, vector<16x64xbf16>
    tpu.vector_store %arg9[%c109, %c0_18], %32 {strides = array<i32>} : memref<145x64xbf16, #tpu.memory_space<vmem>>, vector<16x64xbf16>,
    %c125 = arith.constant 125 : index
    %c0_19 = arith.constant 0 : index
    %34 = vector.load %arg9[%c125, %c0_19] : memref<145x64xbf16, #tpu.memory_space<vmem>>, vector<2x64xbf16>
    tpu.vector_store %arg9[%c125, %c0_19], %3 {strides = array<i32>} : memref<145x64xbf16, #tpu.memory_space<vmem>>, vector<2x64xbf16>,
    %35 = vector.extract_strided_slice %2 {offsets = [7, 0, 0], sizes = [1, 16, 64], strides = [1, 1, 1]} : vector<8x16x64xbf16> to vector<1x16x64xbf16>
    %36 = vector.shape_cast %35 : vector<1x16x64xbf16> to vector<16x64xbf16>
    %c127 = arith.constant 127 : index
    %c0_20 = arith.constant 0 : index
    %37 = vector.load %arg9[%c127, %c0_20] : memref<145x64xbf16, #tpu.memory_space<vmem>>, vector<16x64xbf16>
    tpu.vector_store %arg9[%c127, %c0_20], %36 {strides = array<i32>} : memref<145x64xbf16, #tpu.memory_space<vmem>>, vector<16x64xbf16>,
    %c143 = arith.constant 143 : index
    %c0_21 = arith.constant 0 : index
    %38 = vector.load %arg9[%c143, %c0_21] : memref<145x64xbf16, #tpu.memory_space<vmem>>, vector<2x64xbf16>
    tpu.vector_store %arg9[%c143, %c0_21], %3 {strides = array<i32>} : memref<145x64xbf16, #tpu.memory_space<vmem>>, vector<2x64xbf16>,
    %c0_22 = arith.constant 0 : index
    %c0_23 = arith.constant 0 : index
    %39 = vector.load %arg9[%c0_22, %c0_23] : memref<145x64xbf16, #tpu.memory_space<vmem>>, vector<142x64xbf16>
    %c0_24 = arith.constant 0 : index
    %c0_25 = arith.constant 0 : index
    %c0_26 = arith.constant 0 : index
    %40 = vector.load %arg2[%c0_24, %c0_25, %c0_26] : memref<3x64x128xbf16, #tpu.memory_space<vmem>>, vector<1x64x128xbf16>
    %41 = vector.shape_cast %40 : vector<1x64x128xbf16> to vector<64x128xbf16>
    %cst_27 = arith.constant dense<0.000000e+00> : vector<142x128xf32>
    %42 = tpu.matmul %39, %41, %cst_27 {dimension_numbers = #tpu.dot_dimension_numbers<[1], [0], [0], [1], [0, 0, 1, 1], [], []>} : vector<142x64xbf16>, vector<64x128xbf16>, vector<142x128xf32> -> vector<142x128xf32>
    %c1_28 = arith.constant 1 : index
    %c0_29 = arith.constant 0 : index
    %43 = vector.load %arg9[%c1_28, %c0_29] : memref<145x64xbf16, #tpu.memory_space<vmem>>, vector<142x64xbf16>
    %c1_30 = arith.constant 1 : index
    %c0_31 = arith.constant 0 : index
    %c0_32 = arith.constant 0 : index
    %44 = vector.load %arg2[%c1_30, %c0_31, %c0_32] : memref<3x64x128xbf16, #tpu.memory_space<vmem>>, vector<1x64x128xbf16>
    %45 = vector.shape_cast %44 : vector<1x64x128xbf16> to vector<64x128xbf16>
    %cst_33 = arith.constant dense<0.000000e+00> : vector<142x128xf32>
    %46 = tpu.matmul %43, %45, %cst_33 {dimension_numbers = #tpu.dot_dimension_numbers<[1], [0], [0], [1], [0, 0, 1, 1], [], []>} : vector<142x64xbf16>, vector<64x128xbf16>, vector<142x128xf32> -> vector<142x128xf32>
    %47 = arith.addf %42, %46 : vector<142x128xf32>
    %c2 = arith.constant 2 : index
    %c0_34 = arith.constant 0 : index
    %48 = vector.load %arg9[%c2, %c0_34] : memref<145x64xbf16, #tpu.memory_space<vmem>>, vector<142x64xbf16>
    %c2_35 = arith.constant 2 : index
    %c0_36 = arith.constant 0 : index
    %c0_37 = arith.constant 0 : index
    %49 = vector.load %arg2[%c2_35, %c0_36, %c0_37] : memref<3x64x128xbf16, #tpu.memory_space<vmem>>, vector<1x64x128xbf16>
    %50 = vector.shape_cast %49 : vector<1x64x128xbf16> to vector<64x128xbf16>
    %cst_38 = arith.constant dense<0.000000e+00> : vector<142x128xf32>
    %51 = tpu.matmul %48, %50, %cst_38 {dimension_numbers = #tpu.dot_dimension_numbers<[1], [0], [0], [1], [0, 0, 1, 1], [], []>} : vector<142x64xbf16>, vector<64x128xbf16>, vector<142x128xf32> -> vector<142x128xf32>
    %52 = arith.addf %47, %51 : vector<142x128xf32>
    %c0_39 = arith.constant 0 : index
    %c0_40 = arith.constant 0 : index
    %53 = vector.load %arg3[%c0_39, %c0_40] : memref<1x128xf32, #tpu.memory_space<vmem>>, vector<1x128xf32>
    %54 = vector.broadcast %53 : vector<1x128xf32> to vector<142x128xf32>
    %55 = arith.addf %52, %54 : vector<142x128xf32>
    %cst_41 = arith.constant 0.000000e+00 : f32
    %56 = vector.broadcast %cst_41 : f32 to vector<142x128xf32>
    %57 = arith.maximumf %55, %56 : vector<142x128xf32>
    %58 = arith.truncf %57 : vector<142x128xf32> to vector<142x128xbf16>
    %c1_42 = arith.constant 1 : index
    %c0_43 = arith.constant 0 : index
    %59 = vector.load %arg10[%c1_42, %c0_43] : memref<145x128xbf16, #tpu.memory_space<vmem>>, vector<142x128xbf16>
    tpu.vector_store %arg10[%c1_42, %c0_43], %58 {strides = array<i32>} : memref<145x128xbf16, #tpu.memory_space<vmem>>, vector<142x128xbf16>,
    %60 = vector.extract_strided_slice %4 {offsets = [0, 0], sizes = [1, 128], strides = [1, 1]} : vector<2x128xbf16> to vector<1x128xbf16>
    %c0_44 = arith.constant 0 : index
    %c0_45 = arith.constant 0 : index
    %61 = vector.load %arg10[%c0_44, %c0_45] : memref<145x128xbf16, #tpu.memory_space<vmem>>, vector<1x128xbf16>
    tpu.vector_store %arg10[%c0_44, %c0_45], %60 {strides = array<i32>} : memref<145x128xbf16, #tpu.memory_space<vmem>>, vector<1x128xbf16>,
    %c17_46 = arith.constant 17 : index
    %c0_47 = arith.constant 0 : index
    %62 = vector.load %arg10[%c17_46, %c0_47] : memref<145x128xbf16, #tpu.memory_space<vmem>>, vector<2x128xbf16>
    tpu.vector_store %arg10[%c17_46, %c0_47], %4 {strides = array<i32>} : memref<145x128xbf16, #tpu.memory_space<vmem>>, vector<2x128xbf16>,
    %c35_48 = arith.constant 35 : index
    %c0_49 = arith.constant 0 : index
    %63 = vector.load %arg10[%c35_48, %c0_49] : memref<145x128xbf16, #tpu.memory_space<vmem>>, vector<2x128xbf16>
    tpu.vector_store %arg10[%c35_48, %c0_49], %4 {strides = array<i32>} : memref<145x128xbf16, #tpu.memory_space<vmem>>, vector<2x128xbf16>,
    %c53_50 = arith.constant 53 : index
    %c0_51 = arith.constant 0 : index
    %64 = vector.load %arg10[%c53_50, %c0_51] : memref<145x128xbf16, #tpu.memory_space<vmem>>, vector<2x128xbf16>
    tpu.vector_store %arg10[%c53_50, %c0_51], %4 {strides = array<i32>} : memref<145x128xbf16, #tpu.memory_space<vmem>>, vector<2x128xbf16>,
    %c71_52 = arith.constant 71 : index
    %c0_53 = arith.constant 0 : index
    %65 = vector.load %arg10[%c71_52, %c0_53] : memref<145x128xbf16, #tpu.memory_space<vmem>>, vector<2x128xbf16>
    tpu.vector_store %arg10[%c71_52, %c0_53], %4 {strides = array<i32>} : memref<145x128xbf16, #tpu.memory_space<vmem>>, vector<2x128xbf16>,
    %c89_54 = arith.constant 89 : index
    %c0_55 = arith.constant 0 : index
    %66 = vector.load %arg10[%c89_54, %c0_55] : memref<145x128xbf16, #tpu.memory_space<vmem>>, vector<2x128xbf16>
    tpu.vector_store %arg10[%c89_54, %c0_55], %4 {strides = array<i32>} : memref<145x128xbf16, #tpu.memory_space<vmem>>, vector<2x128xbf16>,
    %c107_56 = arith.constant 107 : index
    %c0_57 = arith.constant 0 : index
    %67 = vector.load %arg10[%c107_56, %c0_57] : memref<145x128xbf16, #tpu.memory_space<vmem>>, vector<2x128xbf16>
    tpu.vector_store %arg10[%c107_56, %c0_57], %4 {strides = array<i32>} : memref<145x128xbf16, #tpu.memory_space<vmem>>, vector<2x128xbf16>,
    %c125_58 = arith.constant 125 : index
    %c0_59 = arith.constant 0 : index
    %68 = vector.load %arg10[%c125_58, %c0_59] : memref<145x128xbf16, #tpu.memory_space<vmem>>, vector<2x128xbf16>
    tpu.vector_store %arg10[%c125_58, %c0_59], %4 {strides = array<i32>} : memref<145x128xbf16, #tpu.memory_space<vmem>>, vector<2x128xbf16>,
    %c143_60 = arith.constant 143 : index
    %c0_61 = arith.constant 0 : index
    %69 = vector.load %arg10[%c143_60, %c0_61] : memref<145x128xbf16, #tpu.memory_space<vmem>>, vector<2x128xbf16>
    tpu.vector_store %arg10[%c143_60, %c0_61], %4 {strides = array<i32>} : memref<145x128xbf16, #tpu.memory_space<vmem>>, vector<2x128xbf16>,
    %c0_62 = arith.constant 0 : index
    %c0_63 = arith.constant 0 : index
    %70 = vector.load %arg10[%c0_62, %c0_63] : memref<145x128xbf16, #tpu.memory_space<vmem>>, vector<142x128xbf16>
    %c0_64 = arith.constant 0 : index
    %c0_65 = arith.constant 0 : index
    %c0_66 = arith.constant 0 : index
    %71 = vector.load %arg4[%c0_64, %c0_65, %c0_66] : memref<3x128x64xbf16, #tpu.memory_space<vmem>>, vector<1x128x64xbf16>
    %72 = vector.shape_cast %71 : vector<1x128x64xbf16> to vector<128x64xbf16>
    %cst_67 = arith.constant dense<0.000000e+00> : vector<142x64xf32>
    %73 = tpu.matmul %70, %72, %cst_67 {dimension_numbers = #tpu.dot_dimension_numbers<[1], [0], [0], [1], [0, 0, 1, 1], [], []>} : vector<142x128xbf16>, vector<128x64xbf16>, vector<142x64xf32> -> vector<142x64xf32>
    %c1_68 = arith.constant 1 : index
    %c0_69 = arith.constant 0 : index
    %74 = vector.load %arg10[%c1_68, %c0_69] : memref<145x128xbf16, #tpu.memory_space<vmem>>, vector<142x128xbf16>
    %c1_70 = arith.constant 1 : index
    %c0_71 = arith.constant 0 : index
    %c0_72 = arith.constant 0 : index
    %75 = vector.load %arg4[%c1_70, %c0_71, %c0_72] : memref<3x128x64xbf16, #tpu.memory_space<vmem>>, vector<1x128x64xbf16>
    %76 = vector.shape_cast %75 : vector<1x128x64xbf16> to vector<128x64xbf16>
    %cst_73 = arith.constant dense<0.000000e+00> : vector<142x64xf32>
    %77 = tpu.matmul %74, %76, %cst_73 {dimension_numbers = #tpu.dot_dimension_numbers<[1], [0], [0], [1], [0, 0, 1, 1], [], []>} : vector<142x128xbf16>, vector<128x64xbf16>, vector<142x64xf32> -> vector<142x64xf32>
    %78 = arith.addf %73, %77 : vector<142x64xf32>
    %c2_74 = arith.constant 2 : index
    %c0_75 = arith.constant 0 : index
    %79 = vector.load %arg10[%c2_74, %c0_75] : memref<145x128xbf16, #tpu.memory_space<vmem>>, vector<142x128xbf16>
    %c2_76 = arith.constant 2 : index
    %c0_77 = arith.constant 0 : index
    %c0_78 = arith.constant 0 : index
    %80 = vector.load %arg4[%c2_76, %c0_77, %c0_78] : memref<3x128x64xbf16, #tpu.memory_space<vmem>>, vector<1x128x64xbf16>
    %81 = vector.shape_cast %80 : vector<1x128x64xbf16> to vector<128x64xbf16>
    %cst_79 = arith.constant dense<0.000000e+00> : vector<142x64xf32>
    %82 = tpu.matmul %79, %81, %cst_79 {dimension_numbers = #tpu.dot_dimension_numbers<[1], [0], [0], [1], [0, 0, 1, 1], [], []>} : vector<142x128xbf16>, vector<128x64xbf16>, vector<142x64xf32> -> vector<142x64xf32>
    %83 = arith.addf %78, %82 : vector<142x64xf32>
    %c0_80 = arith.constant 0 : index
    %c0_81 = arith.constant 0 : index
    %84 = vector.load %arg5[%c0_80, %c0_81] : memref<1x64xf32, #tpu.memory_space<vmem>>, vector<1x64xf32>
    %85 = vector.broadcast %84 : vector<1x64xf32> to vector<142x64xf32>
    %86 = arith.addf %83, %85 : vector<142x64xf32>
    %87 = vector.shape_cast %0 : vector<8x16x64xbf16> to vector<128x64xbf16>
    %c0_82 = arith.constant 0 : index
    %c0_83 = arith.constant 0 : index
    %88 = vector.load %arg6[%c0_82, %c0_83] : memref<64x64xbf16, #tpu.memory_space<vmem>>, vector<64x64xbf16>
    %cst_84 = arith.constant dense<0.000000e+00> : vector<128x64xf32>
    %89 = tpu.matmul %87, %88, %cst_84 {dimension_numbers = #tpu.dot_dimension_numbers<[1], [0], [0], [1], [0, 0, 1, 1], [], []>} : vector<128x64xbf16>, vector<64x64xbf16>, vector<128x64xf32> -> vector<128x64xf32>
    %c0_85 = arith.constant 0 : index
    %c0_86 = arith.constant 0 : index
    %90 = vector.load %arg7[%c0_85, %c0_86] : memref<1x64xf32, #tpu.memory_space<vmem>>, vector<1x64xf32>
    %91 = vector.broadcast %90 : vector<1x64xf32> to vector<128x64xf32>
    %92 = arith.addf %89, %91 : vector<128x64xf32>
    %93 = vector.extract_strided_slice %86 {offsets = [0, 0], sizes = [16, 64], strides = [1, 1]} : vector<142x64xf32> to vector<16x64xf32>
    %94 = vector.extract_strided_slice %92 {offsets = [0, 0], sizes = [16, 64], strides = [1, 1]} : vector<128x64xf32> to vector<16x64xf32>
    %95 = arith.addf %93, %94 : vector<16x64xf32>
    %96 = vector.shape_cast %95 : vector<16x64xf32> to vector<8x2x64xf32>
    %97 = vector.extract_strided_slice %96 {offsets = [0, 0, 0], sizes = [8, 1, 64], strides = [1, 1, 1]} : vector<8x2x64xf32> to vector<8x1x64xf32>
    %98 = vector.shape_cast %97 : vector<8x1x64xf32> to vector<8x64xf32>
    %99 = vector.extract_strided_slice %96 {offsets = [0, 1, 0], sizes = [8, 1, 64], strides = [1, 1, 1]} : vector<8x2x64xf32> to vector<8x1x64xf32>
    %100 = vector.shape_cast %99 : vector<8x1x64xf32> to vector<8x64xf32>
    %101 = arith.addf %98, %100 : vector<8x64xf32>
    %cst_87 = arith.constant 5.000000e-01 : f32
    %102 = vector.broadcast %cst_87 : f32 to vector<8x64xf32>
    %103 = arith.mulf %101, %102 : vector<8x64xf32>
    %c0_88 = arith.constant 0 : index
    %c0_89 = arith.constant 0 : index
    %c0_90 = arith.constant 0 : index
    %104 = vector.load %arg8[%c0_88, %c0_89, %c0_90] : memref<8x8x64xf32, #tpu.memory_space<vmem>>, vector<1x8x64xf32>
    %105 = vector.shape_cast %104 : vector<1x8x64xf32> to vector<8x64xf32>
    %106 = vector.shape_cast %103 : vector<8x64xf32> to vector<1x8x64xf32>
    tpu.vector_store %arg8[%c0_88, %c0_89, %c0_90], %106 {strides = array<i32>} : memref<8x8x64xf32, #tpu.memory_space<vmem>>, vector<1x8x64xf32>,
    %107 = vector.extract_strided_slice %86 {offsets = [18, 0], sizes = [16, 64], strides = [1, 1]} : vector<142x64xf32> to vector<16x64xf32>
    %108 = vector.extract_strided_slice %92 {offsets = [16, 0], sizes = [16, 64], strides = [1, 1]} : vector<128x64xf32> to vector<16x64xf32>
    %109 = arith.addf %107, %108 : vector<16x64xf32>
    %110 = vector.shape_cast %109 : vector<16x64xf32> to vector<8x2x64xf32>
    %111 = vector.extract_strided_slice %110 {offsets = [0, 0, 0], sizes = [8, 1, 64], strides = [1, 1, 1]} : vector<8x2x64xf32> to vector<8x1x64xf32>
    %112 = vector.shape_cast %111 : vector<8x1x64xf32> to vector<8x64xf32>
    %113 = vector.extract_strided_slice %110 {offsets = [0, 1, 0], sizes = [8, 1, 64], strides = [1, 1, 1]} : vector<8x2x64xf32> to vector<8x1x64xf32>
    %114 = vector.shape_cast %113 : vector<8x1x64xf32> to vector<8x64xf32>
    %115 = arith.addf %112, %114 : vector<8x64xf32>
    %cst_91 = arith.constant 5.000000e-01 : f32
    %116 = vector.broadcast %cst_91 : f32 to vector<8x64xf32>
    %117 = arith.mulf %115, %116 : vector<8x64xf32>
    %c1_92 = arith.constant 1 : index
    %c0_93 = arith.constant 0 : index
    %c0_94 = arith.constant 0 : index
    %118 = vector.load %arg8[%c1_92, %c0_93, %c0_94] : memref<8x8x64xf32, #tpu.memory_space<vmem>>, vector<1x8x64xf32>
    %119 = vector.shape_cast %118 : vector<1x8x64xf32> to vector<8x64xf32>
    %120 = vector.shape_cast %117 : vector<8x64xf32> to vector<1x8x64xf32>
    tpu.vector_store %arg8[%c1_92, %c0_93, %c0_94], %120 {strides = array<i32>} : memref<8x8x64xf32, #tpu.memory_space<vmem>>, vector<1x8x64xf32>,
    %121 = vector.extract_strided_slice %86 {offsets = [36, 0], sizes = [16, 64], strides = [1, 1]} : vector<142x64xf32> to vector<16x64xf32>
    %122 = vector.extract_strided_slice %92 {offsets = [32, 0], sizes = [16, 64], strides = [1, 1]} : vector<128x64xf32> to vector<16x64xf32>
    %123 = arith.addf %121, %122 : vector<16x64xf32>
    %124 = vector.shape_cast %123 : vector<16x64xf32> to vector<8x2x64xf32>
    %125 = vector.extract_strided_slice %124 {offsets = [0, 0, 0], sizes = [8, 1, 64], strides = [1, 1, 1]} : vector<8x2x64xf32> to vector<8x1x64xf32>
    %126 = vector.shape_cast %125 : vector<8x1x64xf32> to vector<8x64xf32>
    %127 = vector.extract_strided_slice %124 {offsets = [0, 1, 0], sizes = [8, 1, 64], strides = [1, 1, 1]} : vector<8x2x64xf32> to vector<8x1x64xf32>
    %128 = vector.shape_cast %127 : vector<8x1x64xf32> to vector<8x64xf32>
    %129 = arith.addf %126, %128 : vector<8x64xf32>
    %cst_95 = arith.constant 5.000000e-01 : f32
    %130 = vector.broadcast %cst_95 : f32 to vector<8x64xf32>
    %131 = arith.mulf %129, %130 : vector<8x64xf32>
    %c2_96 = arith.constant 2 : index
    %c0_97 = arith.constant 0 : index
    %c0_98 = arith.constant 0 : index
    %132 = vector.load %arg8[%c2_96, %c0_97, %c0_98] : memref<8x8x64xf32, #tpu.memory_space<vmem>>, vector<1x8x64xf32>
    %133 = vector.shape_cast %132 : vector<1x8x64xf32> to vector<8x64xf32>
    %134 = vector.shape_cast %131 : vector<8x64xf32> to vector<1x8x64xf32>
    tpu.vector_store %arg8[%c2_96, %c0_97, %c0_98], %134 {strides = array<i32>} : memref<8x8x64xf32, #tpu.memory_space<vmem>>, vector<1x8x64xf32>,
    %135 = vector.extract_strided_slice %86 {offsets = [54, 0], sizes = [16, 64], strides = [1, 1]} : vector<142x64xf32> to vector<16x64xf32>
    %136 = vector.extract_strided_slice %92 {offsets = [48, 0], sizes = [16, 64], strides = [1, 1]} : vector<128x64xf32> to vector<16x64xf32>
    %137 = arith.addf %135, %136 : vector<16x64xf32>
    %138 = vector.shape_cast %137 : vector<16x64xf32> to vector<8x2x64xf32>
    %139 = vector.extract_strided_slice %138 {offsets = [0, 0, 0], sizes = [8, 1, 64], strides = [1, 1, 1]} : vector<8x2x64xf32> to vector<8x1x64xf32>
    %140 = vector.shape_cast %139 : vector<8x1x64xf32> to vector<8x64xf32>
    %141 = vector.extract_strided_slice %138 {offsets = [0, 1, 0], sizes = [8, 1, 64], strides = [1, 1, 1]} : vector<8x2x64xf32> to vector<8x1x64xf32>
    %142 = vector.shape_cast %141 : vector<8x1x64xf32> to vector<8x64xf32>
    %143 = arith.addf %140, %142 : vector<8x64xf32>
    %cst_99 = arith.constant 5.000000e-01 : f32
    %144 = vector.broadcast %cst_99 : f32 to vector<8x64xf32>
    %145 = arith.mulf %143, %144 : vector<8x64xf32>
    %c3 = arith.constant 3 : index
    %c0_100 = arith.constant 0 : index
    %c0_101 = arith.constant 0 : index
    %146 = vector.load %arg8[%c3, %c0_100, %c0_101] : memref<8x8x64xf32, #tpu.memory_space<vmem>>, vector<1x8x64xf32>
    %147 = vector.shape_cast %146 : vector<1x8x64xf32> to vector<8x64xf32>
    %148 = vector.shape_cast %145 : vector<8x64xf32> to vector<1x8x64xf32>
    tpu.vector_store %arg8[%c3, %c0_100, %c0_101], %148 {strides = array<i32>} : memref<8x8x64xf32, #tpu.memory_space<vmem>>, vector<1x8x64xf32>,
    %149 = vector.extract_strided_slice %86 {offsets = [72, 0], sizes = [16, 64], strides = [1, 1]} : vector<142x64xf32> to vector<16x64xf32>
    %150 = vector.extract_strided_slice %92 {offsets = [64, 0], sizes = [16, 64], strides = [1, 1]} : vector<128x64xf32> to vector<16x64xf32>
    %151 = arith.addf %149, %150 : vector<16x64xf32>
    %152 = vector.shape_cast %151 : vector<16x64xf32> to vector<8x2x64xf32>
    %153 = vector.extract_strided_slice %152 {offsets = [0, 0, 0], sizes = [8, 1, 64], strides = [1, 1, 1]} : vector<8x2x64xf32> to vector<8x1x64xf32>
    %154 = vector.shape_cast %153 : vector<8x1x64xf32> to vector<8x64xf32>
    %155 = vector.extract_strided_slice %152 {offsets = [0, 1, 0], sizes = [8, 1, 64], strides = [1, 1, 1]} : vector<8x2x64xf32> to vector<8x1x64xf32>
    %156 = vector.shape_cast %155 : vector<8x1x64xf32> to vector<8x64xf32>
    %157 = arith.addf %154, %156 : vector<8x64xf32>
    %cst_102 = arith.constant 5.000000e-01 : f32
    %158 = vector.broadcast %cst_102 : f32 to vector<8x64xf32>
    %159 = arith.mulf %157, %158 : vector<8x64xf32>
    %c4 = arith.constant 4 : index
    %c0_103 = arith.constant 0 : index
    %c0_104 = arith.constant 0 : index
    %160 = vector.load %arg8[%c4, %c0_103, %c0_104] : memref<8x8x64xf32, #tpu.memory_space<vmem>>, vector<1x8x64xf32>
    %161 = vector.shape_cast %160 : vector<1x8x64xf32> to vector<8x64xf32>
    %162 = vector.shape_cast %159 : vector<8x64xf32> to vector<1x8x64xf32>
    tpu.vector_store %arg8[%c4, %c0_103, %c0_104], %162 {strides = array<i32>} : memref<8x8x64xf32, #tpu.memory_space<vmem>>, vector<1x8x64xf32>,
    %163 = vector.extract_strided_slice %86 {offsets = [90, 0], sizes = [16, 64], strides = [1, 1]} : vector<142x64xf32> to vector<16x64xf32>
    %164 = vector.extract_strided_slice %92 {offsets = [80, 0], sizes = [16, 64], strides = [1, 1]} : vector<128x64xf32> to vector<16x64xf32>
    %165 = arith.addf %163, %164 : vector<16x64xf32>
    %166 = vector.shape_cast %165 : vector<16x64xf32> to vector<8x2x64xf32>
    %167 = vector.extract_strided_slice %166 {offsets = [0, 0, 0], sizes = [8, 1, 64], strides = [1, 1, 1]} : vector<8x2x64xf32> to vector<8x1x64xf32>
    %168 = vector.shape_cast %167 : vector<8x1x64xf32> to vector<8x64xf32>
    %169 = vector.extract_strided_slice %166 {offsets = [0, 1, 0], sizes = [8, 1, 64], strides = [1, 1, 1]} : vector<8x2x64xf32> to vector<8x1x64xf32>
    %170 = vector.shape_cast %169 : vector<8x1x64xf32> to vector<8x64xf32>
    %171 = arith.addf %168, %170 : vector<8x64xf32>
    %cst_105 = arith.constant 5.000000e-01 : f32
    %172 = vector.broadcast %cst_105 : f32 to vector<8x64xf32>
    %173 = arith.mulf %171, %172 : vector<8x64xf32>
    %c5 = arith.constant 5 : index
    %c0_106 = arith.constant 0 : index
    %c0_107 = arith.constant 0 : index
    %174 = vector.load %arg8[%c5, %c0_106, %c0_107] : memref<8x8x64xf32, #tpu.memory_space<vmem>>, vector<1x8x64xf32>
    %175 = vector.shape_cast %174 : vector<1x8x64xf32> to vector<8x64xf32>
    %176 = vector.shape_cast %173 : vector<8x64xf32> to vector<1x8x64xf32>
    tpu.vector_store %arg8[%c5, %c0_106, %c0_107], %176 {strides = array<i32>} : memref<8x8x64xf32, #tpu.memory_space<vmem>>, vector<1x8x64xf32>,
    %177 = vector.extract_strided_slice %86 {offsets = [108, 0], sizes = [16, 64], strides = [1, 1]} : vector<142x64xf32> to vector<16x64xf32>
    %178 = vector.extract_strided_slice %92 {offsets = [96, 0], sizes = [16, 64], strides = [1, 1]} : vector<128x64xf32> to vector<16x64xf32>
    %179 = arith.addf %177, %178 : vector<16x64xf32>
    %180 = vector.shape_cast %179 : vector<16x64xf32> to vector<8x2x64xf32>
    %181 = vector.extract_strided_slice %180 {offsets = [0, 0, 0], sizes = [8, 1, 64], strides = [1, 1, 1]} : vector<8x2x64xf32> to vector<8x1x64xf32>
    %182 = vector.shape_cast %181 : vector<8x1x64xf32> to vector<8x64xf32>
    %183 = vector.extract_strided_slice %180 {offsets = [0, 1, 0], sizes = [8, 1, 64], strides = [1, 1, 1]} : vector<8x2x64xf32> to vector<8x1x64xf32>
    %184 = vector.shape_cast %183 : vector<8x1x64xf32> to vector<8x64xf32>
    %185 = arith.addf %182, %184 : vector<8x64xf32>
    %cst_108 = arith.constant 5.000000e-01 : f32
    %186 = vector.broadcast %cst_108 : f32 to vector<8x64xf32>
    %187 = arith.mulf %185, %186 : vector<8x64xf32>
    %c6 = arith.constant 6 : index
    %c0_109 = arith.constant 0 : index
    %c0_110 = arith.constant 0 : index
    %188 = vector.load %arg8[%c6, %c0_109, %c0_110] : memref<8x8x64xf32, #tpu.memory_space<vmem>>, vector<1x8x64xf32>
    %189 = vector.shape_cast %188 : vector<1x8x64xf32> to vector<8x64xf32>
    %190 = vector.shape_cast %187 : vector<8x64xf32> to vector<1x8x64xf32>
    tpu.vector_store %arg8[%c6, %c0_109, %c0_110], %190 {strides = array<i32>} : memref<8x8x64xf32, #tpu.memory_space<vmem>>, vector<1x8x64xf32>,
    %191 = vector.extract_strided_slice %86 {offsets = [126, 0], sizes = [16, 64], strides = [1, 1]} : vector<142x64xf32> to vector<16x64xf32>
    %192 = vector.extract_strided_slice %92 {offsets = [112, 0], sizes = [16, 64], strides = [1, 1]} : vector<128x64xf32> to vector<16x64xf32>
    %193 = arith.addf %191, %192 : vector<16x64xf32>
    %194 = vector.shape_cast %193 : vector<16x64xf32> to vector<8x2x64xf32>
    %195 = vector.extract_strided_slice %194 {offsets = [0, 0, 0], sizes = [8, 1, 64], strides = [1, 1, 1]} : vector<8x2x64xf32> to vector<8x1x64xf32>
    %196 = vector.shape_cast %195 : vector<8x1x64xf32> to vector<8x64xf32>
    %197 = vector.extract_strided_slice %194 {offsets = [0, 1, 0], sizes = [8, 1, 64], strides = [1, 1, 1]} : vector<8x2x64xf32> to vector<8x1x64xf32>
    %198 = vector.shape_cast %197 : vector<8x1x64xf32> to vector<8x64xf32>
    %199 = arith.addf %196, %198 : vector<8x64xf32>
    %cst_111 = arith.constant 5.000000e-01 : f32
    %200 = vector.broadcast %cst_111 : f32 to vector<8x64xf32>
    %201 = arith.mulf %199, %200 : vector<8x64xf32>
    %c7 = arith.constant 7 : index
    %c0_112 = arith.constant 0 : index
    %c0_113 = arith.constant 0 : index
    %202 = vector.load %arg8[%c7, %c0_112, %c0_113] : memref<8x8x64xf32, #tpu.memory_space<vmem>>, vector<1x8x64xf32>
    %203 = vector.shape_cast %202 : vector<1x8x64xf32> to vector<8x64xf32>
    %204 = vector.shape_cast %201 : vector<8x64xf32> to vector<1x8x64xf32>
    tpu.vector_store %arg8[%c7, %c0_112, %c0_113], %204 {strides = array<i32>} : memref<8x8x64xf32, #tpu.memory_space<vmem>>, vector<1x8x64xf32>,
    return
  }
  func.func @transform_0(%arg0: i32) -> (i32, i32, i32) {
    %c0_i32 = arith.constant 0 : i32
    %c0_i32_0 = arith.constant 0 : i32
    %c0_i32_1 = arith.constant 0 : i32
    return %arg0, %c0_i32, %c0_i32_0 : i32, i32, i32
  }
  func.func @transform_1(%arg0: i32) -> (i32, i32, i32) {
    %c0_i32 = arith.constant 0 : i32
    %c0_i32_0 = arith.constant 0 : i32
    %c0_i32_1 = arith.constant 0 : i32
    %c0_i32_2 = arith.constant 0 : i32
    return %c0_i32, %c0_i32_0, %c0_i32_1 : i32, i32, i32
  }
  func.func @transform_2(%arg0: i32) -> (i32, i32) {
    %c0_i32 = arith.constant 0 : i32
    %c0_i32_0 = arith.constant 0 : i32
    %c0_i32_1 = arith.constant 0 : i32
    return %c0_i32, %c0_i32_0 : i32, i32
  }
  func.func @transform_3(%arg0: i32) -> (i32, i32, i32) {
    %c0_i32 = arith.constant 0 : i32
    %c0_i32_0 = arith.constant 0 : i32
    %c0_i32_1 = arith.constant 0 : i32
    %c0_i32_2 = arith.constant 0 : i32
    return %c0_i32, %c0_i32_0, %c0_i32_1 : i32, i32, i32
  }
  func.func @transform_4(%arg0: i32) -> (i32, i32) {
    %c0_i32 = arith.constant 0 : i32
    %c0_i32_0 = arith.constant 0 : i32
    %c0_i32_1 = arith.constant 0 : i32
    return %c0_i32, %c0_i32_0 : i32, i32
  }
  func.func @transform_5(%arg0: i32) -> (i32, i32) {
    %c0_i32 = arith.constant 0 : i32
    %c0_i32_0 = arith.constant 0 : i32
    %c0_i32_1 = arith.constant 0 : i32
    return %c0_i32, %c0_i32_0 : i32, i32
  }
  func.func @transform_6(%arg0: i32) -> (i32, i32) {
    %c0_i32 = arith.constant 0 : i32
    %c0_i32_0 = arith.constant 0 : i32
    %c0_i32_1 = arith.constant 0 : i32
    return %c0_i32, %c0_i32_0 : i32, i32
  }
  func.func @transform_7(%arg0: i32) -> (i32, i32, i32) {
    %c0_i32 = arith.constant 0 : i32
    %c0_i32_0 = arith.constant 0 : i32
    %c0_i32_1 = arith.constant 0 : i32
    return %arg0, %c0_i32, %c0_i32_0 : i32, i32, i32
  }
}

</mosaic_0001>

<bundles_post_ra>
// kernel: tpu_custom_call.1
= control target key start
LH: loop header
LB: loop body
LE: loop exit
PB: predicated region body
PF: predicated region fallthrough
CT: control target
= control target key end

     0   :  { %12 = vsyncpa [#allocation5], 0  ;;  %s4702_s0 = inlined_call_operand.vmem [shape: bf16[16,16,64], index: 0, kind: input, shape index: {}]   ;;  %s4703_s1 = inlined_call_operand.vmem [shape: bf16[3,64,128], index: 1, kind: input, shape index: {}]   ;;  %s4704_s2 = inlined_call_operand.vmem [shape: f32[1,128], index: 2, kind: input, shape index: {}]   ;;  %s4705_s3 = inlined_call_operand.vmem [shape: bf16[3,128,64], index: 3, kind: input, shape index: {}]   ;;  %s4706_s4 = inlined_call_operand.vmem [shape: f32[1,64], index: 4, kind: input, shape index: {}]   ;;  %s4707_s5 = inlined_call_operand.vmem [shape: bf16[64,64], index: 5, kind: input, shape index: {}]   ;;  %s4708_s6 = inlined_call_operand.vmem [shape: f32[1,64], index: 6, kind: input, shape index: {}]   ;;  %s4709_s7 = inlined_call_operand.hbm [shape: f32[16,8,64], index: 7, kind: output, shape index: {}]  }
   0x1   :  { %14 = vsyncpa [#allocation5 + $0x1], 0  ;;  %s3748_s24 = smov 0   ;;  %s3750_s25 = smov 0  }
   0x2   :  { %s3752_s26 = smov 0   ;;  %s3754_s27 = smov 0  }
   0x3 LB: > { %s3769_s28 = sadd.s32 4294967295, %s3704_s27   ;;  %s3083_s29 = sadd.s32 4294967294, %s3704_s27   ;;  %s3704_s27 = sphi %s3754_s27, %s4782_s27   ;;  %s3700_s26 = sphi %s3752_s26, %s4781_s26   ;;  %s3696_s25 = sphi %s3750_s25, %s4780_s25   ;;  %s3692_s24 = sphi %s3748_s24, %s4779_s24  }
   0x4   : > { %s3773_s30 = sadd.s32 1, %s3704_s27   ;;  %s179_s8 = sadd.s32 1, %s3700_s26 }
   0x5   : > { %s176_s9 = ssub.s32 %s3704_s27, %s3773_s30  ;;  %p189_p0 = scmp.ne.s32.totalorder %s3700_s26, %s3696_s25 }
   0x6   : > { %p177_p1 = scmp.eq.s32.totalorder %s176_s9, 0  ;;  %p190_p2 = scmp.eq.s32.totalorder %s3769_s28, 1 }
   0x7   : > { %p195_p3 = scmp.ne.s32.totalorder %s3696_s25, %s3692_s24  ;;  %p196_p4 = scmp.eq.s32.totalorder %s3083_s29, 1 }
   0x8   : > { %s3784_s10 = scalar_select %p177_p1, %s3700_s26, %s179_s8  }
   0x9   : > { %p3786_p5 = por %p190_p2, %p189_p0  ;;  %p3790_p6 = por %p196_p4, %p195_p3 }
   0xa   : > { %p3086_p7 = scmp.ge.s32.totalorder %s3704_s27, 1  ;;  %p242_p8 = scmp.lt.s32.totalorder %s3704_s27, 3 }
   0xc   : > { %p243_p9 = pnand %p3086_p7, %p242_p8 }
   0xd   : > { %s3088_s17 = sshll.u32 (!%p243_p9), %s3769_s28, 3  ;;  %s272_s29 = sand.u32 (!%p243_p9), 1, %s3696_s25  }
   0xe   : > { %246 = sbr.rel (%p243_p9) target bundleno = 587 (0x24b), region = 48  ;;  %p276_p10 = scmp.lt.s32.totalorder (!%p243_p9), %s3088_s17, 15 }
   0xf   : > { %s3087_s8 = sshll.u32 (!%p243_p9), %s272_s29, 6  ;;  %s3561_s13 = sshll.u32 (!%p243_p9), %s3769_s28, 6 }
  0x10   : > { %s4490_s9 = scalar_lea.vmem (!%p243_p9), [#allocation4], %s3087_s8  ;;  %s3017_s28 = scalar_lea.hbm (!%p243_p9), %s4709_s7, %s3561_s13 }
  0x11   : > { %s3020_s18 = sshll.u32 (!%p243_p9), %s3017_s28, 4  ;;  %s3006_s19 = scalar_lea.sflag (!%p243_p9), [#allocation5], %s272_s29  ;;  %s3021_s18 = int_to_ptr.hbm [resolvable:$true] %s3020_s18 }
  0x12   : > { %s3654_s20 = sshra.s32 (!%p243_p9), %s3021_s18, 4  ;;  %s3660_s23 = scalar_lea.hbm (!%p243_p9), %s4709_s7, 128  ;;  %s3655_s20 = int_to_ptr.hbm [resolvable:$true] %s3654_s20 }
  0x13   : > { %v3525_v0 = vld [vmem:[%s4703_s1 + $0x58] sm:$0xff]  ;;  %vm348_vm0 = vcmask 516096   ;;  %vm4713_vm1 = vsmask.f32 256  ;;  %v3524_v2 = vld [vmem:[%s4703_s1 + $0x50] sm:$0xff]  ;;  %s4784_s17 = smov (!%p276_p10, %s3088_s17), 15  ;;  %p3661_p0 = scmp.lt.s32.totalorder %s3655_s20, %s4709_s7 }
  0x14   : > { %v3521_v1 = vld [vmem:[%s4703_s1 + $0x38] sm:$0xff]  ;;  %1093 = vmatpush.bf16.msra.mxu2 %v3525_v0  ;;  %v3520_v3 = vld [vmem:[%s4703_s1 + $0x30] sm:$0xff]  ;;  %vm3810_vm2 = vmand %vm348_vm0, %vm4713_vm1  ;;  %s3498_s22 = sshll.u32 %s4784_s17, 3  ;;  %vm354_vm3 = vsmask.f32 4368  ;;  %vm4714_vm4 = vcmask 519168  }
  0x15   : > { %857 = vmatpush.bf16.msra.mxu0 %v3521_v1  ;;  %v351_v5 = vld [vmem:[#allocation2] sm:$0x1]  ;;  %3576 = vmatpush.bf16.msra.mxu3 %v3521_v1  ;;  %s3825_s15 = scalar_lea.vmem %s4702_s0, %s3498_s22  ;;  %v3522_v11 = vld [vmem:[%s4703_s1 + $0x40] sm:$0xff]  ;;  %vm4711_vm5 = vsmask.f32 7938  ;;  %vm3846_vm8 = vmor %vm4713_vm1, %vm354_vm3  ;;  %vm387_vm10 = vcmask 517120  }
  0x16   : > { %v352_v6 = vsel %vm3810_vm2, 0, %v351_v5  ;;  %v3523_v7 = vld [vmem:[%s4703_s1 + $0x48] sm:$0xff]  ;;  %v284_v9 = vld [vmem:[%s3825_s15] sm:$0xff]   ;;  %v288_v18 = vld [vmem:[%s3825_s15 + $0x10] sm:$0xff]   ;;  %vm393_vm6 = vsmask.f32 1280 }
  0x17   : > { %353 = vst [vmem:[#allocation2] sm:$0x1] %v352_v6  ;;  %v3519_v8 = vld [vmem:[%s4703_s1 + $0x28] sm:$0xff]  ;;  %v3518_v12 = vld [vmem:[%s4703_s1 + $0x20] sm:$0xff]  ;;  %v300_v14 = vunpack.c.l.bf16 %v284_v9  ;;  %v301_v15 = vunpack.c.h.bf16 %v284_v9  ;;  %v645_v21 = vld [vmem:[#allocation2 + $0x48] sm:$0x1]  ;;  %v305_v22 = vunpack.c.h.bf16 %v288_v18  ;;  %v304_v30 = vunpack.c.l.bf16 %v288_v18 }
  0x18   : > { %1094 = vmatpush.bf16.msra.mxu2 %v3524_v2  ;;  %v286_v10 = vld [vmem:[%s3825_s15 + $0x8] sm:$0xff]   ;;  %v3836_v13 = vld [vmem:[%s3825_s15 + $0x20] sm:$0xff]   ;;  %v646_v29 = vsel %vm3810_vm2, 0, %v645_v21  ;;  %vm394_vm7 = vsmask.f32 5392  ;;  %vm3852_vm9 = vmand %vm4714_vm4, %vm4711_vm5  ;;  %vm429_vm14 = vcmask 518145  }
  0x19   : > { %858 = vmatpush.bf16.msra.mxu0 %v3520_v3  ;;  %3577 = vmatpush.bf16.msra.mxu3 %v3520_v3  ;;  %v302_v16 = vunpack.c.l.bf16 %v286_v10  ;;  %v303_v17 = vunpack.c.h.bf16 %v286_v10  ;;  %v308_v19 = vunpack.c.l.bf16 %v3836_v13  ;;  %v516_v20 = vld [vmem:[#allocation2 + $0x24] sm:$0x1]  ;;  %v316_v23 = vmax.f32 %v300_v14, 0.0  ;;  %647 = vst [vmem:[#allocation2 + $0x48] sm:$0x1] %v646_v29  ;;  %vm3868_vm11 = vmor %vm393_vm6, %vm394_vm7  ;;  %v3517_v18 = vld [vmem:[%s4703_s1 + $0x18] sm:$0xff] }
  0x1a   : > { %v317_v24 = vmax.f32 %v301_v15, 0.0  ;;  %v517_v28 = vsel %vm3810_vm2, 0, %v516_v20  ;;  %v320_v36 = vmax.f32 %v304_v30, 0.0  ;;  %v321_v37 = vmax.f32 %v305_v22, 0.0  ;;  %v384_v49 = vld [vmem:[#allocation2 + $0x8] sm:$0x1]  ;;  %vm3876_vm12 = vmand %vm387_vm10, %vm393_vm6  ;;  %3580 = vmatpush.bf16.msra.mxu1 %v3517_v18 }
  0x1b   : > { %v318_v25 = vmax.f32 %v302_v16, 0.0  ;;  %v319_v26 = vmax.f32 %v303_v17, 0.0  ;;  %v324_v27 = vmax.f32 %v308_v19, 0.0  ;;  %v332_v31 = vpack.c.bf16 %v316_v23, %v316_v23  ;;  %518 = vst [vmem:[#allocation2 + $0x24] sm:$0x1] %v517_v28  ;;  %v3516_v20 = vld [vmem:[%s4703_s1 + $0x10] sm:$0xff] }
  0x1c   : > { %1095 = vmatpush.bf16.msra.mxu2 %v3523_v7  ;;  %v333_v32 = vpack.c.bf16 %v317_v24, %v317_v24  ;;  %v336_v9 = vpack.c.bf16 %v320_v36, %v320_v36  ;;  %v337_v14 = vpack.c.bf16 %v321_v37, %v321_v37  ;;  %vm4710_vm13 = vsmask.f32 1282  ;;  %v298_v5 = vld [vmem:[%s3825_s15 + $0x38] sm:$0xff]   ;;  %s3018_s17 = sshll.u32 %s4490_s9, 4  ;;  %s3019_s17 = int_to_ptr.vmem [resolvable:$true] %s3018_s17 }
  0x1d   : > { %859 = vmatpush.bf16.msra.mxu0 %v3519_v8  ;;  %3578 = vmatpush.bf16.msra.mxu3 %v3519_v8  ;;  %v334_v33 = vpack.c.bf16 %v318_v25, %v318_v25  ;;  %v335_v34 = vpack.c.bf16 %v319_v26, %v319_v26  ;;  %v340_v35 = vpack.c.bf16 %v324_v27, %v324_v27  ;;  %v357_v38 = vshrl.u32 %v332_v31, 16  ;;  %vm3897_vm6 = vmand %vm387_vm10, %vm4710_vm13 }
  0x1e   : > { %v360_v39 = vshll.u32 %v332_v31, 16  ;;  %v365_v40 = vshrl.u32 %v333_v32, 16  ;;  %v368_v41 = vshll.u32 %v333_v32, 16  ;;  %v379_v53 = vld [vmem:[#allocation2] sm:$0xf]  ;;  %v439_v22 = vshrl.u32 %v336_v9, 16  ;;  %3581 = vmatpush.bf16.msra.mxu1 %v3516_v20 }
  0x1f   : > { %v397_v42 = vshrl.u32 %v334_v33, 16  ;;  %v400_v43 = vshll.u32 %v334_v33, 16  ;;  %v406_v44 = vshrl.u32 %v335_v34, 16  ;;  %v409_v45 = vshll.u32 %v335_v34, 16 }
  0x20   : > { %1096 = vmatpush.bf16.msra.mxu2 %v3522_v11  ;;  %v359_v47 = vrot.slane %v357_v38, 7  ;;  %v367_v48 = vrot.slane %v365_v40, 7  ;;  %v520_v50 = vshrl.u32 %v340_v35, 16  ;;  %v523_v51 = vshll.u32 %v340_v35, 16  ;;  %v426_v11 = vld [vmem:[#allocation2 + $0x10] sm:$0x3] }
  0x21   : > { %860 = vmatpush.bf16.msra.mxu0 %v3518_v12  ;;  %3579 = vmatpush.bf16.msra.mxu3 %v3518_v12  ;;  %v399_v54 = vrot.slane %v397_v42, 6  ;;  %v402_v55 = vrot.slane %v400_v43, 7  ;;  %v408_v56 = vrot.slane %v406_v44, 6  ;;  %v411_v57 = vrot.slane %v409_v45, 7  ;;  %v290_v12 = vld [vmem:[%s3825_s15 + $0x18] sm:$0xff]  }
  0x22   : > { %v362_v58 = vor.u32 %v360_v39, %v359_v47  ;;  %v363_v59 = vrot.slane %v359_v47, 4  ;;  %v370_v60 = vor.u32 %v368_v41, %v367_v48  ;;  %v372_v61 = vrot.slane %v367_v48, 4  ;;  %v539_v6 = vld [vmem:[#allocation2 + $0x24] sm:$0xf]  ;;  %v469_v41 = vld [vmem:[#allocation2 + $0x18] sm:$0x7] }
  0x23   : > { %v3856_v62 = vor.u32 %v402_v55, %v399_v54  ;;  %v412_v63 = vor.u32 %v411_v57, %v408_v56  ;;  %v3858_v0 = vrot.slane %v520_v50, 7  ;;  %v306_v19 = vunpack.c.l.bf16 %v290_v12 }
  0x24   : > { %v371_v1 = vsel %vm3846_vm8, %v363_v59, %v370_v60  ;;  %v380_v2 = vsel %vm3852_vm9, %v362_v58, %v379_v53  ;;  %v385_v3 = vsel %vm3810_vm2, %v372_v61, %v384_v49  ;;  %v442_v23 = vshll.u32 %v336_v9, 16 }
  0x25   : > { %381 = vst [vmem:[#allocation2] sm:$0xf] %v380_v2  ;;  %v404_v7 = vrot.slane %v3856_v62, 4  ;;  %v525_v8 = vor.u32 %v523_v51, %v3858_v0  ;;  %v414_v15 = vrot.slane %v412_v63, 4  ;;  %957 = vmatpush.bf16.msrb.mxu0 %v3517_v18  ;;  %vm436_vm15 = vsmask.f32 6416 }
  0x26   : > { %383 = vst.msk [vmem:[#allocation2 + $0x4] sm:$0xf] %vm4714_vm4, %v371_v1  ;;  %v448_v24 = vshrl.u32 %v337_v14, 16  ;;  %v451_v25 = vshll.u32 %v337_v14, 16  ;;  %v441_v26 = vrot.slane %v439_v22, 5  ;;  %v444_v27 = vrot.slane %v442_v23, 6 }
  0x27   : > { %386 = vst [vmem:[#allocation2 + $0x8] sm:$0x1] %v385_v3  ;;  %v413_v16 = vsel %vm3868_vm11, %v404_v7, %v412_v63  ;;  %v540_v17 = vsel %vm3852_vm9, %v525_v8, %v539_v6  ;;  %v427_v21 = vsel %vm3876_vm12, %v414_v15, %v426_v11  ;;  %v307_v28 = vunpack.c.h.bf16 %v290_v12  ;;  %v3515_v6 = vld [vmem:[%s4703_s1 + $0x8] sm:$0xff] }
  0x28   : > { %424 = vst.msk [vmem:[#allocation2 + $0xc] sm:$0xf] %vm4714_vm4, %v413_v16  ;;  %v322_v29 = vmax.f32 %v306_v19, 0.0  ;;  %vm435_vm0 = vsmask.f32 2304  ;;  %v450_v30 = vrot.slane %v448_v24, 5  ;;  %v3901_v33 = vor.u32 %v444_v27, %v441_v26  ;;  %3582 = vmatpush.bf16.msra.mxu1 %v3515_v6 }
  0x29   : > { %541 = vst [vmem:[#allocation2 + $0x24] sm:$0xf] %v540_v17  ;;  %v453_v31 = vrot.slane %v451_v25, 6  ;;  %vm467_vm3 = vcmask 518144   ;;  %vm4712_vm7 = vsmask.f32 2310  ;;  %958 = vmatpush.bf16.msrb.mxu0 %v3516_v20  ;;  %vm3905_vm9 = vmor %vm435_vm0, %vm436_vm15  ;;  %v309_v2 = vunpack.c.h.bf16 %v3836_v13 }
  0x2a   : > { %428 = vst [vmem:[#allocation2 + $0x10] sm:$0x3] %v427_v21  ;;  %v323_v34 = vmax.f32 %v307_v28, 0.0  ;;  %v338_v35 = vpack.c.bf16 %v322_v29, %v322_v29  ;;  %v4734_v36 = vmov 0  ;;  %v446_v39 = vrot.slane %v3901_v33, 4  ;;  %vm3911_vm10 = vmand %vm467_vm3, %vm435_vm0  ;;  %v3514_v17 = vld [vmem:[%s4703_s1] sm:$0xff] }
  0x2b   : > { %v4735_v36 = vsel %vm3905_vm9, 4294967295, %v4734_v36  ;;  %v454_v37 = vor.u32 %v453_v31, %v450_v30  ;;  %vm3919_vm15 = vmand %vm429_vm14, %vm4712_vm7  ;;  %vm418_vm13 = vcmask 519169   ;;  %vm419_vm5 = vsmask.f32 7942  ;;  %v510_v24 = vld [vmem:[#allocation2 + $0x20] sm:$0xf] }
  0x2c   : > { %v339_v44 = vpack.c.bf16 %v323_v34, %v323_v34  ;;  %v481_v47 = vshll.u32 %v338_v35, 16  ;;  %v484_v49 = vshrl.u32 %v338_v35, 16  ;;  %vm4716_vm14 = vsmask.f32 3328  ;;  %vm3933_vm3 = vmand %vm418_vm13, %vm419_vm5  ;;  %v3571_v11 = vld [vmem:[#allocation2] sm:$0xe]  ;;  %3583 = vmatpush.bf16.msra.mxu1 %v3514_v17 }
  0x2d   : > { %v456_v45 = vrot.slane %v454_v37, 4  ;;  %v455_v48 = vsel %vm3905_vm9, %v446_v39, %v454_v37  ;;  %vm478_vm0 = vsmask.f32 7440  ;;  %vm4717_vm7 = vsmask.f32 3338  ;;  %v3943_v61 = vld [vmem:[#allocation2] sm:$0xff]   ;;  %959 = vmatpush.bf16.msrb.mxu0 %v3515_v6 }
  0x2e   : > { %v390_v38 = vld [vmem:[#allocation2 + $0x8] sm:$0x3]  ;;  %466 = vst.msk [vmem:[#allocation2 + $0x14] sm:$0xf] %vm4714_vm4, %v455_v48  ;;  %v3928_v52 = vrot.slane %v481_v47, 5  ;;  %v490_v53 = vshll.u32 %v339_v44, 16  ;;  %vm3939_vm9 = vmor %vm4716_vm14, %vm478_vm0  ;;  %v315_v12 = vunpack.c.h.bf16 %v298_v5 }
  0x2f   : > { %v391_v42 = vsel %vm3897_vm6, 0, %v390_v38  ;;  %v470_v51 = vsel %vm3911_vm10, %v456_v45, %v469_v41  ;;  %v486_v55 = vrot.slane %v484_v49, 4  ;;  %v494_v59 = vshrl.u32 %v339_v44, 16  ;;  %v3570_v9 = vld [vmem:[#allocation2] sm:$0xf0]  ;;  %v3548_v34 = vld [vmem:[%s4705_s3 + $0x78] sm:$0xff] }
  0x30   : > { %392 = vst [vmem:[#allocation2 + $0x8] sm:$0x3] %v391_v42  ;;  %v492_v58 = vrot.slane %v490_v53, 5  ;;  %vm460_vm1 = vcmask 519170   ;;  %vm461_vm4 = vsmask.f32 7946  ;;  %v3572_v25 = vor.u32 %v3571_v11, %v3570_v9  ;;  %1690 = vmatpush.bf16.msrb.mxu3 %v3548_v34 }
  0x31   : > { %v432_v50 = vld [vmem:[#allocation2 + $0x10] sm:$0x6]  ;;  %471 = vst [vmem:[#allocation2 + $0x18] sm:$0x7] %v470_v51  ;;  %v487_v57 = vor.u32 %v486_v55, %v3928_v52  ;;  %v4742_v60 = vmov 0  ;;  %v496_v1 = vrot.slane %v494_v59, 4  ;;  %vm3950_vm5 = vmand %vm460_vm1, %vm4717_vm7  ;;  %960 = vmatpush.bf16.msrb.mxu0 %v3514_v17 }
  0x32   : > { %v433_v54 = vsel %vm3919_vm15, 0, %v432_v50  ;;  %v4743_v60 = vsel %vm3939_vm9, 4294967295, %v4742_v60  ;;  %vm3957_vm13 = vmand %vm460_vm1, %vm461_vm4  ;;  %v325_v15 = vmax.f32 %v309_v2, 0.0  ;;  %v733_v16 = vshll.u32 %v3943_v61, 16  ;;  %v543_v37 = vld [vmem:[#allocation2 + $0x2c] sm:$0x1] }
  0x33   : > { %434 = vst [vmem:[#allocation2 + $0x10] sm:$0x6] %v433_v54  ;;  %v488_v63 = vrot.slane %v487_v57, 4  ;;  %v497_v14 = vor.u32 %v496_v1, %v492_v58  ;;  %vm4748_vm1 = vcmask 519168   ;;  %v4750_v21 = vmov 0  ;;  %v294_v48 = vld [vmem:[%s3825_s15 + $0x28] sm:$0xff]  }
  0x34   : > { %vm4749_vm4 = vmmov %vm4748_vm1  ;;  %v3976_v22 = vpack.c.bf16 %v325_v15, %v325_v15  ;;  %v731_v28 = vshrl.u32 %v3943_v61, 16  ;;  %v735_v29 = vrot.slane %v733_v16, 1  ;;  %vm825_vm7 = vcmask 523264  }
  0x35   : > { %v493_v13 = vsel %vm3939_vm9, %v488_v63, %v492_v58  ;;  %v498_v20 = vrot.slane %v497_v14, 4  ;;  %vm3972_vm0 = vmand %vm4749_vm4, %vm4716_vm14  ;;  %vm503_vm4 = vsmask.f32 7950  ;;  %vm1020_vm9 = vcmask 1046528  }
  0x36   : > { %508 = vst.msk [vmem:[#allocation2 + $0x1c] sm:$0xf] %vm4748_vm1, %v493_v13  ;;  %v4751_v21 = vsel %vm3972_vm0, 4294967295, %v4750_v21  ;;  %v528_v27 = vshrl.u32 %v3976_v22, 16  ;;  %vm502_vm1 = vcmask 519171   ;;  %v736_v39 = vor.u32 %v735_v29, %v731_v28 }
  0x37   : > { %v421_v3 = vld [vmem:[#allocation2 + $0x8] sm:$0xe]  ;;  %v511_v26 = vsel %vm3972_vm0, %v498_v20, %v510_v24  ;;  %vm3990_vm14 = vmand %vm502_vm1, %vm503_vm4  ;;  %vm729_vm0 = vsmask.f32 7424  ;;  %v311_v53 = vunpack.c.h.bf16 %v294_v48  ;;  %v310_v57 = vunpack.c.l.bf16 %v294_v48 }
  0x38   : > { %v422_v8 = vsel %vm3933_vm3, %v3856_v62, %v421_v3  ;;  %v474_v62 = vld [vmem:[#allocation2 + $0x18] sm:$0xc]  ;;  %512 = vst [vmem:[#allocation2 + $0x20] sm:$0xf] %v511_v26  ;;  %v3985_v30 = vrot.slane %v528_v27, 7  ;;  %vm1397_vm1 = vcmask 1043456  }
  0x39   : > { %423 = vst [vmem:[#allocation2 + $0x8] sm:$0xe] %v422_v8  ;;  %v475_v19 = vsel %vm3950_vm5, 0, %v474_v62  ;;  %v326_v63 = vmax.f32 %v310_v57, 0.0 }
  0x3a   : > { %v463_v18 = vld [vmem:[#allocation2 + $0x10] sm:$0xc]  ;;  %476 = vst [vmem:[#allocation2 + $0x18] sm:$0xc] %v475_v19  ;;  %v535_v35 = vrot.slane %v3985_v30, 4 }
  0x3b   : > { %v464_v23 = vsel %vm3957_vm13, %v3901_v33, %v463_v18  ;;  %v1021_v33 = vrot.slane %v3572_v25, 1  ;;  %v342_v13 = vpack.c.bf16 %v326_v63, %v326_v63  ;;  %v531_v25 = vshll.u32 %v3976_v22, 16 }
  0x3c   : > { %465 = vst [vmem:[#allocation2 + $0x10] sm:$0xc] %v464_v23  ;;  %v544_v44 = vsel %vm3810_vm2, %v535_v35, %v543_v37  ;;  %v526_v35 = vrot.slane %v3858_v0, 4  ;;  %vm4754_vm2 = vcmask 519168  }
  0x3d   : > { %545 = vst [vmem:[#allocation2 + $0x2c] sm:$0x1] %v544_v44  ;;  %v550_v18 = vshrl.u32 %v342_v13, 16  ;;  %v553_v19 = vshll.u32 %v342_v13, 16  ;;  %v533_v37 = vor.u32 %v531_v25, %v3985_v30  ;;  %v296_v44 = vld [vmem:[%s3825_s15 + $0x30] sm:$0xff]  }
  0x3e   : > { %v313_v0 = vunpack.c.h.bf16 %v296_v44 }
  0x3f   : > { %v513_v51 = vld [vmem:[#allocation2 + $0x20] sm:$0x8]  ;;  %v552_v26 = vrot.slane %v550_v18, 6  ;;  %v555_v32 = vrot.slane %v553_v19, 7 }
  0x40   : > { %v3987_v31 = vld [vmem:[#allocation2 + $0x8] sm:$0xff]  ;;  %v514_v4 = vsel %vm3990_vm14, 0, %v513_v51  ;;  %v329_v10 = vmax.f32 %v313_v0, 0.0 }
  0x41   : > { %v1022_v38 = vrot.slane %v3987_v31, 1  ;;  %v738_v41 = vshll.u32 %v3987_v31, 16  ;;  %v505_v42 = vld [vmem:[#allocation2 + $0x18] sm:$0x8]  ;;  %515 = vst [vmem:[#allocation2 + $0x20] sm:$0x8] %v514_v4 }
  0x42   : > { %v506_v47 = vsel %vm3990_vm14, %v3928_v52, %v505_v42  ;;  %v327_v52 = vmax.f32 %v311_v53, 0.0  ;;  %v742_v6 = vshrl.u32 %v3987_v31, 16 }
  0x43   : > { %v3999_v45 = vld [vmem:[#allocation2 + $0x10] sm:$0xff]  ;;  %v1023_v49 = vsel %vm1020_vm9, %v1021_v33, %v1022_v38  ;;  %v740_v50 = vrot.slane %v738_v41, 1  ;;  %507 = vst [vmem:[#allocation2 + $0x18] sm:$0x8] %v506_v47 }
  0x44   : > { %3201 = vmatmul.msk.bf16.vlgmr.msra.gmra.mxu2 %vm825_vm7, %v1023_v49  ;;  %3170 = vmatmul.msk.bf16.vlgmr.msra.gmra.mxu1 %vm825_vm7, %v3999_v45  ;;  %v746_v55 = vshll.u32 %v3999_v45, 16  ;;  %v343_v58 = vpack.c.bf16 %v327_v52, %v327_v52  ;;  %v750_v59 = vshrl.u32 %v3999_v45, 16  ;;  %v546_v1 = vld [vmem:[#allocation2 + $0x2c] sm:$0x3]  ;;  %v1024_v16 = vrot.slane %v3999_v45, 1 }
  0x45   : > { %v741_v54 = vsel %vm729_vm0, %v736_v39, %v740_v50  ;;  %v547_v11 = vsel %vm3897_vm6, 0, %v546_v1  ;;  %v744_v23 = vor.u32 %v742_v6, %v740_v50  ;;  %v575_v33 = vld [vmem:[#allocation2 + $0x34] sm:$0x3]  ;;  %v556_v39 = vor.u32 %v555_v32, %v552_v26  ;;  %vm4757_vm6 = vmmov %vm4754_vm2 }
  0x46   : > { %3143 = vmatmul.msk.bf16.vlgmr.msra.gmra.mxu0 %vm825_vm7, %v741_v54  ;;  %v559_v2 = vshrl.u32 %v343_v58, 16  ;;  %v562_v3 = vshll.u32 %v343_v58, 16  ;;  %v748_v8 = vrot.slane %v746_v55, 1  ;;  %548 = vst [vmem:[#allocation2 + $0x2c] sm:$0x3] %v547_v11  ;;  %v1025_v28 = vsel %vm1020_vm9, %v1022_v38, %v1024_v16 }
  0x47   : > { %v534_v45 = vsel %vm3846_vm8, %v526_v35, %v533_v37  ;;  %v312_v49 = vunpack.c.l.bf16 %v296_v44  ;;  %v345_v50 = vpack.c.bf16 %v329_v10, %v329_v10  ;;  %v557_v43 = vrot.slane %v556_v39, 4 }
  0x48   : > { %v561_v14 = vrot.slane %v559_v2, 6  ;;  %v564_v15 = vrot.slane %v562_v3, 7  ;;  %v752_v17 = vor.u32 %v750_v59, %v748_v8  ;;  %v4030_v42 = vld [vmem:[#allocation2 + $0x20] sm:$0xff]  ;;  %v749_v38 = vsel %vm729_vm0, %v744_v23, %v748_v8  ;;  %542 = vst.msk [vmem:[#allocation2 + $0x28] sm:$0xf] %vm4754_vm2, %v534_v45 }
  0x49   : > { %v762_v48 = vshll.u32 %v4030_v42, 16  ;;  %v328_v56 = vmax.f32 %v312_v49, 0.0  ;;  %v591_v53 = vshrl.u32 %v345_v50, 16  ;;  %v594_v4 = vshll.u32 %v345_v50, 16  ;;  %v639_v50 = vld [vmem:[#allocation2 + $0x44] sm:$0xf] }
  0x4a   : > { %v4016_v9 = vld [vmem:[#allocation2 + $0x18] sm:$0xff]  ;;  %v565_v20 = vor.u32 %v564_v15, %v561_v14  ;;  %v766_v40 = vshrl.u32 %v4030_v42, 16 }
  0x4b   : > { %v754_v62 = vshll.u32 %v4016_v9, 16  ;;  %v758_v30 = vshrl.u32 %v4016_v9, 16  ;;  %v764_v52 = vrot.slane %v762_v48, 1  ;;  %v344_v57 = vpack.c.bf16 %v328_v56, %v328_v56  ;;  %v607_v14 = vld [vmem:[#allocation2 + $0x3c] sm:$0x7] }
  0x4c   : > { %v567_v27 = vrot.slane %v565_v20, 4  ;;  %v593_v58 = vrot.slane %v591_v53, 5  ;;  %v596_v59 = vrot.slane %v594_v4, 6  ;;  %v1026_v63 = vrot.slane %v4016_v9, 1 }
  0x4d   : > { %v756_v24 = vrot.slane %v754_v62, 1  ;;  %v571_v22 = vld [vmem:[#allocation2 + $0x2c] sm:$0xe]  ;;  %v582_v1 = vshrl.u32 %v344_v57, 16  ;;  %v585_v2 = vshll.u32 %v344_v57, 16  ;;  %v566_v19 = vsel %vm3868_vm11, %v557_v43, %v565_v20 }
  0x4e   : > { %v576_v41 = vsel %vm3876_vm12, %v567_v27, %v575_v33  ;;  %v572_v47 = vsel %vm3933_vm3, %v556_v39, %v571_v22  ;;  %v597_v3 = vor.u32 %v596_v59, %v593_v58  ;;  %v1027_v15 = vsel %vm1020_vm9, %v1024_v16, %v1026_v63  ;;  %vm4755_vm12 = vmmov %vm4754_vm2 }
  0x4f   : > { %v757_v29 = vsel %vm729_vm0, %v752_v17, %v756_v24  ;;  %577 = vst [vmem:[#allocation2 + $0x34] sm:$0x3] %v576_v41  ;;  %v760_v54 = vor.u32 %v758_v30, %v756_v24  ;;  %v584_v8 = vrot.slane %v582_v1, 5  ;;  %v587_v11 = vrot.slane %v585_v2, 6  ;;  %vm4760_vm3 = vmmov %vm4754_vm2 }
  0x50   : > { %3145 = vmatmul.msk.bf16.vlgmr.msra.gmra.mxu3 %vm825_vm7, %v757_v29  ;;  %573 = vst [vmem:[#allocation2 + $0x2c] sm:$0xe] %v572_v47  ;;  %v599_v13 = vrot.slane %v597_v3, 4  ;;  %v314_v20 = vunpack.c.l.bf16 %v298_v5  ;;  %v768_v25 = vor.u32 %v766_v40, %v764_v52  ;;  %v1028_v29 = vrot.slane %v4030_v42, 1 }
  0x51   : > { %v765_v6 = vsel %vm729_vm0, %v760_v54, %v764_v52  ;;  %v588_v17 = vor.u32 %v587_v11, %v584_v8  ;;  %574 = vst.msk [vmem:[#allocation2 + $0x30] sm:$0xf] %vm4755_vm12, %v566_v19  ;;  %vm4756_vm11 = vnez %v4735_v36  ;;  %vm4764_vm2 = vsmask.f32 7938 }
  0x52   : > { %v608_v62 = vsel %vm3911_vm10, %v599_v13, %v607_v14  ;;  %v330_v27 = vmax.f32 %v314_v20, 0.0  ;;  %v1029_v22 = vsel %vm1020_vm9, %v1026_v63, %v1028_v29  ;;  %vm4758_vm10 = vnez %v4751_v21  ;;  %v3555_v20 = vld [vmem:[%s4705_s3 + $0xb0] sm:$0xff]  ;;  %vm4222_vm12 = vmand %vm1397_vm1, %vm4764_vm2 }
  0x53   : > { %609 = vst [vmem:[#allocation2 + $0x3c] sm:$0x7] %v608_v62  ;;  %v589_v44 = vrot.slane %v588_v17, 4  ;;  %v3547_v62 = vld [vmem:[%s4705_s3 + $0x70] sm:$0xff]  ;;  %vm4773_vm2 = vsmask.f32 2310 }
  0x54   : > { %3202 = vmatmul.msk.bf16.gmra.mxu2 %vm825_vm7, %v1025_v28  ;;  %3171 = vmatmul.msk.bf16.gmra.mxu1 %vm825_vm7, %v4016_v9  ;;  %v331_v28 = vmax.f32 %v315_v12, 0.0  ;;  %v346_v33 = vpack.c.bf16 %v330_v27, %v330_v27 }
  0x55   : > { %1691 = vmatpush.bf16.msrb.mxu3 %v3547_v62 }
  0x56   : > { %3144 = vmatmul.msk.bf16.gmra.mxu0 %vm825_vm7, %v749_v38  ;;  %v578_v51 = vld [vmem:[#allocation2 + $0x34] sm:$0x6]  ;;  %v614_v37 = vshll.u32 %v346_v33, 16 }
  0x57   : > { %v579_v55 = vsel %vm3919_vm15, 0, %v578_v51  ;;  %v4053_v9 = vld [vmem:[#allocation2 + $0x28] sm:$0xff]  ;;  %v617_v51 = vshrl.u32 %v346_v33, 16  ;;  %vm4759_vm15 = vnez %v4743_v60  ;;  %v4101_v60 = vld [vmem:[%s4707_s5 + $0x18] sm:$0xff] }
  0x58   : > { %580 = vst [vmem:[#allocation2 + $0x34] sm:$0x6] %v579_v55  ;;  %v770_v16 = vshll.u32 %v4053_v9, 16  ;;  %v616_v38 = vrot.slane %v614_v37, 5  ;;  %v774_v49 = vshrl.u32 %v4053_v9, 16  ;;  %v1030_v55 = vrot.slane %v4053_v9, 1  ;;  %3584 = vmatpush.bf16.msrb.mxu2 %v4101_v60 }
  0x59   : > { %v619_v54 = vrot.slane %v617_v51, 4 }
  0x5a   : > { %v610_v24 = vld [vmem:[#allocation2 + $0x3c] sm:$0xc]  ;;  %v772_v26 = vrot.slane %v770_v16, 1  ;;  %v1031_v21 = vsel %vm1020_vm9, %v1028_v29, %v1030_v55  ;;  %v3554_v29 = vld [vmem:[%s4705_s3 + $0xa8] sm:$0xff] }
  0x5b   : > { %v611_v32 = vsel %vm3950_vm5, 0, %v610_v24  ;;  %v620_v52 = vor.u32 %v619_v54, %v616_v38  ;;  %vm4761_vm5 = vsmask.f32 256  ;;  %v3552_v54 = vld [vmem:[%s4705_s3 + $0x98] sm:$0xff] }
  0x5c   : > { %612 = vst [vmem:[#allocation2 + $0x3c] sm:$0xc] %v611_v32  ;;  %v773_v35 = vsel %vm729_vm0, %v768_v25, %v772_v26  ;;  %v776_v53 = vor.u32 %v774_v49, %v772_v26  ;;  %v3546_v25 = vld [vmem:[%s4705_s3 + $0x68] sm:$0xff]  ;;  %v4132_v32 = vld [vmem:[%s4707_s5 + $0x10] sm:$0xff] }
  0x5d   : > { %v621_v58 = vrot.slane %v620_v52, 4  ;;  %1692 = vmatpush.bf16.msrb.mxu3 %v3546_v25  ;;  %3585 = vmatpush.bf16.msrb.mxu2 %v4132_v32 }
  0x5f   : > { %v603_v18 = vld [vmem:[#allocation2 + $0x34] sm:$0xc] }
  0x60   : > { %3146 = vmatmul.msk.bf16.gmra.mxu3 %vm825_vm7, %v765_v6  ;;  %v604_v23 = vsel %vm3957_vm13, %v588_v17, %v603_v18  ;;  %v3556_v17 = vld [vmem:[%s4705_s3 + $0xb8] sm:$0xff] }
  0x61   : > { %605 = vst [vmem:[#allocation2 + $0x34] sm:$0xc] %v604_v23  ;;  %1953 = vmatpush.bf16.msrb.mxu1 %v3556_v17 }
  0x63   : > { %v635_v0 = vld [vmem:[#allocation2 + $0x3c] sm:$0x8] }
  0x64   : > { %3203 = vmatmul.msk.bf16.gmra.mxu2 %vm825_vm7, %v1027_v15  ;;  %3172 = vmatmul.msk.bf16.gmra.mxu1 %vm825_vm7, %v4030_v42  ;;  %v598_v42 = vsel %vm4756_vm11, %v589_v44, %v597_v3  ;;  %v636_v10 = vsel %vm3990_vm14, %v616_v38, %v635_v0  ;;  %v3539_v44 = vld [vmem:[%s4705_s3 + $0x30] sm:$0xff]  ;;  %v3537_v0 = vld [vmem:[%s4705_s3 + $0x20] sm:$0xff]  ;;  %vm1427_vm11 = vcmask 1041408  }
  0x65   : > { %606 = vst.msk [vmem:[#allocation2 + $0x38] sm:$0xf] %vm4757_vm6, %v598_v42  ;;  %1954 = vmatpush.bf16.msrb.mxu1 %v3555_v20  ;;  %v3543_v20 = vld [vmem:[%s4705_s3 + $0x50] sm:$0xff]  ;;  %vm1437_vm6 = vcmask 1043458  }
  0x66   : > { %3168 = vmatmul.msk.bf16.vlgmr.msrb.gmra.mxu0 %vm825_vm7, %v3943_v61  ;;  %v347_v61 = vpack.c.bf16 %v331_v28, %v331_v28  ;;  %637 = vst [vmem:[#allocation2 + $0x3c] sm:$0x8] %v636_v10 }
  0x68   : > { %v623_v39 = vshll.u32 %v347_v61, 16  ;;  %v627_v41 = vshrl.u32 %v347_v61, 16  ;;  %v3512_v47 = vld [vmem:[#allocation2 + $0x30] sm:$0xff]  ;;  %v3545_v61 = vld [vmem:[%s4705_s3 + $0x60] sm:$0xff] }
  0x69   : > { %v778_v36 = vshll.u32 %v3512_v47, 16  ;;  %v782_v2 = vshrl.u32 %v3512_v47, 16  ;;  %v1032_v14 = vrot.slane %v3512_v47, 1  ;;  %1955 = vmatpush.bf16.msrb.mxu1 %v3554_v29  ;;  %1693 = vmatpush.bf16.msrb.mxu3 %v3545_v61 }
  0x6a   : > { %v625_v7 = vrot.slane %v623_v39, 5  ;;  %v629_v45 = vrot.slane %v627_v41, 4  ;;  %v3540_v39 = vld [vmem:[%s4705_s3 + $0x38] sm:$0xff] }
  0x6b   : > { %v780_v4 = vrot.slane %v778_v36, 1  ;;  %v1033_v43 = vsel %vm1020_vm9, %v1030_v55, %v1032_v14  ;;  %1804 = vmatpush.bf16.msra.mxu0 %v3540_v39  ;;  %v3535_v36 = vld [vmem:[%s4705_s3 + $0x10] sm:$0xff] }
  0x6c   : > { %v630_v30 = vor.u32 %v629_v45, %v625_v7 }
  0x6d   : > { %v781_v57 = vsel %vm729_vm0, %v776_v53, %v780_v4  ;;  %v3513_v1 = vld [vmem:[#allocation2 + $0x38] sm:$0xff]  ;;  %v784_v6 = vor.u32 %v782_v2, %v780_v4  ;;  %v1462_v53 = vld [vmem:[#allocation3 + $0x48] sm:$0x1] }
  0x6e   : > { %v631_v48 = vrot.slane %v630_v30, 4  ;;  %v786_v3 = vshll.u32 %v3513_v1, 16  ;;  %v1034_v40 = vrot.slane %v3513_v1, 1  ;;  %v3536_v30 = vld [vmem:[%s4705_s3 + $0x18] sm:$0xff] }
  0x6f   : > { %1805 = vmatpush.bf16.msra.mxu0 %v3539_v44  ;;  %v3544_v4 = vld [vmem:[%s4705_s3 + $0x58] sm:$0xff]  ;;  %v3542_v44 = vld [vmem:[%s4705_s3 + $0x48] sm:$0xff] }
  0x70   : > { %3147 = vmatmul.msk.bf16.gmra.mxu3 %vm825_vm7, %v773_v35  ;;  %v640_v56 = vsel %vm4758_vm10, %v631_v48, %v639_v50  ;;  %v788_v8 = vrot.slane %v786_v3, 1  ;;  %v1035_v5 = vsel %vm1020_vm9, %v1032_v14, %v1034_v40  ;;  %v3553_v35 = vld [vmem:[%s4705_s3 + $0xa0] sm:$0xff]  ;;  %vm4767_vm10 = vsmask.f32 1282 }
  0x71   : > { %641 = vst [vmem:[#allocation2 + $0x44] sm:$0xf] %v640_v56  ;;  %1956 = vmatpush.bf16.msrb.mxu1 %v3553_v35  ;;  %1694 = vmatpush.bf16.msrb.mxu3 %v3544_v4 }
  0x72   : > { %v789_v15 = vsel %vm729_vm0, %v784_v6, %v788_v8 }
  0x74   : > { %3204 = vmatmul.msk.bf16.gmra.mxu2 %vm825_vm7, %v1029_v22  ;;  %3173 = vmatmul.msk.bf16.gmra.mxu1 %vm825_vm7, %v4053_v9  ;;  %v790_v9 = vshrl.u32 %v3513_v1, 16 }
  0x75   : > { %1957 = vmatpush.bf16.msrb.mxu1 %v3552_v54  ;;  %1695 = vmatpush.bf16.msrb.mxu3 %v3543_v20 }
  0x76   : > { %3169 = vmatmul.msk.bf16.gmra.mxu0 %vm825_vm7, %v3987_v31  ;;  %v626_v31 = vsel %vm4759_vm15, %v621_v58, %v625_v7  ;;  %v792_v19 = vor.u32 %v790_v9, %v788_v8  ;;  %v3538_v7 = vld [vmem:[%s4705_s3 + $0x28] sm:$0xff]  ;;  %vm4283_vm15 = vmand %vm1427_vm11, %vm4767_vm10 }
  0x77   : > { %638 = vst.msk [vmem:[#allocation2 + $0x40] sm:$0xf] %vm4760_vm3, %v626_v31  ;;  %1806 = vmatpush.bf16.msra.mxu0 %v3538_v7  ;;  %v3558_v58 = vld [vmem:[%s4707_s5 + $0x8] sm:$0xff]  ;;  %vm4770_vm3 = vsmask.f32 3338 }
  0x78   : > { %v642_v59 = vld [vmem:[#allocation2 + $0x44] sm:$0x8]  ;;  %v3688_v24 = vld [vmem:[#allocation2 + $0x40] sm:$0x70]  ;;  %3586 = vmatpush.bf16.msrb.mxu2 %v3558_v58 }
  0x79   : > { %v643_v63 = vsel %vm3990_vm14, 0, %v642_v59  ;;  %vm1422_vm14 = vcmask 1040384   ;;  %v3533_v59 = vld [vmem:[%s4705_s3] sm:$0xff]  ;;  %1696 = vmatpush.bf16.msrb.mxu3 %v3542_v44 }
  0x7a   : > { %644 = vst [vmem:[#allocation2 + $0x44] sm:$0x8] %v643_v63  ;;  %vm4175_vm13 = vmand %vm1422_vm14, %vm4761_vm5  ;;  %vm1432_vm5 = vcmask 1042433  }
  0x7b   : > { %1807 = vmatpush.bf16.msra.mxu0 %v3537_v0  ;;  %v1463_v55 = vsel %vm4175_vm13, 0, %v1462_v53  ;;  %v3549_v0 = vld [vmem:[%s4705_s3 + $0x80] sm:$0xff]  ;;  %vm4288_vm14 = vmand %vm1437_vm6, %vm4770_vm3  ;;  %vm1442_vm6 = vcmask 1043459   ;;  %vm2278_vm3 = vcmask 1046534  }
  0x7c   : > { %1464 = vst [vmem:[#allocation3 + $0x48] sm:$0x1] %v1463_v55  ;;  %vm4328_vm10 = vmand %vm1442_vm6, %vm503_vm4  ;;  %vm4778_vm4 = vsmask.f32 3328 }
  0x7e   : > { %v3634_v13 = vld [vmem:[#allocation2 + $0x40] sm:$0xf]  }
  0x7f   : > { %v3635_v12 = vor.u32 %v3688_v24, %v3634_v13  ;;  %1808 = vmatpush.bf16.msra.mxu0 %v3536_v30 }
  0x80   : > { %3148 = vmatmul.msk.bf16.gmra.mxu3 %vm825_vm7, %v781_v57  ;;  %v3534_v57 = vld [vmem:[%s4705_s3 + $0x8] sm:$0xff] }
  0x81   : > { %v664_v11 = vld [vmem:[#allocation2 + $0x40] sm:$0xff]  }
  0x82   : > { %v794_v18 = vshll.u32 %v664_v11, 16  ;;  %v798_v26 = vshrl.u32 %v664_v11, 16  ;;  %v1036_v27 = vrot.slane %v664_v11, 1 }
  0x83   : > { %1809 = vmatpush.bf16.msra.mxu0 %v3535_v36 }
  0x84   : > { %3205 = vmatmul.msk.bf16.gmra.mxu2 %vm825_vm7, %v1031_v21  ;;  %3174 = vmatmul.msk.bf16.gmra.mxu1 %vm825_vm7, %v3512_v47  ;;  %v796_v23 = vrot.slane %v794_v18, 1  ;;  %v1037_v33 = vsel %vm1020_vm9, %v1034_v40, %v1036_v27  ;;  %v4201_v21 = vld [vmem:[%s4704_s2] ss:$0 sm:$0xff] }
  0x86   : > { %v797_v16 = vsel %vm729_vm0, %v792_v19, %v796_v23  ;;  %v800_v28 = vor.u32 %v798_v26, %v796_v23 }
  0x87   : > { %1810 = vmatpush.bf16.msra.mxu0 %v3534_v57 }
  0x8b   : > { %1811 = vmatpush.bf16.msra.mxu0 %v3533_v59 }
  0x8f   : > { %2151 = vmatpush.bf16.msrb.mxu0 %v4101_v60  ;;  %v3551_v60 = vld [vmem:[%s4705_s3 + $0x90] sm:$0xff] }
  0x90   : > { %3149 = vmatmul.msk.bf16.gmra.mxu3 %vm825_vm7, %v789_v15  ;;  %1958 = vmatpush.bf16.msrb.mxu1 %v3551_v60 }
  0x93   : > { %2152 = vmatpush.bf16.msrb.mxu0 %v4132_v32  ;;  %v1399_v32 = vld [vmem:[#allocation3] sm:$0xf] }
  0x94   : > { %3206 = vmatmul.msk.bf16.gmra.mxu2 %vm825_vm7, %v1033_v43  ;;  %3175 = vmatmul.msk.bf16.gmra.mxu1 %vm825_vm7, %v3513_v1 }
  0x97   : > { %2153 = vmatpush.bf16.msrb.mxu0 %v3558_v58 }
  0xa0   : > { %3150 = vmatmul.msk.bf16.gmra.mxu3 %vm825_vm7, %v797_v16 }
  0xa4   : > { %3207 = vmatmul.msk.bf16.gmra.mxu2 %vm825_vm7, %v1035_v5  ;;  %3176 = vmatmul.msk.bf16.gmra.mxu1 %vm825_vm7, %v3635_v12 }
  0xb0   : > { %3151 = vmatmul.msk.bf16.gmra.mxu3 %vm825_vm7, %v800_v28 }
  0xb4   : > { %3208 = vmatmul.msk.bf16.gmra.mxu2 %vm825_vm7, %v1037_v33  ;;  %v3550_v33 = vld [vmem:[%s4705_s3 + $0x88] sm:$0xff] }
  0xb5   : > { %1959 = vmatpush.bf16.msrb.mxu1 %v3550_v33 }
  0xb9   : > { %1960 = vmatpush.bf16.msrb.mxu1 %v3549_v0 }
  0xc1   : > { %v972_v41 = vpop.f32.mrf.mxu1 }
  0xc3   : > { %v862_v37 = vpop.f32.mrf.mxu0 }
  0xc4   : > { %3209 = vmatmul.msk.bf16.gmra.mxu2 %vm825_vm7, %v1036_v27 }
  0xc7   : > { %v1098_v22 = vpop.f32.mrf.mxu2 }
  0xc9   : > { %v974_v47 = vpop.f32.mrf.mxu1 }
  0xcb   : > { %v864_v38 = vpop.f32.mrf.mxu0 }
  0xcf   : > { %v1100_v45 = vpop.f32.mrf.mxu2 }
  0xd1   : > { %v4167_v49 = vpop.f32.mrf.mxu1 }
  0xd3   : > { %v4160_v42 = vpop.f32.mrf.mxu0  ;;  %v872_v10 = vpop.f32.mrf.mxu3 }
  0xd4   : > { %v973_v1 = vadd.f32 %v972_v41, %v872_v10 }
  0xd7   : > { %v4165_v48 = vpop.f32.mrf.mxu2 }
  0xd9   : > { %v4203_v2 = vpop.f32.mrf.mxu1 }
  0xdb   : > { %v4172_v50 = vpop.f32.mrf.mxu0  ;;  %v874_v56 = vpop.f32.mrf.mxu3 }
  0xdc   : > { %v975_v18 = vadd.f32 %v974_v47, %v874_v56 }
  0xdf   : > { %v4185_v52 = vpop.f32.mrf.mxu2 }
  0xe1   : > { %v4212_v40 = vpop.f32.mrf.mxu1 }
  0xe3   : > { %v962_v31 = vpop.f32.mrf.mxu0  ;;  %v877_v34 = vpop.f32.mrf.mxu3 }
  0xe4   : > { %v963_v63 = vadd.f32 %v962_v31, %v862_v37 }
  0xe6   : > { %v1143_v3 = vadd.f32 %v1098_v22, %v963_v63  ;;  %v978_v22 = vadd.f32 %v4167_v49, %v877_v34 }
  0xe7   : > { %v1108_v6 = vpop.f32.mrf.mxu2 }
  0xe8   : > { %v1165_v8 = vadd.f32 %v4201_v21, %v1143_v3  ;;  %v1147_v11 = vadd.f32 %v1108_v6, %v973_v1 }
  0xe9   : > { %v4244_v54 = vpop.f32.mrf.mxu1 }
  0xea   : > { %v1183_v13 = vmax.f32 %v1165_v8, 0.0  ;;  %v1169_v14 = vadd.f32 %v4201_v21, %v1147_v11 }
  0xeb   : > { %v964_v15 = vpop.f32.mrf.mxu0  ;;  %v879_v9 = vpop.f32.mrf.mxu3 }
  0xec   : > { %v1201_v43 = vpack.c.bf16 %v1183_v13, %v1183_v13  ;;  %v1187_v17 = vmax.f32 %v1169_v14, 0.0  ;;  %v965_v62 = vadd.f32 %v964_v15, %v864_v38  ;;  %v980_v14 = vadd.f32 %v4203_v2, %v879_v9 }
  0xee   : > { %v1220_v19 = vshrl.u32 %v1201_v43, 16  ;;  %v1144_v23 = vadd.f32 %v1100_v45, %v965_v62  ;;  %v4214_v16 = vpack.c.bf16 %v1187_v17, %v1187_v17  ;;  %v1223_v12 = vshll.u32 %v1201_v43, 16 }
  0xef   : > { %v1110_v5 = vpop.f32.mrf.mxu2 }
  0xf0   : > { %v1222_v24 = vrot.slane %v1220_v19, 7  ;;  %v1166_v25 = vadd.f32 %v4201_v21, %v1144_v23  ;;  %v1148_v27 = vadd.f32 %v1110_v5, %v975_v18  ;;  %v1255_v61 = vshrl.u32 %v4214_v16, 16 }
  0xf2   : > { %v1225_v28 = vor.u32 %v1223_v12, %v1222_v24  ;;  %v1184_v29 = vmax.f32 %v1166_v25, 0.0  ;;  %v1170_v35 = vadd.f32 %v4201_v21, %v1148_v27  ;;  %v4241_v10 = vrot.slane %v1255_v61, 7 }
  0xf3   : > { %v967_v37 = vpop.f32.mrf.mxu0  ;;  %v882_v38 = vpop.f32.mrf.mxu3  ;;  %v1226_v59 = vrot.slane %v1222_v24, 4 }
  0xf4   : > { %v1400_v39 = vsel %vm4222_vm12, %v1225_v28, %v1399_v32  ;;  %v1202_v41 = vpack.c.bf16 %v1184_v29, %v1184_v29  ;;  %v1188_v7 = vmax.f32 %v1170_v35, 0.0  ;;  %v968_v45 = vadd.f32 %v967_v37, %v4160_v42  ;;  %v3541_v42 = vld [vmem:[%s4705_s3 + $0x40] sm:$0xff]  ;;  %v4263_v28 = vpop.f32.mrf.mxu1  ;;  %vm4307_vm12 = vmand %vm1432_vm5, %vm4773_vm2 }
  0xf5   : > { %1401 = vst [vmem:[#allocation3] sm:$0xf] %v1400_v39  ;;  %1697 = vmatpush.bf16.msrb.mxu3 %v3541_v42  ;;  %v983_v37 = vadd.f32 %v4212_v40, %v882_v38  ;;  %vm2500_vm5 = vcmask 1045504  }
  0xf6   : > { %v1228_v47 = vshrl.u32 %v1202_v41, 16  ;;  %v1206_v30 = vpack.c.bf16 %v1188_v7, %v1188_v7  ;;  %v1145_v49 = vadd.f32 %v4165_v48, %v968_v45  ;;  %v1231_v53 = vshll.u32 %v1202_v41, 16 }
  0xf7   : > { %v1113_v36 = vpop.f32.mrf.mxu2  ;;  %v1262_v48 = vrot.slane %v4241_v10, 4  ;;  %v1258_v41 = vshll.u32 %v4214_v16, 16 }
  0xf8   : > { %v1230_v56 = vrot.slane %v1228_v47, 7  ;;  %v1149_v4 = vadd.f32 %v1113_v36, %v978_v22  ;;  %v1264_v55 = vshrl.u32 %v1206_v30, 16  ;;  %v1267_v57 = vshll.u32 %v1206_v30, 16  ;;  %v3557_v36 = vld [vmem:[%s4707_s5] sm:$0xff] }
  0xf9   : > { %v1167_v58 = vadd.f32 %v4201_v21, %v1145_v49  ;;  %3587 = vmatpush.bf16.msrb.mxu2 %v3557_v36  ;;  %2154 = vmatpush.bf16.msrb.mxu0 %v3557_v36 }
  0xfa   : > { %v1233_v31 = vor.u32 %v1231_v53, %v1230_v56  ;;  %v1171_v63 = vadd.f32 %v4201_v21, %v1149_v4  ;;  %v1266_v1 = vrot.slane %v1264_v55, 7 }
  0xfb   : > { %v1185_v34 = vmax.f32 %v1167_v58, 0.0  ;;  %v969_v3 = vpop.f32.mrf.mxu0  ;;  %v884_v15 = vpop.f32.mrf.mxu3 }
  0xfc   : > { %v1424_v6 = vld [vmem:[#allocation3] sm:$0x1]  ;;  %v1234_v8 = vsel %vm3846_vm8, %v1226_v59, %v1233_v31  ;;  %v1189_v11 = vmax.f32 %v1171_v63, 0.0  ;;  %v970_v13 = vadd.f32 %v969_v3, %v4172_v50  ;;  %v1269_v17 = vor.u32 %v1267_v57, %v1266_v1 }
  0xfd   : > { %v1425_v43 = vsel %vm4175_vm13, 0, %v1424_v6  ;;  %1402 = vst [vmem:[#allocation3 + $0x4] sm:$0xf] %v1234_v8  ;;  %v1203_v62 = vpack.c.bf16 %v1185_v34, %v1185_v34  ;;  %v1271_v25 = vrot.slane %v1266_v1, 4  ;;  %v985_v1 = vadd.f32 %v4244_v54, %v884_v15  ;;  %v989_v34 = vpop.f32.mrf.mxu1 }
  0xfe   : > { %1426 = vst [vmem:[#allocation3] sm:$0x1] %v1425_v43  ;;  %v1207_v18 = vpack.c.bf16 %v1189_v11, %v1189_v11  ;;  %v1146_v19 = vadd.f32 %v4185_v52, %v970_v13  ;;  %v1270_v23 = vsel %vm3846_vm8, %v1262_v48, %v1269_v17  ;;  %v1235_v52 = vrot.slane %v1230_v56, 4  ;;  %v3500_v11 = vld [vmem:[%s3825_s15 + $0x8] sm:$0xff] }
  0xff   : > { %v1237_v60 = vshrl.u32 %v1203_v62, 16  ;;  %v1115_v5 = vpop.f32.mrf.mxu2  ;;  %1406 = vst [vmem:[#allocation3 + $0x14] sm:$0xf] %v1270_v23  ;;  %v1240_v12 = vshll.u32 %v1203_v62, 16  ;;  %v1260_v56 = vor.u32 %v1258_v41, %v4241_v10  ;;  %3415 = vmatmul.msk.bf16.vlgmr.msrb.gmra.mxu2 %vm825_vm7, %v3500_v11  ;;  %v1419_v10 = vld [vmem:[#allocation3 + $0x44] sm:$0xf] }
 0x100   : > { %v1273_v50 = vshrl.u32 %v1207_v18, 16  ;;  %v1276_v20 = vshll.u32 %v1207_v18, 16  ;;  %v1168_v2 = vadd.f32 %v4201_v21, %v1146_v19  ;;  %v1150_v9 = vadd.f32 %v1115_v5, %v980_v14  ;;  %v3574_v5 = vld [vmem:[#allocation3] sm:$0xe] }
 0x101   : > { %v1239_v24 = vrot.slane %v1237_v60, 7 }
 0x102   : > { %v1275_v26 = vrot.slane %v1273_v50, 7  ;;  %v1186_v32 = vmax.f32 %v1168_v2, 0.0  ;;  %v1172_v27 = vadd.f32 %v4201_v21, %v1150_v9 }
 0x103   : > { %v1242_v29 = vor.u32 %v1240_v12, %v1239_v24  ;;  %v4266_v39 = vpop.f32.mrf.mxu3  ;;  %v1244_v53 = vrot.slane %v1239_v24, 4 }
 0x104   : > { %v1278_v33 = vor.u32 %v1276_v20, %v1275_v26  ;;  %v1204_v61 = vpack.c.bf16 %v1186_v32, %v1186_v32  ;;  %v1190_v35 = vmax.f32 %v1172_v27, 0.0  ;;  %v1280_v4 = vrot.slane %v1275_v26, 4  ;;  %v3573_v18 = vld [vmem:[#allocation3] sm:$0xf0] }
 0x105   : > { %v1243_v22 = vsel %vm3846_vm8, %v1235_v52, %v1242_v29  ;;  %v4271_v44 = vld [vmem:[#allocation3] sm:$0xff]   ;;  %v3575_v24 = vor.u32 %v3574_v5, %v3573_v18 }
 0x106   : > { %1403 = vst [vmem:[#allocation3 + $0x8] sm:$0xf] %v1243_v22  ;;  %v1279_v7 = vsel %vm3846_vm8, %v1271_v25, %v1278_v33  ;;  %v1246_v45 = vshrl.u32 %v1204_v61, 16  ;;  %v1208_v47 = vpack.c.bf16 %v1190_v35, %v1190_v35  ;;  %1812 = vmatmul.bf16.vlgmr.msra.gmra.mxu0 %v4271_v44  ;;  %v1249_v40 = vshll.u32 %v1204_v61, 16  ;;  %v992_v33 = vpop.f32.mrf.mxu1 }
 0x107   : > { %1407 = vst [vmem:[#allocation3 + $0x18] sm:$0xf] %v1279_v7  ;;  %v1118_v38 = vpop.f32.mrf.mxu2  ;;  %v1565_v2 = vshll.u32 %v4271_v44, 16  ;;  %v988_v25 = vadd.f32 %v4263_v28, %v4266_v39  ;;  %v1879_v41 = vrot.slane %v3575_v24, 1 }
 0x108   : > { %v1248_v0 = vrot.slane %v1246_v45, 7  ;;  %v1282_v30 = vshrl.u32 %v1208_v47, 16  ;;  %v1285_v16 = vshll.u32 %v1208_v47, 16  ;;  %v1151_v49 = vadd.f32 %v1118_v38, %v983_v37 }
 0x109   : > { %v1567_v61 = vrot.slane %v1565_v2, 1  ;;  %v1563_v47 = vshrl.u32 %v4271_v44, 16 }
 0x10a   : > { %v1251_v42 = vor.u32 %v1249_v40, %v1248_v0  ;;  %v1253_v55 = vrot.slane %v1248_v0, 4  ;;  %v1284_v57 = vrot.slane %v1282_v30, 7  ;;  %v1173_v58 = vadd.f32 %v4201_v21, %v1151_v49 }
 0x10b   : > { %v889_v8 = vpop.f32.mrf.mxu3  ;;  %v1568_v49 = vor.u32 %v1567_v61, %v1563_v47 }
 0x10c   : > { %v1252_v31 = vsel %vm3846_vm8, %v1244_v53, %v1251_v42  ;;  %v1261_v63 = vsel %vm3846_vm8, %v1253_v55, %v1260_v56  ;;  %v1287_v48 = vor.u32 %v1285_v16, %v1284_v57  ;;  %v1191_v6 = vmax.f32 %v1173_v58, 0.0  ;;  %v3501_v55 = vld [vmem:[%s3825_s15 + $0x10] sm:$0xff] }
 0x10d   : > { %v1429_v3 = vld [vmem:[#allocation3 + $0x8] sm:$0x3]  ;;  %1404 = vst [vmem:[#allocation3 + $0xc] sm:$0xf] %v1252_v31  ;;  %v1289_v20 = vrot.slane %v1284_v57, 4 }
 0x10e   : > { %v1430_v13 = vsel %vm4283_vm15, 0, %v1429_v3  ;;  %v1439_v14 = vld [vmem:[#allocation3 + $0x18] sm:$0xc]  ;;  %1405 = vst [vmem:[#allocation3 + $0x10] sm:$0xf] %v1261_v63  ;;  %v1288_v43 = vsel %vm3846_vm8, %v1280_v4, %v1287_v48  ;;  %v1209_v62 = vpack.c.bf16 %v1191_v6, %v1191_v6  ;;  %v990_v4 = vadd.f32 %v989_v34, %v889_v8  ;;  %v994_v6 = vpop.f32.mrf.mxu1 }
 0x10f   : > { %1431 = vst [vmem:[#allocation3 + $0x8] sm:$0x3] %v1430_v13  ;;  %v1440_v17 = vsel %vm4288_vm14, 0, %v1439_v14  ;;  %v1120_v54 = vpop.f32.mrf.mxu2  ;;  %3416 = vmatmul.msk.bf16.gmra.mxu2 %vm825_vm7, %v3501_v55 }
 0x110   : > { %1441 = vst [vmem:[#allocation3 + $0x18] sm:$0xc] %v1440_v17  ;;  %v1152_v15 = vadd.f32 %v1120_v54, %v985_v1  ;;  %v1291_v19 = vshrl.u32 %v1209_v62, 16  ;;  %v1294_v23 = vshll.u32 %v1209_v62, 16 }
 0x111   : > { %1408 = vst [vmem:[#allocation3 + $0x1c] sm:$0xf] %v1288_v43 }
 0x112   : > { %v1174_v60 = vadd.f32 %v4201_v21, %v1152_v15  ;;  %v1293_v9 = vrot.slane %v1291_v19, 7 }
 0x113   : > { %v892_v22 = vpop.f32.mrf.mxu3 }
 0x114   : > { %v1192_v12 = vmax.f32 %v1174_v60, 0.0  ;;  %v1296_v32 = vor.u32 %v1294_v23, %v1293_v9  ;;  %v1298_v38 = vrot.slane %v1293_v9, 4  ;;  %v993_v54 = vadd.f32 %v992_v33, %v892_v22 }
 0x115   : > { %v1434_v26 = vld [vmem:[#allocation3 + $0x10] sm:$0x6] }
 0x116   : > { %v1435_v27 = vsel %vm4307_vm12, 0, %v1434_v26  ;;  %v1210_v52 = vpack.c.bf16 %v1192_v12, %v1192_v12  ;;  %v4316_v29 = vld [vmem:[#allocation3 + $0x8] sm:$0xff]  ;;  %v1297_v35 = vsel %vm3846_vm8, %v1289_v20, %v1296_v32  ;;  %v997_v51 = vpop.f32.mrf.mxu1 }
 0x117   : > { %1436 = vst [vmem:[#allocation3 + $0x10] sm:$0x6] %v1435_v27  ;;  %v1123_v37 = vpop.f32.mrf.mxu2  ;;  %1817 = vmatmul.bf16.gmra.mxu0 %v4316_v29  ;;  %v1880_v45 = vrot.slane %v4316_v29, 1  ;;  %v1570_v40 = vshll.u32 %v4316_v29, 16  ;;  %v1574_v12 = vshrl.u32 %v4316_v29, 16 }
 0x118   : > { %1409 = vst [vmem:[#allocation3 + $0x20] sm:$0xf] %v1297_v35  ;;  %v1300_v7 = vshrl.u32 %v1210_v52, 16  ;;  %v1303_v28 = vshll.u32 %v1210_v52, 16  ;;  %v1153_v39 = vadd.f32 %v1123_v37, %v988_v25 }
 0x119   : > { %v1881_v16 = vsel %vm1020_vm9, %v1879_v41, %v1880_v45  ;;  %v1572_v36 = vrot.slane %v1570_v40, 1 }
 0x11a   : > { %v1302_v0 = vrot.slane %v1300_v7, 7  ;;  %v1175_v30 = vadd.f32 %v4201_v21, %v1153_v39  ;;  %1961 = vmatmul.bf16.vlgmr.msrb.gmra.mxu1 %v1881_v16  ;;  %v3502_v7 = vld [vmem:[%s3825_s15 + $0x18] sm:$0xff]  ;;  %v4358_v16 = vld [vmem:[#allocation3 + $0x18] sm:$0xff] }
 0x11b   : > { %v1573_v44 = vsel %vm729_vm0, %v1568_v49, %v1572_v36  ;;  %v894_v11 = vpop.f32.mrf.mxu3  ;;  %v1576_v33 = vor.u32 %v1574_v12, %v1572_v36  ;;  %v3503_v12 = vld [vmem:[%s3825_s15 + $0x20] sm:$0xff] }
 0x11c   : > { %v1305_v56 = vor.u32 %v1303_v28, %v1302_v0  ;;  %v1193_v53 = vmax.f32 %v1175_v30, 0.0  ;;  %1698 = vmatmul.bf16.vlgmr.msrb.gmra.mxu3 %v1573_v44  ;;  %v1307_v13 = vrot.slane %v1302_v0, 4  ;;  %v995_v41 = vadd.f32 %v994_v6, %v894_v11 }
 0x11d   : > { %v1884_v6 = vrot.slane %v4358_v16, 1 }
 0x11e   : > { %v1306_v57 = vsel %vm3846_vm8, %v1298_v38, %v1305_v56  ;;  %v1211_v58 = vpack.c.bf16 %v1193_v53, %v1193_v53  ;;  %v4339_v8 = vld [vmem:[#allocation3 + $0x10] sm:$0xff]  ;;  %v999_v53 = vpop.f32.mrf.mxu1 }
 0x11f   : > { %v1444_v31 = vld [vmem:[#allocation3 + $0x20] sm:$0x8]  ;;  %1410 = vst [vmem:[#allocation3 + $0x24] sm:$0xf] %v1306_v57  ;;  %v1125_v63 = vpop.f32.mrf.mxu2  ;;  %v1578_v15 = vshll.u32 %v4339_v8, 16  ;;  %v1882_v60 = vrot.slane %v4339_v8, 1  ;;  %3417 = vmatmul.msk.bf16.gmra.mxu2 %vm825_vm7, %v3502_v7 }
 0x120   : > { %v1445_v48 = vsel %vm4328_vm10, 0, %v1444_v31  ;;  %v1309_v1 = vshrl.u32 %v1211_v58, 16  ;;  %v1312_v34 = vshll.u32 %v1211_v58, 16  ;;  %v1154_v3 = vadd.f32 %v1125_v63, %v990_v4 }
 0x121   : > { %1446 = vst [vmem:[#allocation3 + $0x20] sm:$0x8] %v1445_v48  ;;  %v1580_v25 = vrot.slane %v1578_v15, 1  ;;  %v1883_v52 = vsel %vm1020_vm9, %v1880_v45, %v1882_v60  ;;  %v1582_v63 = vshrl.u32 %v4339_v8, 16  ;;  %v1586_v48 = vshll.u32 %v4358_v16, 16 }
 0x122   : > { %v1311_v14 = vrot.slane %v1309_v1, 7  ;;  %v1176_v43 = vadd.f32 %v4201_v21, %v1154_v3 }
 0x123   : > { %v897_v61 = vpop.f32.mrf.mxu3  ;;  %v1581_v22 = vsel %vm729_vm0, %v1576_v33, %v1580_v25  ;;  %v1584_v11 = vor.u32 %v1582_v63, %v1580_v25 }
 0x124   : > { %v1314_v17 = vor.u32 %v1312_v34, %v1311_v14  ;;  %v1194_v62 = vmax.f32 %v1176_v43, 0.0  ;;  %v1316_v26 = vrot.slane %v1311_v14, 4  ;;  %v998_v56 = vadd.f32 %v997_v51, %v897_v61 }
 0x125   : > { %v1885_v43 = vsel %vm1020_vm9, %v1882_v60, %v1884_v6 }
 0x126   : > { %v1447_v18 = vld [vmem:[#allocation3 + $0x24] sm:$0x1]  ;;  %v1315_v19 = vsel %vm3846_vm8, %v1307_v13, %v1314_v17  ;;  %v1212_v23 = vpack.c.bf16 %v1194_v62, %v1194_v62  ;;  %v1588_v17 = vrot.slane %v1586_v48, 1 }
 0x127   : > { %v1448_v5 = vsel %vm4175_vm13, 0, %v1447_v18  ;;  %1411 = vst [vmem:[#allocation3 + $0x28] sm:$0xf] %v1315_v19  ;;  %v1128_v20 = vpop.f32.mrf.mxu2  ;;  %1822 = vmatmul.bf16.gmra.mxu0 %v4339_v8  ;;  %vm1418_vm13 = vmand %vm1397_vm1, %vm4778_vm4 }
 0x128   : > { %1449 = vst [vmem:[#allocation3 + $0x24] sm:$0x1] %v1448_v5  ;;  %v1318_v2 = vshrl.u32 %v1212_v23, 16  ;;  %v1321_v9 = vshll.u32 %v1212_v23, 16  ;;  %v1155_v24 = vadd.f32 %v1128_v20, %v993_v54  ;;  %v1589_v15 = vsel %vm729_vm0, %v1584_v11, %v1588_v17  ;;  %v1002_v23 = vpop.f32.mrf.mxu1 }
 0x12a   : > { %v1320_v32 = vrot.slane %v1318_v2, 7  ;;  %v1177_v27 = vadd.f32 %v4201_v21, %v1155_v24  ;;  %1966 = vmatmul.bf16.gmra.mxu1 %v1883_v52 }
 0x12b   : > { %v899_v4 = vpop.f32.mrf.mxu3 }
 0x12c   : > { %v1323_v35 = vor.u32 %v1321_v9, %v1320_v32  ;;  %v1195_v37 = vmax.f32 %v1177_v27, 0.0  ;;  %1703 = vmatmul.bf16.gmra.mxu3 %v1581_v22  ;;  %v1325_v38 = vrot.slane %v1320_v32, 4  ;;  %v1000_v54 = vadd.f32 %v999_v53, %v899_v4 }
 0x12e   : > { %v1324_v29 = vsel %vm3846_vm8, %v1316_v26, %v1323_v35  ;;  %v1213_v28 = vpack.c.bf16 %v1195_v37, %v1195_v37 }
 0x12f   : > { %1412 = vst [vmem:[#allocation3 + $0x2c] sm:$0xf] %v1324_v29  ;;  %v1130_v39 = vpop.f32.mrf.mxu2  ;;  %v4373_v24 = vld [vmem:[#allocation3 + $0x20] sm:$0xff]  ;;  %3418 = vmatmul.msk.bf16.gmra.mxu2 %vm825_vm7, %v3503_v12 }
 0x130   : > { %v1327_v45 = vshrl.u32 %v1213_v28, 16  ;;  %v1330_v47 = vshll.u32 %v1213_v28, 16  ;;  %v1156_v40 = vadd.f32 %v1130_v39, %v995_v41  ;;  %v1594_v33 = vshll.u32 %v4373_v24, 16 }
 0x131   : > { %v1886_v41 = vrot.slane %v4373_v24, 1 }
 0x132   : > { %v1329_v0 = vrot.slane %v1327_v45, 7  ;;  %v1178_v30 = vadd.f32 %v4201_v21, %v1156_v40  ;;  %v1590_v40 = vshrl.u32 %v4358_v16, 16 }
 0x133   : > { %v902_v20 = vpop.f32.mrf.mxu3  ;;  %v1887_v50 = vsel %vm1020_vm9, %v1884_v6, %v1886_v41 }
 0x134   : > { %v1332_v49 = vor.u32 %v1330_v47, %v1329_v0  ;;  %v1196_v36 = vmax.f32 %v1178_v30, 0.0  ;;  %v1334_v13 = vrot.slane %v1329_v0, 4  ;;  %v1003_v51 = vadd.f32 %v1002_v23, %v902_v20  ;;  %v1004_v47 = vpop.f32.mrf.mxu1 }
 0x136   : > { %v1450_v44 = vld [vmem:[#allocation3 + $0x2c] sm:$0x3]  ;;  %v1333_v55 = vsel %vm3846_vm8, %v1325_v38, %v1332_v49  ;;  %v1214_v57 = vpack.c.bf16 %v1196_v36, %v1196_v36  ;;  %v1596_v38 = vrot.slane %v1594_v33, 1  ;;  %v1592_v36 = vor.u32 %v1590_v40, %v1588_v17 }
 0x137   : > { %v1451_v58 = vsel %vm4283_vm15, 0, %v1450_v44  ;;  %1413 = vst [vmem:[#allocation3 + $0x30] sm:$0xf] %v1333_v55  ;;  %v1133_v31 = vpop.f32.mrf.mxu2  ;;  %1827 = vmatmul.bf16.gmra.mxu0 %v4358_v16  ;;  %vm2276_vm15 = vcmask 1045509  }
 0x138   : > { %1452 = vst [vmem:[#allocation3 + $0x2c] sm:$0x3] %v1451_v58  ;;  %v1336_v1 = vshrl.u32 %v1214_v57, 16  ;;  %v1339_v34 = vshll.u32 %v1214_v57, 16  ;;  %v1157_v3 = vadd.f32 %v1133_v31, %v998_v56  ;;  %v1597_v44 = vsel %vm729_vm0, %v1592_v36, %v1596_v38  ;;  %v3504_v58 = vld [vmem:[%s3825_s15 + $0x28] sm:$0xff] }
 0x13a   : > { %v1338_v14 = vrot.slane %v1336_v1, 7  ;;  %v1179_v59 = vadd.f32 %v4201_v21, %v1157_v3  ;;  %1971 = vmatmul.bf16.gmra.mxu1 %v1885_v43 }
 0x13b   : > { %v904_v45 = vpop.f32.mrf.mxu3 }
 0x13c   : > { %v1341_v8 = vor.u32 %v1339_v34, %v1338_v14  ;;  %v1197_v62 = vmax.f32 %v1179_v59, 0.0  ;;  %1708 = vmatmul.bf16.gmra.mxu3 %v1589_v15  ;;  %v1343_v25 = vrot.slane %v1338_v14, 4  ;;  %v1005_v4 = vadd.f32 %v1004_v47, %v904_v45 }
 0x13e   : > { %v1342_v18 = vsel %vm3846_vm8, %v1334_v13, %v1341_v8  ;;  %v1215_v19 = vpack.c.bf16 %v1197_v62, %v1197_v62 }
 0x13f   : > { %1414 = vst [vmem:[#allocation3 + $0x34] sm:$0xf] %v1342_v18  ;;  %v1135_v5 = vpop.f32.mrf.mxu2  ;;  %v3530_v1 = vld [vmem:[#allocation3 + $0x28] sm:$0xff]  ;;  %3419 = vmatmul.msk.bf16.gmra.mxu2 %vm825_vm7, %v3504_v58 }
 0x140   : > { %v1345_v2 = vshrl.u32 %v1215_v19, 16  ;;  %v1348_v9 = vshll.u32 %v1215_v19, 16  ;;  %v1158_v60 = vadd.f32 %v1135_v5, %v1000_v54  ;;  %v1602_v14 = vshll.u32 %v3530_v1, 16 }
 0x141   : > { %v1888_v8 = vrot.slane %v3530_v1, 1 }
 0x142   : > { %v1347_v26 = vrot.slane %v1345_v2, 7  ;;  %v1180_v32 = vadd.f32 %v4201_v21, %v1158_v60  ;;  %v1604_v18 = vrot.slane %v1602_v14, 1 }
 0x143   : > { %v1889_v5 = vsel %vm1020_vm9, %v1886_v41, %v1888_v8 }
 0x144   : > { %v1350_v27 = vor.u32 %v1348_v9, %v1347_v26  ;;  %v1198_v52 = vmax.f32 %v1180_v32, 0.0  ;;  %v1352_v0 = vrot.slane %v1347_v26, 4 }
 0x146   : > { %v1453_v61 = vld [vmem:[#allocation3 + $0x34] sm:$0x6]  ;;  %v1351_v35 = vsel %vm3846_vm8, %v1343_v25, %v1350_v27  ;;  %v1216_v37 = vpack.c.bf16 %v1198_v52, %v1198_v52 }
 0x147   : > { %v1454_v22 = vsel %vm4307_vm12, 0, %v1453_v61  ;;  %1415 = vst [vmem:[#allocation3 + $0x38] sm:$0xf] %v1351_v35  ;;  %v1138_v7 = vpop.f32.mrf.mxu2  ;;  %1832 = vmatmul.bf16.gmra.mxu0 %v4373_v24 }
 0x148   : > { %1455 = vst [vmem:[#allocation3 + $0x34] sm:$0x6] %v1454_v22  ;;  %v1354_v29 = vshrl.u32 %v1216_v37, 16  ;;  %v1357_v28 = vshll.u32 %v1216_v37, 16  ;;  %v1159_v39 = vadd.f32 %v1138_v7, %v1003_v51  ;;  %v1606_v51 = vshrl.u32 %v3530_v1, 16  ;;  %v3506_v37 = vld [vmem:[%s3825_s15 + $0x38] sm:$0xff] }
 0x14a   : > { %v1356_v30 = vrot.slane %v1354_v29, 7  ;;  %v1181_v49 = vadd.f32 %v4201_v21, %v1159_v39  ;;  %1976 = vmatmul.bf16.gmra.mxu1 %v1887_v50  ;;  %v1608_v61 = vor.u32 %v1606_v51, %v1604_v18 }
 0x14c   : > { %v1359_v56 = vor.u32 %v1357_v28, %v1356_v30  ;;  %v1199_v53 = vmax.f32 %v1181_v49, 0.0  ;;  %1713 = vmatmul.bf16.gmra.mxu3 %v1597_v44  ;;  %v1361_v34 = vrot.slane %v1356_v30, 4 }
 0x14e   : > { %v1360_v55 = vsel %vm3846_vm8, %v1352_v0, %v1359_v56  ;;  %v1217_v57 = vpack.c.bf16 %v1199_v53, %v1199_v53 }
 0x14f   : > { %1416 = vst [vmem:[#allocation3 + $0x3c] sm:$0xf] %v1360_v55  ;;  %v1140_v16 = vpop.f32.mrf.mxu2  ;;  %v3531_v25 = vld [vmem:[#allocation3 + $0x30] sm:$0xff] }
 0x150   : > { %v1363_v31 = vshrl.u32 %v1217_v57, 16  ;;  %v1366_v63 = vshll.u32 %v1217_v57, 16  ;;  %v1160_v48 = vadd.f32 %v1140_v16, %v1005_v4  ;;  %v1610_v26 = vshll.u32 %v3531_v25, 16  ;;  %v3499_v16 = vld [vmem:[%s3825_s15] sm:$0xff] }
 0x151   : > { %v1890_v32 = vrot.slane %v3531_v25, 1  ;;  %v1614_v42 = vshrl.u32 %v3531_v25, 16 }
 0x152   : > { %v1365_v3 = vrot.slane %v1363_v31, 7  ;;  %v1182_v6 = vadd.f32 %v4201_v21, %v1160_v48  ;;  %v1598_v21 = vshrl.u32 %v4373_v24, 16  ;;  %v3505_v24 = vld [vmem:[%s3825_s15 + $0x30] sm:$0xff]  ;;  %v1612_v33 = vrot.slane %v1610_v26, 1  ;;  %s3656_s15 = scalar_lea.hbm %s3655_s20, 64 }
 0x153   : > { %3420 = vmatmul.msk.bf16.gmra.mxu2 %vm825_vm7, %v3505_v24  ;;  %v1891_v46 = vsel %vm1020_vm9, %v1888_v8, %v1890_v32  ;;  %p3657_p11 = scmp.ne.s32.totalorder %s3655_s20, %s3656_s15  ;;  %p3662_p1 = scmp.lt.s32.totalorder %s3660_s23, %s3656_s15 }
 0x154   : > { %v1368_v11 = vor.u32 %v1366_v63, %v1365_v3  ;;  %v1200_v13 = vmax.f32 %v1182_v6, 0.0  ;;  %v1370_v19 = vrot.slane %v1365_v3, 4  ;;  %v1600_v20 = vor.u32 %v1598_v21, %v1596_v38 }
 0x155   : > { %v1613_v35 = vsel %vm729_vm0, %v1608_v61, %v1612_v33  ;;  %v1616_v47 = vor.u32 %v1614_v42, %v1612_v33  ;;  %p3658_p12 = pnand %p3657_p11, %p3786_p5  ;;  %p3663_p2 = por %p3662_p1, %p3661_p0 }
 0x156   : > { %v1456_v59 = vld [vmem:[#allocation3 + $0x3c] sm:$0xc]  ;;  %v1369_v43 = vsel %vm3846_vm8, %v1361_v34, %v1368_v11  ;;  %v1218_v17 = vpack.c.bf16 %v1200_v13, %v1200_v13  ;;  %v1605_v9 = vsel %vm729_vm0, %v1600_v20, %v1604_v18 }
 0x157   : > { %v1457_v62 = vsel %vm4288_vm14, 0, %v1456_v59  ;;  %1417 = vst [vmem:[#allocation3 + $0x40] sm:$0xf] %v1369_v43  ;;  %1837 = vmatmul.bf16.gmra.mxu0 %v3530_v1  ;;  %vm2280_vm14 = vcmask 1047559   ;;  %p3659_p13 = pneg %p3658_p12 }
 0x158   : > { %1458 = vst [vmem:[#allocation3 + $0x3c] sm:$0xc] %v1457_v62  ;;  %v1372_v54 = vshrl.u32 %v1218_v17, 16  ;;  %v1375_v15 = vshll.u32 %v1218_v17, 16 }
 0x159   : > { %p3664_p3 = pnand %p3663_p2, %p3659_p13 }
 0x15a   : > { %v1374_v23 = vrot.slane %v1372_v54, 7  ;;  %1981 = vmatmul.bf16.gmra.mxu1 %v1889_v5  ;;  %v4426_v54 = vld [vmem:[%s4708_s6] ss:$0 sm:$0xff] }
 0x15c   : > { %v1377_v2 = vor.u32 %v1375_v15, %v1374_v23  ;;  %1718 = vmatmul.bf16.gmra.mxu3 %v1605_v9 }
 0x15e   : > { %v1378_v60 = vsel %vm3846_vm8, %v1370_v19, %v1377_v2  ;;  %v3638_v45 = vld [vmem:[#allocation3 + $0x40] sm:$0xf]   ;;  %v4432_v2 = vld [vmem:[%s4706_s4] ss:$0 sm:$0xff]  ;;  %vm2268_vm8 = vcmask 1041409  }
 0x15f   : > { %v1420_v12 = vsel %vm1418_vm13, %v1378_v60, %v1419_v10  ;;  %v3532_v41 = vld [vmem:[#allocation3 + $0x38] sm:$0xff] }
 0x160   : > { %1421 = vst [vmem:[#allocation3 + $0x44] sm:$0xf] %v1420_v12  ;;  %v1618_v22 = vshll.u32 %v3532_v41, 16  ;;  %v1892_v7 = vrot.slane %v3532_v41, 1  ;;  %v1622_v36 = vshrl.u32 %v3532_v41, 16 }
 0x162   : > { %v1620_v29 = vrot.slane %v1618_v22, 1  ;;  %v1893_v28 = vsel %vm1020_vm9, %v1890_v32, %v1892_v7 }
 0x163   : > { %3421 = vmatmul.msk.bf16.gmra.mxu2 %vm825_vm7, %v3506_v37 }
 0x164   : > { %v1621_v40 = vsel %vm729_vm0, %v1616_v47, %v1620_v29  ;;  %v1624_v44 = vor.u32 %v1622_v36, %v1620_v29 }
 0x167   : > { %v1459_v27 = vld [vmem:[#allocation3 + $0x44] sm:$0x8]  ;;  %1842 = vmatmul.bf16.gmra.mxu0 %v3531_v25  ;;  %v3689_v38 = vld [vmem:[#allocation3 + $0x40] sm:$0x70] }
 0x168   : > { %v1460_v52 = vsel %vm4328_vm10, 0, %v1459_v27  ;;  %v3639_v49 = vor.u32 %v3689_v38, %v3638_v45 }
 0x169   : > { %1461 = vst [vmem:[#allocation3 + $0x44] sm:$0x8] %v1460_v52 }
 0x16a   : > { %1986 = vmatmul.bf16.gmra.mxu1 %v1891_v46 }
 0x16c   : > { %1723 = vmatmul.bf16.gmra.mxu3 %v1613_v35 }
 0x170   : > { %v1481_v39 = vld [vmem:[#allocation3 + $0x40] sm:$0xff]  }
 0x171   : > { %v1626_v30 = vshll.u32 %v1481_v39, 16  ;;  %v1894_v50 = vrot.slane %v1481_v39, 1  ;;  %v1630_v63 = vshrl.u32 %v1481_v39, 16 }
 0x173   : > { %v1628_v56 = vrot.slane %v1626_v30, 1  ;;  %v1895_v53 = vsel %vm1020_vm9, %v1892_v7, %v1894_v50  ;;  %vm2270_vm9 = vcmask 1042434  }
 0x175   : > { %v1629_v55 = vsel %vm729_vm0, %v1624_v44, %v1628_v56  ;;  %v1632_v1 = vor.u32 %v1630_v63, %v1628_v56  ;;  %vm2274_vm0 = vcmask 1044484  }
 0x177   : > { %1847 = vmatmul.bf16.gmra.mxu0 %v3532_v41 }
 0x17a   : > { %1991 = vmatmul.bf16.gmra.mxu1 %v1893_v28 }
 0x17c   : > { %1728 = vmatmul.bf16.gmra.mxu3 %v1621_v40 }
 0x182   : > { %v2161_v57 = vpop.f32.mrf.mxu2 }
 0x183   : > { %v1813_v0 = vpop.f32.mrf.mxu0  ;;  %v2162_v19 = vadd.f32 %v4426_v54, %v2161_v57 }
 0x185   : > { %v2287_v10 = vrot.slane %v2162_v19, 6 }
 0x187   : > { %1852 = vmatmul.bf16.gmra.mxu0 %v3639_v49 }
 0x18a   : > { %1996 = vmatmul.bf16.gmra.mxu1 %v1895_v53  ;;  %v2163_v48 = vpop.f32.mrf.mxu2 }
 0x18b   : > { %v1815_v4 = vpop.f32.mrf.mxu0  ;;  %v2164_v60 = vadd.f32 %v4426_v54, %v2163_v48 }
 0x18c   : > { %1733 = vmatmul.bf16.gmra.mxu3 %v1629_v55 }
 0x18d   : > { %v2288_v27 = vrot.slane %v2164_v60, 6 }
 0x18f   : > { %v2289_v33 = vsel %vm1427_vm11, %v2287_v10, %v2288_v27 }
 0x192   : > { %v2166_v13 = vpop.f32.mrf.mxu2 }
 0x193   : > { %v2167_v40 = vadd.f32 %v4426_v54, %v2166_v13 }
 0x194   : > { %v1818_v58 = vpop.f32.mrf.mxu0 }
 0x195   : > { %v2394_v44 = vrot.slane %v2167_v40, 4 }
 0x197   : > { %v1962_v31 = vpop.f32.mrf.mxu1  ;;  %3414 = vmatmul.msk.bf16.vlgmr.msrb.gmra.mxu0 %vm825_vm7, %v3499_v16 }
 0x19a   : > { %2001 = vmatmul.bf16.gmra.mxu1 %v1894_v50  ;;  %v2168_v15 = vpop.f32.mrf.mxu2 }
 0x19b   : > { %v4448_v38 = vadd.f32 %v4426_v54, %v2168_v15 }
 0x19c   : > { %v1820_v34 = vpop.f32.mrf.mxu0  ;;  %1738 = vmatmul.bf16.gmra.mxu3 %v1632_v1 }
 0x19d   : > { %v2395_v55 = vrot.slane %v4448_v38, 4 }
 0x19f   : > { %v1964_v3 = vpop.f32.mrf.mxu1  ;;  %v1699_v6 = vpop.f32.mrf.mxu3 }
 0x1a0   : > { %v1814_v11 = vadd.f32 %v1813_v0, %v1699_v6 }
 0x1a2   : > { %v4419_v14 = vadd.f32 %v1962_v31, %v1814_v11  ;;  %v4438_v24 = vpop.f32.mrf.mxu2 }
 0x1a4   : > { %v1823_v59 = vpop.f32.mrf.mxu0 }
 0x1a7   : > { %v1967_v43 = vpop.f32.mrf.mxu1  ;;  %v1701_v17 = vpop.f32.mrf.mxu3 }
 0x1a8   : > { %v1816_v8 = vadd.f32 %v1815_v4, %v1701_v17 }
 0x1aa   : > { %v4421_v62 = vadd.f32 %v1964_v3, %v1816_v8  ;;  %v4444_v41 = vpop.f32.mrf.mxu2 }
 0x1ac   : > { %v1825_v21 = vpop.f32.mrf.mxu0 }
 0x1af   : > { %v1969_v18 = vpop.f32.mrf.mxu1  ;;  %v1704_v23 = vpop.f32.mrf.mxu3 }
 0x1b0   : > { %v1819_v5 = vadd.f32 %v1818_v58, %v1704_v23 }
 0x1b2   : > { %v2009_v20 = vadd.f32 %v1967_v43, %v1819_v5  ;;  %v4454_v58 = vpop.f32.mrf.mxu2  ;;  %v2396_v5 = vsel %vm1397_vm1, %v2394_v44, %v2395_v55 }
 0x1b4   : > { %v4434_v9 = vpop.f32.mrf.mxu0  ;;  %v2031_v12 = vadd.f32 %v4432_v2, %v2009_v20 }
 0x1b6   : > { %v2293_v25 = vadd.f32 %v2287_v10, %v2031_v12 }
 0x1b7   : > { %v1972_v26 = vpop.f32.mrf.mxu1  ;;  %v1706_v32 = vpop.f32.mrf.mxu3 }
 0x1b8   : > { %2299 = vst.sshfl [vmem:[#allocation1] sm:$0xff pattern:$0x73625140] %v2293_v25  ;;  %v1821_v52 = vadd.f32 %v1820_v34, %v1706_v32 }
 0x1ba   : > { %v2010_v51 = vadd.f32 %v1969_v18, %v1821_v52 }
 0x1bc   : > { %v4441_v46 = vpop.f32.mrf.mxu0  ;;  %v2032_v61 = vadd.f32 %v4432_v2, %v2010_v51 }
 0x1be   : > { %v2294_v35 = vadd.f32 %v2289_v33, %v2032_v61  ;;  %v4463_v61 = vpop.f32.mrf.mxu2 }
 0x1bf   : > { %v1974_v37 = vpop.f32.mrf.mxu1  ;;  %v2302_v22 = vld [vmem:[#allocation1 + $0x1] ss:$4 sm:$0xff]  ;;  %v2304_v7 = vld [vmem:[#allocation1 + $0x2] ss:$4 sm:$0xff]  ;;  %v2306_v42 = vld [vmem:[#allocation1 + $0x3] ss:$4 sm:$0xff]  ;;  %v1709_v29 = vpop.f32.mrf.mxu3 }
 0x1c0   : > { %2300 = vst.sshfl [vmem:[#allocation1 + $0x20] sm:$0xff pattern:$0x73625140] %v2294_v35  ;;  %v1824_v28 = vadd.f32 %v1823_v59, %v1709_v29  ;;  %v3430_v39 = vrot.slane %v2302_v22, 9  ;;  %v3431_v45 = vrot.slane %v2304_v7, 9  ;;  %v3432_v47 = vrot.slane %v2306_v42, 9 }
 0x1c2   : > { %v2011_v0 = vadd.f32 %v1972_v26, %v1824_v28  ;;  %v2349_v30 = vadd.f32 %v3430_v39, %v2302_v22  ;;  %v2350_v49 = vadd.f32 %v3431_v45, %v2304_v7  ;;  %v2351_v50 = vadd.f32 %v3432_v47, %v2306_v42 }
 0x1c4   : > { %v4450_v36 = vpop.f32.mrf.mxu0  ;;  %v2033_v56 = vadd.f32 %v4432_v2, %v2011_v0  ;;  %v2357_v53 = vmul.f32 0.5, %v2349_v30  ;;  %v2358_v4 = vmul.f32 0.5, %v2350_v49  ;;  %v2359_v48 = vmul.f32 0.5, %v2351_v50 }
 0x1c5   : > { %v2172_v0 = vadd.f32 %v4426_v54, %v4438_v24 }
 0x1c6   : > { %v2295_v57 = vadd.f32 %v2288_v27, %v2033_v56  ;;  %v2373_v31 = vperm.slane %v2357_v53, 0  ;;  %v2374_v63 = vperm.slane %v2358_v4, 0  ;;  %v2375_v10 = vperm.slane %v2359_v48, 0 }
 0x1c7   : > { %v1977_v16 = vpop.f32.mrf.mxu1  ;;  %v1711_v1 = vpop.f32.mrf.mxu3  ;;  %v2308_v34 = vld [vmem:[#allocation1 + $0x20] ss:$4 sm:$0xff]  ;;  %v2310_v3 = vld [vmem:[#allocation1 + $0x21] ss:$4 sm:$0xff]  ;;  %v2312_v6 = vld [vmem:[#allocation1 + $0x22] ss:$4 sm:$0xff]  ;;  %v2400_v32 = vadd.f32 %v2394_v44, %v2033_v56 }
 0x1c8   : > { %2315 = vst.sshfl [vmem:[#allocation1] sm:$0xff pattern:$0x73625140] %v2295_v57  ;;  %v1826_v11 = vadd.f32 %v1825_v21, %v1711_v1  ;;  %v2314_v13 = vld [vmem:[#allocation1 + $0x23] ss:$4 sm:$0xff]  ;;  %v3433_v59 = vrot.slane %v2308_v34, 9  ;;  %v2381_v12 = vsel %vm2268_vm8, %v2374_v63, %v2373_v31 }
 0x1c9   : > { %v3434_v43 = vrot.slane %v2310_v3, 9  ;;  %v3435_v17 = vrot.slane %v2312_v6, 9  ;;  %v3436_v8 = vrot.slane %v2314_v13, 9  ;;  %v2382_v7 = vsel %vm2270_vm9, %v2375_v10, %v2381_v12 }
 0x1ca   : > { %v2012_v15 = vadd.f32 %v1974_v37, %v1826_v11  ;;  %v2352_v18 = vadd.f32 %v3433_v59, %v2308_v34  ;;  %v2501_v44 = vrot.slane %v2172_v0, 2 }
 0x1cb   : > { %v2353_v19 = vadd.f32 %v3434_v43, %v2310_v3  ;;  %v2354_v23 = vadd.f32 %v3435_v17, %v2312_v6  ;;  %v2355_v25 = vadd.f32 %v3436_v8, %v2314_v13  ;;  %v4487_v13 = vpop.f32.mrf.mxu2 }
 0x1cc   : > { %v4459_v20 = vpop.f32.mrf.mxu0  ;;  %v2034_v60 = vadd.f32 %v4432_v2, %v2012_v15  ;;  %v2360_v21 = vmul.f32 0.5, %v2352_v18 }
 0x1cd   : > { %v2361_v26 = vmul.f32 0.5, %v2353_v19  ;;  %v2362_v27 = vmul.f32 0.5, %v2354_v23  ;;  %v2363_v39 = vmul.f32 0.5, %v2355_v25 }
 0x1ce   : > { %v2376_v52 = vperm.slane %v2360_v21, 0  ;;  %v2401_v51 = vadd.f32 %v2396_v5, %v2034_v60 }
 0x1cf   : > { %v1979_v33 = vpop.f32.mrf.mxu1  ;;  %v2316_v35 = vld [vmem:[#allocation1] ss:$4 sm:$0xff]  ;;  %v2377_v37 = vperm.slane %v2361_v26, 0  ;;  %v1714_v22 = vpop.f32.mrf.mxu3  ;;  %v2378_v47 = vperm.slane %v2362_v27, 0  ;;  %v2379_v4 = vperm.slane %v2363_v39, 0 }
 0x1d0   : > { %2406 = vst.sshfl [vmem:[#allocation1] sm:$0xff pattern:$0x73625140] %v2400_v32  ;;  %v1829_v42 = vadd.f32 %v4434_v9, %v1714_v22  ;;  %v3437_v29 = vrot.slane %v2316_v35, 9  ;;  %v2383_v28 = vsel %vm1442_vm6, %v2376_v52, %v2382_v7  ;;  %v4476_v9 = vadd.f32 %v4426_v54, %v4444_v41 }
 0x1d1   : > { %2407 = vst.sshfl [vmem:[#allocation1 + $0x20] sm:$0xff pattern:$0x73625140] %v2401_v51  ;;  %v2384_v45 = vsel %vm2274_vm0, %v2377_v37, %v2383_v28 }
 0x1d2   : > { %v2013_v40 = vadd.f32 %v1977_v16, %v1829_v42  ;;  %v2356_v30 = vadd.f32 %v3437_v29, %v2316_v35  ;;  %v2385_v53 = vsel %vm2276_vm15, %v2378_v47, %v2384_v45  ;;  %v2502_v48 = vrot.slane %v4476_v9, 2 }
 0x1d3   : > { %v2386_v1 = vsel %vm2278_vm3, %v2379_v4, %v2385_v53  ;;  %v2183_v9 = vpop.f32.mrf.mxu2 }
 0x1d4   : > { %v4472_v49 = vpop.f32.mrf.mxu0  ;;  %v2035_v50 = vadd.f32 %v4432_v2, %v2013_v40  ;;  %v2364_v56 = vmul.f32 0.5, %v2356_v30  ;;  %v2503_v18 = vsel %vm2500_vm5, %v2501_v44, %v2502_v48 }
 0x1d6   : > { %v2402_v24 = vadd.f32 %v2395_v55, %v2035_v50  ;;  %v2380_v16 = vperm.slane %v2364_v56, 0  ;;  %v2507_v35 = vadd.f32 %v2501_v44, %v2035_v50 }
 0x1d7   : > { %v1982_v57 = vpop.f32.mrf.mxu1  ;;  %v2409_v31 = vld [vmem:[#allocation1 + $0x2] ss:$4 sm:$0xff]  ;;  %v2411_v63 = vld [vmem:[#allocation1 + $0x3] ss:$4 sm:$0xff]  ;;  %v1716_v41 = vpop.f32.mrf.mxu3 }
 0x1d8   : > { %v2413_v34 = vld [vmem:[#allocation1 + $0x20] ss:$4 sm:$0xff]  ;;  %v2415_v3 = vld [vmem:[#allocation1 + $0x21] ss:$4 sm:$0xff]  ;;  %v2417_v6 = vld [vmem:[#allocation1 + $0x22] ss:$4 sm:$0xff]  ;;  %v1831_v11 = vadd.f32 %v4441_v46, %v1716_v41  ;;  %v2387_v38 = vsel %vm2280_vm14, %v2380_v16, %v2386_v1 }
 0x1d9   : > { %v2419_v55 = vld [vmem:[#allocation1 + $0x23] ss:$4 sm:$0xff]  ;;  %2420 = vst.sshfl [vmem:[#allocation1] sm:$0xff pattern:$0x73625140] %v2402_v24  ;;  %v3439_v59 = vrot.slane %v2409_v31, 9 }
 0x1da   : > { %v2014_v43 = vadd.f32 %v1979_v33, %v1831_v11  ;;  %v3440_v17 = vrot.slane %v2411_v63, 9  ;;  %3438 = vst.msk [vmem:[%s4490_s9 + $0x8] sm:$0xff] %vm825_vm7, %v2387_v38  ;;  %v3441_v8 = vrot.slane %v2413_v34, 9  ;;  %v3442_v15 = vrot.slane %v2415_v3, 9 }
 0x1db   : > { %v2456_v46 = vadd.f32 %v3439_v59, %v2409_v31  ;;  %v3443_v23 = vrot.slane %v2417_v6, 9  ;;  %v3444_v5 = vrot.slane %v2419_v55, 9 }
 0x1dc   : > { %v4495_v19 = vpop.f32.mrf.mxu0  ;;  %v2036_v10 = vadd.f32 %v4432_v2, %v2014_v43  ;;  %v2457_v60 = vadd.f32 %v3440_v17, %v2411_v63  ;;  %v2458_v21 = vadd.f32 %v3441_v8, %v2413_v34  ;;  %v2459_v25 = vadd.f32 %v3442_v15, %v2415_v3 }
 0x1dd   : > { %v2464_v12 = vmul.f32 0.5, %v2456_v46  ;;  %v2460_v26 = vadd.f32 %v3443_v23, %v2417_v6  ;;  %v2461_v51 = vadd.f32 %v3444_v5, %v2419_v55 }
 0x1de   : > { %v2508_v32 = vadd.f32 %v2503_v18, %v2036_v10  ;;  %v2465_v52 = vmul.f32 0.5, %v2457_v60  ;;  %v2466_v33 = vmul.f32 0.5, %v2458_v21  ;;  %v2467_v7 = vmul.f32 0.5, %v2459_v25 }
 0x1df   : > { %v1984_v27 = vpop.f32.mrf.mxu1  ;;  %v1719_v37 = vpop.f32.mrf.mxu3  ;;  %v2480_v22 = vperm.slane %v2464_v12, 0  ;;  %v2468_v45 = vmul.f32 0.5, %v2460_v26  ;;  %v2469_v56 = vmul.f32 0.5, %v2461_v51 }
 0x1e0   : > { %v2421_v42 = vld [vmem:[#allocation1] ss:$4 sm:$0xff]  ;;  %v2423_v29 = vld [vmem:[#allocation1 + $0x1] ss:$4 sm:$0xff]  ;;  %v1834_v28 = vadd.f32 %v4450_v36, %v1719_v37  ;;  %v2481_v39 = vperm.slane %v2465_v52, 0  ;;  %v2482_v53 = vperm.slane %v2466_v33, 0  ;;  %v4521_v26 = vpop.f32.mrf.mxu2  ;;  %v4524_v33 = vadd.f32 %v4426_v54, %v2183_v9 }
 0x1e1   : > { %2513 = vst.sshfl [vmem:[#allocation1] sm:$0xff pattern:$0x73625140] %v2507_v35  ;;  %v3445_v47 = vrot.slane %v2421_v42, 9  ;;  %v3446_v40 = vrot.slane %v2423_v29, 9  ;;  %v2483_v44 = vperm.slane %v2467_v7, 0 }
 0x1e2   : > { %2514 = vst.sshfl [vmem:[#allocation1 + $0x20] sm:$0xff pattern:$0x73625140] %v2508_v32  ;;  %v2015_v0 = vadd.f32 %v1982_v57, %v1834_v28  ;;  %v2488_v30 = vsel %vm2268_vm8, %v2481_v39, %v2480_v22  ;;  %v2484_v36 = vperm.slane %v2468_v45, 0  ;;  %v2485_v3 = vperm.slane %v2469_v56, 0 }
 0x1e3   : > { %v2462_v4 = vadd.f32 %v3445_v47, %v2421_v42  ;;  %v2463_v24 = vadd.f32 %v3446_v40, %v2423_v29  ;;  %v2489_v31 = vsel %vm2270_vm9, %v2482_v53, %v2488_v30  ;;  %v2690_v53 = vrot.slane %v4524_v33, 6 }
 0x1e4   : > { %v4500_v50 = vpop.f32.mrf.mxu0  ;;  %v2037_v16 = vadd.f32 %v4432_v2, %v2015_v0  ;;  %v2490_v1 = vsel %vm1442_vm6, %v2483_v44, %v2489_v31 }
 0x1e5   : > { %v2470_v63 = vmul.f32 0.5, %v2462_v4  ;;  %v2471_v41 = vmul.f32 0.5, %v2463_v24  ;;  %v2491_v6 = vsel %vm2274_vm0, %v2484_v36, %v2490_v1 }
 0x1e6   : > { %v2509_v57 = vadd.f32 %v2502_v48, %v2037_v16  ;;  %v2492_v17 = vsel %vm2276_vm15, %v2485_v3, %v2491_v6  ;;  %v2177_v48 = vadd.f32 %v4426_v54, %v4454_v58 }
 0x1e7   : > { %v1987_v34 = vpop.f32.mrf.mxu1  ;;  %v1721_v11 = vpop.f32.mrf.mxu3  ;;  %v2486_v38 = vperm.slane %v2470_v63, 0  ;;  %v2487_v55 = vperm.slane %v2471_v41, 0 }
 0x1e8   : > { %v2516_v59 = vld [vmem:[#allocation1 + $0x3] ss:$4 sm:$0xff]  ;;  %v1836_v43 = vadd.f32 %v4459_v20, %v1721_v11  ;;  %v4516_v20 = vadd.f32 %v4426_v54, %v4487_v13  ;;  %v2179_v13 = vadd.f32 %v4426_v54, %v4463_v61 }
 0x1e9   : > { %2525 = vst.sshfl [vmem:[#allocation1] sm:$0xff pattern:$0x73625140] %v2509_v57  ;;  %v2518_v8 = vld [vmem:[#allocation1 + $0x20] ss:$4 sm:$0xff]  ;;  %v3448_v15 = vrot.slane %v2516_v59, 9  ;;  %v2493_v18 = vsel %vm2278_vm3, %v2486_v38, %v2492_v17 }
 0x1ea   : > { %v2016_v46 = vadd.f32 %v1984_v27, %v1836_v43  ;;  %v2494_v23 = vsel %vm2280_vm14, %v2487_v55, %v2493_v18  ;;  %v2520_v5 = vld [vmem:[#allocation1 + $0x21] ss:$4 sm:$0xff]  ;;  %v2522_v10 = vld [vmem:[#allocation1 + $0x22] ss:$4 sm:$0xff]  ;;  %v3449_v60 = vrot.slane %v2518_v8, 9  ;;  %v2689_v22 = vrot.slane %v4516_v20, 6 }
 0x1eb   : > { %3447 = vst.msk [vmem:[%s4490_s9 + $0x10] sm:$0xff] %vm825_vm7, %v2494_v23  ;;  %v2563_v25 = vadd.f32 %v3448_v15, %v2516_v59  ;;  %v2524_v58 = vld [vmem:[#allocation1 + $0x23] ss:$4 sm:$0xff]  ;;  %v3450_v32 = vrot.slane %v2520_v5, 9  ;;  %v3451_v27 = vrot.slane %v2522_v10, 9  ;;  %v4543_v59 = vpop.f32.mrf.mxu2 }
 0x1ec   : > { %v4512_v21 = vpop.f32.mrf.mxu0  ;;  %v2038_v12 = vadd.f32 %v4432_v2, %v2016_v46  ;;  %v2564_v35 = vadd.f32 %v3449_v60, %v2518_v8  ;;  %v3452_v7 = vrot.slane %v2524_v58, 9 }
 0x1ed   : > { %v4529_v42 = vmul.f32 0.5, %v2563_v25  ;;  %v2565_v40 = vadd.f32 %v3450_v32, %v2520_v5  ;;  %v2566_v0 = vadd.f32 %v3451_v27, %v2522_v10 }
 0x1ee   : > { %v2605_v52 = vadd.f32 %v2177_v48, %v2038_v12  ;;  %v4533_v61 = vmul.f32 0.5, %v2564_v35  ;;  %v2567_v31 = vadd.f32 %v3452_v7, %v2524_v58 }
 0x1ef   : > { %v1989_v51 = vpop.f32.mrf.mxu1  ;;  %v1724_v37 = vpop.f32.mrf.mxu3  ;;  %v2587_v63 = vperm.slane %v4529_v42, 0  ;;  %v4539_v11 = vmul.f32 0.5, %v2565_v40  ;;  %v4541_v38 = vmul.f32 0.5, %v2566_v0 }
 0x1f0   : > { %v2609_v29 = vrot.slane %v2605_v52, 2  ;;  %v2610_v28 = vrot.slane %v2605_v52, 4  ;;  %v2611_v39 = vrot.slane %v2605_v52, 6  ;;  %v3457_v45 = vrot.slane %v2605_v52, 9  ;;  %v2526_v16 = vld [vmem:[#allocation1] ss:$4 sm:$0xff] }
 0x1f1   : > { %v1839_v47 = vadd.f32 %v4472_v49, %v1724_v37  ;;  %v2528_v36 = vld [vmem:[#allocation1 + $0x1] ss:$4 sm:$0xff]  ;;  %v2530_v57 = vld [vmem:[#allocation1 + $0x2] ss:$4 sm:$0xff]  ;;  %v3453_v43 = vrot.slane %v2526_v16, 9  ;;  %v2588_v8 = vperm.slane %v4533_v61, 0 }
 0x1f2   : > { %v3458_v30 = vrot.slane %v2609_v29, 9  ;;  %v3459_v9 = vrot.slane %v2610_v28, 9  ;;  %v3460_v56 = vrot.slane %v2611_v39, 9  ;;  %v2645_v4 = vadd.f32 %v3457_v45, %v2605_v52 }
 0x1f3   : > { %v2017_v24 = vadd.f32 %v1987_v34, %v1839_v47  ;;  %v3454_v17 = vrot.slane %v2528_v36, 9  ;;  %v3455_v23 = vrot.slane %v2530_v57, 9  ;;  %v2568_v37 = vadd.f32 %v3453_v43, %v2526_v16 }
 0x1f4   : > { %v4535_v44 = vpop.f32.mrf.mxu0  ;;  %v2646_v41 = vadd.f32 %v3458_v30, %v2609_v29  ;;  %v2647_v49 = vadd.f32 %v3459_v9, %v2610_v28  ;;  %v2648_v1 = vadd.f32 %v3460_v56, %v2611_v39  ;;  %v2653_v3 = vmul.f32 0.5, %v2645_v4 }
 0x1f5   : > { %v2039_v6 = vadd.f32 %v4432_v2, %v2017_v24  ;;  %v2569_v7 = vadd.f32 %v3454_v17, %v2528_v36  ;;  %v2570_v39 = vadd.f32 %v3455_v23, %v2530_v57  ;;  %v2576_v4 = vmul.f32 0.5, %v2568_v37 }
 0x1f6   : > { %v2654_v55 = vmul.f32 0.5, %v2646_v41  ;;  %v2655_v34 = vmul.f32 0.5, %v2647_v49  ;;  %v2656_v15 = vmul.f32 0.5, %v2648_v1  ;;  %v2669_v5 = vperm.slane %v2653_v3, 0 }
 0x1f7   : > { %v2606_v18 = vadd.f32 %v2179_v13, %v2039_v6  ;;  %v1726_v48 = vpop.f32.mrf.mxu3  ;;  %v1992_v46 = vpop.f32.mrf.mxu1  ;;  %v2577_v24 = vmul.f32 0.5, %v2569_v7  ;;  %v2589_v1 = vperm.slane %v4539_v11, 0  ;;  %v2595_v57 = vsel %vm2268_vm8, %v2588_v8, %v2587_v63 }
 0x1f8   : > { %v2670_v10 = vperm.slane %v2654_v55, 0  ;;  %v2671_v60 = vperm.slane %v2655_v34, 0  ;;  %v1841_v12 = vadd.f32 %v4495_v19, %v1726_v48  ;;  %v2672_v45 = vperm.slane %v2656_v15, 0  ;;  %v2191_v55 = vpop.f32.mrf.mxu2 }
 0x1f9   : > { %v2612_v25 = vrot.slane %v2606_v18, 2  ;;  %v2613_v58 = vrot.slane %v2606_v18, 4  ;;  %v2614_v32 = vrot.slane %v2606_v18, 6  ;;  %v3461_v27 = vrot.slane %v2606_v18, 9 }
 0x1fa   : > { %v2677_v52 = vsel %vm2268_vm8, %v2670_v10, %v2669_v5  ;;  %v2018_v35 = vadd.f32 %v1989_v51, %v1841_v12  ;;  %v2575_v19 = vmul.f32 0.5, %v2567_v31  ;;  %v2578_v15 = vmul.f32 0.5, %v2570_v39 }
 0x1fb   : > { %v3462_v42 = vrot.slane %v2612_v25, 9  ;;  %v3463_v29 = vrot.slane %v2613_v58, 9  ;;  %v3464_v13 = vrot.slane %v2614_v32, 9  ;;  %v2649_v47 = vadd.f32 %v3461_v27, %v2606_v18 }
 0x1fc   : > { %v4548_v28 = vpop.f32.mrf.mxu0  ;;  %v2040_v40 = vadd.f32 %v4432_v2, %v2018_v35  ;;  %v2678_v0 = vsel %vm2270_vm9, %v2671_v60, %v2677_v52  ;;  %v2590_v18 = vperm.slane %v4541_v38, 0  ;;  %v2591_v11 = vperm.slane %v2575_v19, 0 }
 0x1fd   : > { %v2650_v30 = vadd.f32 %v3462_v42, %v2612_v25  ;;  %v2651_v9 = vadd.f32 %v3463_v29, %v2613_v58  ;;  %v2652_v56 = vadd.f32 %v3464_v13, %v2614_v32  ;;  %v2657_v61 = vmul.f32 0.5, %v2649_v47 }
 0x1fe   : > { %v2695_v51 = vadd.f32 %v2689_v22, %v2040_v40  ;;  %v2679_v31 = vsel %vm1442_vm6, %v2672_v45, %v2678_v0  ;;  %v2592_v5 = vperm.slane %v2576_v4, 0  ;;  %v2596_v60 = vsel %vm2270_vm9, %v2589_v1, %v2595_v57 }
 0x1ff   : > { %v2658_v16 = vmul.f32 0.5, %v2650_v30  ;;  %v2659_v36 = vmul.f32 0.5, %v2651_v9  ;;  %v2660_v41 = vmul.f32 0.5, %v2652_v56  ;;  %v1729_v49 = vpop.f32.mrf.mxu3  ;;  %v2673_v3 = vperm.slane %v2657_v61, 0  ;;  %v1994_v17 = vpop.f32.mrf.mxu1 }
 0x200   : > { %v1844_v6 = vadd.f32 %v4500_v50, %v1729_v49  ;;  %2701 = vst.sshfl [vmem:[#allocation1] sm:$0xff pattern:$0x73625140] %v2695_v51  ;;  %v2593_v50 = vperm.slane %v2577_v24, 0  ;;  %v2597_v38 = vsel %vm1442_vm6, %v2590_v18, %v2596_v60  ;;  %v2594_v52 = vperm.slane %v2578_v15, 0  ;;  %v2193_v19 = vpop.f32.mrf.mxu2 }
 0x201   : > { %v2674_v34 = vperm.slane %v2658_v16, 0  ;;  %v2675_v43 = vperm.slane %v2659_v36, 0  ;;  %v2680_v48 = vsel %vm2274_vm0, %v2673_v3, %v2679_v31  ;;  %v2676_v63 = vperm.slane %v2660_v41, 0 }
 0x202   : > { %v2019_v23 = vadd.f32 %v1992_v46, %v1844_v6  ;;  %v2691_v46 = vsel %vm1427_vm11, %v2689_v22, %v2690_v53  ;;  %v2598_v32 = vsel %vm2274_vm0, %v2591_v11, %v2597_v38  ;;  %v2187_v24 = vadd.f32 %v4426_v54, %v4521_v26 }
 0x203   : > { %v2681_v8 = vsel %vm2276_vm15, %v2674_v34, %v2680_v48  ;;  %v2599_v35 = vsel %vm2276_vm15, %v2592_v5, %v2598_v32  ;;  %v4589_v16 = vadd.f32 %v4426_v54, %v4543_v59  ;;  %v4592_v36 = vadd.f32 %v4426_v54, %v2193_v19 }
 0x204   : > { %v4561_v10 = vpop.f32.mrf.mxu0  ;;  %v2682_v12 = vsel %vm2278_vm3, %v2675_v43, %v2681_v8  ;;  %v2041_v25 = vadd.f32 %v4432_v2, %v2019_v23  ;;  %v2600_v7 = vsel %vm2278_vm3, %v2593_v50, %v2599_v35  ;;  %v4597_v3 = vadd.f32 %v4426_v54, %v2191_v55 }
 0x205   : > { %v2683_v58 = vsel %vm2280_vm14, %v2676_v63, %v2682_v12  ;;  %v2601_v20 = vsel %vm2280_vm14, %v2594_v52, %v2600_v7  ;;  %v2029_v59 = vadd.f32 %v4432_v2, %v4419_v14  ;;  %v2796_v33 = vrot.slane %v4589_v16, 4 }
 0x206   : > { %3465 = vst.msk [vmem:[%s4490_s9 + $0x20] sm:$0xff] %vm825_vm7, %v2683_v58  ;;  %v2696_v27 = vadd.f32 %v2691_v46, %v2041_v25  ;;  %v2795_v23 = vrot.slane %v2187_v24, 4  ;;  %v2902_v55 = vrot.slane %v4592_v36, 2  ;;  %v2901_v8 = vrot.slane %v4597_v3, 2 }
 0x207   : > { %v1731_v37 = vpop.f32.mrf.mxu3  ;;  %v2704_v42 = vld [vmem:[#allocation1 + $0x1] ss:$4 sm:$0xff]  ;;  %v2706_v29 = vld [vmem:[#allocation1 + $0x2] ss:$4 sm:$0xff]  ;;  %v2708_v13 = vld [vmem:[#allocation1 + $0x3] ss:$4 sm:$0xff]  ;;  %v1997_v9 = vpop.f32.mrf.mxu1  ;;  %v2030_v32 = vadd.f32 %v4432_v2, %v4421_v62 }
 0x208   : > { %v1846_v39 = vadd.f32 %v4512_v21, %v1731_v37  ;;  %2702 = vst.sshfl [vmem:[#allocation1 + $0x20] sm:$0xff pattern:$0x73625140] %v2696_v27  ;;  %v3466_v22 = vrot.slane %v2704_v42, 9  ;;  %v3467_v45 = vrot.slane %v2706_v29, 9  ;;  %v3468_v47 = vrot.slane %v2708_v13, 9 }
 0x209   : > { %3456 = vst.msk [vmem:[%s4490_s9 + $0x18] sm:$0xff] %vm825_vm7, %v2601_v20  ;;  %v2797_v58 = vsel %vm1397_vm1, %v2795_v23, %v2796_v33  ;;  %v4616_v7 = vsel %vm2500_vm5, %v2901_v8, %v2902_v55 }
 0x20a   : > { %v2020_v40 = vadd.f32 %v1994_v17, %v1846_v39  ;;  %v2751_v0 = vadd.f32 %v3466_v22, %v2704_v42  ;;  %v2752_v30 = vadd.f32 %v3467_v45, %v2706_v29  ;;  %v2753_v61 = vadd.f32 %v3468_v47, %v2708_v13 }
 0x20c   : > { %v4582_v56 = vpop.f32.mrf.mxu0  ;;  %v2042_v51 = vadd.f32 %v4432_v2, %v2020_v40  ;;  %v2759_v4 = vmul.f32 0.5, %v2751_v0  ;;  %v2760_v21 = vmul.f32 0.5, %v2752_v30  ;;  %v2761_v49 = vmul.f32 0.5, %v2753_v61 }
 0x20e   : > { %v2697_v41 = vadd.f32 %v2690_v53, %v2042_v51  ;;  %v2775_v1 = vperm.slane %v2759_v4, 0  ;;  %v2776_v57 = vperm.slane %v2760_v21, 0  ;;  %v2777_v60 = vperm.slane %v2761_v49, 0 }
 0x20f   : > { %v1734_v31 = vpop.f32.mrf.mxu3  ;;  %v2710_v6 = vld [vmem:[#allocation1 + $0x20] ss:$4 sm:$0xff]  ;;  %v2712_v34 = vld [vmem:[#allocation1 + $0x21] ss:$4 sm:$0xff]  ;;  %v2714_v26 = vld [vmem:[#allocation1 + $0x22] ss:$4 sm:$0xff]  ;;  %v1999_v46 = vpop.f32.mrf.mxu1  ;;  %v2801_v29 = vadd.f32 %v2795_v23, %v2042_v51 }
 0x210   : > { %v1849_v43 = vadd.f32 %v4535_v44, %v1734_v31  ;;  %v2716_v17 = vld [vmem:[#allocation1 + $0x23] ss:$4 sm:$0xff]  ;;  %2717 = vst.sshfl [vmem:[#allocation1] sm:$0xff pattern:$0x73625140] %v2697_v41  ;;  %v3469_v15 = vrot.slane %v2710_v6, 9  ;;  %v2783_v38 = vsel %vm2268_vm8, %v2776_v57, %v2775_v1 }
 0x211   : > { %v3470_v53 = vrot.slane %v2712_v34, 9  ;;  %v3471_v18 = vrot.slane %v2714_v26, 9  ;;  %v3472_v48 = vrot.slane %v2716_v17, 9  ;;  %v2784_v45 = vsel %vm2270_vm9, %v2777_v60, %v2783_v38 }
 0x212   : > { %v2021_v11 = vadd.f32 %v1997_v9, %v1849_v43  ;;  %v2754_v5 = vadd.f32 %v3469_v15, %v2710_v6 }
 0x213   : > { %v2755_v44 = vadd.f32 %v3470_v53, %v2712_v34  ;;  %v2756_v50 = vadd.f32 %v3471_v18, %v2714_v26  ;;  %v2757_v27 = vadd.f32 %v3472_v48, %v2716_v17 }
 0x214   : > { %v2156_v63 = vpop.f32.mrf.mxu0  ;;  %v2043_v14 = vadd.f32 %v4432_v2, %v2021_v11  ;;  %v2762_v25 = vmul.f32 0.5, %v2754_v5 }
 0x215   : > { %v2157_v12 = vadd.f32 %v4426_v54, %v2156_v63  ;;  %v2763_v52 = vmul.f32 0.5, %v2755_v44  ;;  %v2764_v20 = vmul.f32 0.5, %v2756_v50  ;;  %v2765_v9 = vmul.f32 0.5, %v2757_v27 }
 0x216   : > { %v2802_v35 = vadd.f32 %v2797_v58, %v2043_v14  ;;  %v2778_v42 = vperm.slane %v2762_v25, 0 }
 0x217   : > { %v2196_v37 = vadd.f32 %v2157_v12, %v2029_v59  ;;  %v1736_v13 = vpop.f32.mrf.mxu3  ;;  %v2718_v39 = vld [vmem:[#allocation1] ss:$4 sm:$0xff]  ;;  %v2779_v22 = vperm.slane %v2763_v52, 0  ;;  %v2780_v57 = vperm.slane %v2764_v20, 0  ;;  %v2781_v17 = vperm.slane %v2765_v9, 0  ;;  %v2002_v63 = vpop.f32.mrf.mxu1 }
 0x218   : > { %v1851_v0 = vadd.f32 %v4548_v28, %v1736_v13  ;;  %v3473_v30 = vrot.slane %v2718_v39, 9  ;;  %v2785_v61 = vsel %vm1442_vm6, %v2778_v42, %v2784_v45  ;;  %2807 = vst.sshfl [vmem:[#allocation1] sm:$0xff pattern:$0x73625140] %v2801_v29 }
 0x219   : > { %v2200_v47 = vrot.slane %v2196_v37, 2  ;;  %v2201_v40 = vrot.slane %v2196_v37, 4  ;;  %v2202_v62 = vrot.slane %v2196_v37, 6  ;;  %v3422_v19 = vrot.slane %v2196_v37, 9 }
 0x21a   : > { %2808 = vst.sshfl [vmem:[#allocation1 + $0x20] sm:$0xff pattern:$0x73625140] %v2802_v35  ;;  %v2022_v41 = vadd.f32 %v1999_v46, %v1851_v0  ;;  %v2758_v1 = vadd.f32 %v3473_v30, %v2718_v39  ;;  %v2786_v31 = vsel %vm2274_vm0, %v2779_v22, %v2785_v61 }
 0x21b   : > { %v3423_v4 = vrot.slane %v2200_v47, 9  ;;  %v3424_v21 = vrot.slane %v2201_v40, 9  ;;  %v3425_v51 = vrot.slane %v2202_v62, 9  ;;  %v2236_v24 = vadd.f32 %v3422_v19, %v2196_v37 }
 0x21c   : > { %v2158_v49 = vpop.f32.mrf.mxu0  ;;  %v2044_v26 = vadd.f32 %v4432_v2, %v2022_v41  ;;  %v2766_v59 = vmul.f32 0.5, %v2758_v1  ;;  %v2787_v48 = vsel %vm2276_vm15, %v2780_v57, %v2786_v31 }
 0x21d   : > { %v2237_v3 = vadd.f32 %v3423_v4, %v2200_v47  ;;  %v2238_v6 = vadd.f32 %v3424_v21, %v2201_v40  ;;  %v2239_v34 = vadd.f32 %v3425_v51, %v2202_v62  ;;  %v2244_v28 = vmul.f32 0.5, %v2236_v24 }
 0x21e   : > { %v2159_v43 = vadd.f32 %v4426_v54, %v2158_v49  ;;  %v2803_v11 = vadd.f32 %v2796_v33, %v2044_v26  ;;  %v4627_v5 = vadd.f32 %v2901_v8, %v2044_v26  ;;  %v2782_v12 = vperm.slane %v2766_v59, 0 }
 0x21f   : > { %v2245_v15 = vmul.f32 0.5, %v2237_v3  ;;  %v2246_v53 = vmul.f32 0.5, %v2238_v6  ;;  %v2247_v18 = vmul.f32 0.5, %v2239_v34  ;;  %v2260_v23 = vperm.slane %v2244_v28, 0  ;;  %v1739_v50 = vpop.f32.mrf.mxu3  ;;  %v2810_v25 = vld [vmem:[#allocation1 + $0x2] ss:$4 sm:$0xff] }
 0x220   : > { %v2197_v44 = vadd.f32 %v2159_v43, %v2030_v32  ;;  %v1854_v54 = vadd.f32 %v4561_v10, %v1739_v50  ;;  %v2812_v52 = vld [vmem:[#allocation1 + $0x3] ss:$4 sm:$0xff]  ;;  %v2788_v8 = vsel %vm2278_vm3, %v2781_v17, %v2787_v48  ;;  %v3475_v30 = vrot.slane %v2810_v25, 9  ;;  %v2004_v43 = vpop.f32.mrf.mxu1 }
 0x221   : > { %v2261_v60 = vperm.slane %v2245_v15, 0  ;;  %v2262_v14 = vperm.slane %v2246_v53, 0  ;;  %v2263_v35 = vperm.slane %v2247_v18, 0  ;;  %v2814_v10 = vld [vmem:[#allocation1 + $0x20] ss:$4 sm:$0xff]  ;;  %v2789_v22 = vsel %vm2280_vm14, %v2782_v12, %v2788_v8 }
 0x222   : > { %v2203_v38 = vrot.slane %v2197_v44, 2  ;;  %v2204_v58 = vrot.slane %v2197_v44, 4  ;;  %v2205_v46 = vrot.slane %v2197_v44, 6  ;;  %v3426_v27 = vrot.slane %v2197_v44, 9  ;;  %v2816_v45 = vld [vmem:[#allocation1 + $0x21] ss:$4 sm:$0xff] }
 0x223   : > { %v2269_v16 = vsel %vm2268_vm8, %v2261_v60, %v2260_v23  ;;  %v2023_v33 = vadd.f32 %v2002_v63, %v1854_v54  ;;  %2821 = vst.sshfl [vmem:[#allocation1] sm:$0xff pattern:$0x73625140] %v2803_v11  ;;  %v2818_v19 = vld [vmem:[#allocation1 + $0x22] ss:$4 sm:$0xff]  ;;  %v3476_v4 = vrot.slane %v2812_v52, 9  ;;  %v2857_v59 = vadd.f32 %v3475_v30, %v2810_v25 }
 0x224   : > { %v2271_v32 = vsel %vm2270_vm9, %v2262_v14, %v2269_v16  ;;  %v3427_v37 = vrot.slane %v2203_v38, 9  ;;  %v3428_v42 = vrot.slane %v2204_v58, 9  ;;  %v3429_v29 = vrot.slane %v2205_v46, 9  ;;  %3474 = vst.msk [vmem:[%s4490_s9 + $0x28] sm:$0xff] %vm825_vm7, %v2789_v22  ;;  %v2820_v0 = vld [vmem:[#allocation1 + $0x23] ss:$4 sm:$0xff] }
 0x225   : > { %v2273_v13 = vsel %vm1442_vm6, %v2263_v35, %v2271_v32  ;;  %v2240_v39 = vadd.f32 %v3426_v27, %v2197_v44  ;;  %v2045_v20 = vadd.f32 %v4432_v2, %v2023_v33  ;;  %v3477_v21 = vrot.slane %v2814_v10, 9 }
 0x226   : > { %v2241_v47 = vadd.f32 %v3427_v37, %v2203_v38  ;;  %v2242_v40 = vadd.f32 %v3428_v42, %v2204_v58  ;;  %v2243_v62 = vadd.f32 %v3429_v29, %v2205_v46  ;;  %v3478_v1 = vrot.slane %v2816_v45, 9 }
 0x227   : > { %v2248_v9 = vmul.f32 0.5, %v2240_v39  ;;  %v2908_v61 = vadd.f32 %v4616_v7, %v2045_v20  ;;  %v1741_v49 = vpop.f32.mrf.mxu3  ;;  %v3479_v3 = vrot.slane %v2818_v19, 9  ;;  %v3480_v6 = vrot.slane %v2820_v0, 9 }
 0x228   : > { %v2249_v51 = vmul.f32 0.5, %v2241_v47  ;;  %v2250_v24 = vmul.f32 0.5, %v2242_v40  ;;  %v2251_v41 = vmul.f32 0.5, %v2243_v62  ;;  %v1856_v31 = vadd.f32 %v4582_v56, %v1741_v49 }
 0x229   : > { %v2264_v57 = vperm.slane %v2248_v9, 0  ;;  %2914 = vst.sshfl [vmem:[#allocation1 + $0x20] sm:$0xff pattern:$0x73625140] %v2908_v61  ;;  %v2858_v15 = vadd.f32 %v3476_v4, %v2812_v52  ;;  %v2859_v53 = vadd.f32 %v3477_v21, %v2814_v10  ;;  %v2860_v11 = vadd.f32 %v3478_v1, %v2816_v45 }
 0x22a   : > { %v2265_v34 = vperm.slane %v2249_v51, 0  ;;  %v2266_v28 = vperm.slane %v2250_v24, 0  ;;  %v2267_v26 = vperm.slane %v2251_v41, 0  ;;  %v2024_v17 = vadd.f32 %v2004_v43, %v1856_v31  ;;  %v2822_v48 = vld [vmem:[#allocation1] ss:$4 sm:$0xff] }
 0x22b   : > { %v2275_v7 = vsel %vm2274_vm0, %v2264_v57, %v2273_v13  ;;  %v2824_v23 = vld [vmem:[#allocation1 + $0x1] ss:$4 sm:$0xff]  ;;  %v2861_v56 = vadd.f32 %v3479_v3, %v2818_v19  ;;  %v2862_v63 = vadd.f32 %v3480_v6, %v2820_v0  ;;  %v3481_v60 = vrot.slane %v2822_v48, 9 }
 0x22c   : > { %v2277_v18 = vsel %vm2276_vm15, %v2265_v34, %v2275_v7  ;;  %v2046_v50 = vadd.f32 %v4432_v2, %v2024_v17  ;;  %v3482_v14 = vrot.slane %v2824_v23, 9  ;;  %2913 = vst.sshfl [vmem:[#allocation1] sm:$0xff pattern:$0x73625140] %v4627_v5  ;;  %v2865_v12 = vmul.f32 0.5, %v2857_v59 }
 0x22d   : > { %v2279_v44 = vsel %vm2278_vm3, %v2266_v28, %v2277_v18  ;;  %v2866_v25 = vmul.f32 0.5, %v2858_v15  ;;  %v2867_v38 = vmul.f32 0.5, %v2859_v53  ;;  %v2863_v58 = vadd.f32 %v3481_v60, %v2822_v48 }
 0x22e   : > { %v2281_v54 = vsel %vm2280_vm14, %v2267_v26, %v2279_v44  ;;  %v2864_v46 = vadd.f32 %v3482_v14, %v2824_v23  ;;  %v2868_v27 = vmul.f32 0.5, %v2860_v11  ;;  %v2869_v52 = vmul.f32 0.5, %v2861_v56 }
 0x22f   : > { %2283 = vst.msk [vmem:[%s4490_s9] sm:$0xff] %vm825_vm7, %v2281_v54  ;;  %v2870_v35 = vmul.f32 0.5, %v2862_v63  ;;  %v2881_v16 = vperm.slane %v2865_v12, 0  ;;  %v2882_v33 = vperm.slane %v2866_v25, 0  ;;  %v2909_v2 = vadd.f32 %v2902_v55, %v2046_v50 }
 0x230   : > { %v2918_v8 = vld [vmem:[#allocation1 + $0x20] ss:$4 sm:$0xff]  ;;  %v2871_v32 = vmul.f32 0.5, %v2863_v58  ;;  %v2872_v5 = vmul.f32 0.5, %v2864_v46  ;;  %v2883_v37 = vperm.slane %v2867_v38, 0  ;;  %v2884_v29 = vperm.slane %v2868_v27, 0 }
 0x231   : > { %v2920_v42 = vld [vmem:[#allocation1 + $0x21] ss:$4 sm:$0xff]  ;;  %v2885_v10 = vperm.slane %v2869_v52, 0  ;;  %v2889_v13 = vsel %vm2268_vm8, %v2882_v33, %v2881_v16  ;;  %v2922_v39 = vld [vmem:[#allocation1 + $0x22] ss:$4 sm:$0xff]  ;;  %v2886_v20 = vperm.slane %v2870_v35, 0 }
 0x232   : > { %v2887_v22 = vperm.slane %v2871_v32, 0  ;;  %v2890_v45 = vsel %vm2270_vm9, %v2883_v37, %v2889_v13  ;;  %v2924_v47 = vld [vmem:[#allocation1 + $0x23] ss:$4 sm:$0xff]  ;;  %v3485_v40 = vrot.slane %v2918_v8, 9  ;;  %v2888_v62 = vperm.slane %v2872_v5, 0 }
 0x233   : > { %v2891_v19 = vsel %vm1442_vm6, %v2884_v29, %v2890_v45  ;;  %v2916_v36 = vld [vmem:[#allocation1 + $0x3] ss:$4 sm:$0xff]  ;;  %v3486_v55 = vrot.slane %v2920_v42, 9  ;;  %v3487_v0 = vrot.slane %v2922_v39, 9  ;;  %v3488_v21 = vrot.slane %v2924_v47, 9 }
 0x234   : > { %v2892_v30 = vsel %vm2274_vm0, %v2885_v10, %v2891_v19  ;;  %2925 = vst.sshfl [vmem:[#allocation1] sm:$0xff pattern:$0x73625140] %v2909_v2  ;;  %v3484_v9 = vrot.slane %v2916_v36, 9  ;;  %v2964_v61 = vadd.f32 %v3485_v40, %v2918_v8 }
 0x235   : > { %v2893_v4 = vsel %vm2276_vm15, %v2886_v20, %v2892_v30  ;;  %v2965_v51 = vadd.f32 %v3486_v55, %v2920_v42  ;;  %v2966_v49 = vadd.f32 %v3487_v0, %v2922_v39  ;;  %v2967_v34 = vadd.f32 %v3488_v21, %v2924_v47 }
 0x236   : > { %v2894_v24 = vsel %vm2278_vm3, %v2887_v22, %v2893_v4  ;;  %v2963_v41 = vadd.f32 %v3484_v9, %v2916_v36  ;;  %v2972_v1 = vmul.f32 0.5, %v2964_v61 }
 0x237   : > { %v2895_v57 = vsel %vm2280_vm14, %v2888_v62, %v2894_v24  ;;  %v2973_v31 = vmul.f32 0.5, %v2965_v51  ;;  %v2974_v26 = vmul.f32 0.5, %v2966_v49  ;;  %v2975_v23 = vmul.f32 0.5, %v2967_v34 }
 0x238   : > { %3483 = vst.msk [vmem:[%s4490_s9 + $0x30] sm:$0xff] %vm825_vm7, %v2895_v57  ;;  %v2971_v3 = vmul.f32 0.5, %v2963_v41  ;;  %v2988_v6 = vperm.slane %v2972_v1, 0 }
 0x239   : > { %v2989_v28 = vperm.slane %v2973_v31, 0  ;;  %v2990_v50 = vperm.slane %v2974_v26, 0  ;;  %v2991_v25 = vperm.slane %v2975_v23, 0 }
 0x23a   : > { %v2987_v43 = vperm.slane %v2971_v3, 0 }
 0x23b   : > { %v2926_v59 = vld [vmem:[#allocation1] ss:$4 sm:$0xff]  ;;  %v2928_v7 = vld [vmem:[#allocation1 + $0x1] ss:$4 sm:$0xff]  ;;  %v2930_v17 = vld [vmem:[#allocation1 + $0x2] ss:$4 sm:$0xff] }
 0x23c   : > { %v3489_v15 = vrot.slane %v2926_v59, 9  ;;  %v3490_v53 = vrot.slane %v2928_v7, 9  ;;  %v3491_v18 = vrot.slane %v2930_v17, 9  ;;  %v2995_v48 = vsel %vm2268_vm8, %v2988_v6, %v2987_v43 }
 0x23d   : > { %v2996_v11 = vsel %vm2270_vm9, %v2989_v28, %v2995_v48 }
 0x23e   : > { %v2968_v56 = vadd.f32 %v3489_v15, %v2926_v59  ;;  %v2969_v63 = vadd.f32 %v3490_v53, %v2928_v7  ;;  %v2970_v44 = vadd.f32 %v3491_v18, %v2930_v17  ;;  %v2997_v12 = vsel %vm1442_vm6, %v2990_v50, %v2996_v11 }
 0x23f   : > { %v2998_v46 = vsel %vm2274_vm0, %v2991_v25, %v2997_v12 }
 0x240   : > { %v2976_v60 = vmul.f32 0.5, %v2968_v56  ;;  %v2977_v14 = vmul.f32 0.5, %v2969_v63  ;;  %v2978_v54 = vmul.f32 0.5, %v2970_v44 }
 0x242   : > { %v2992_v38 = vperm.slane %v2976_v60, 0  ;;  %v2993_v58 = vperm.slane %v2977_v14, 0  ;;  %v2994_v27 = vperm.slane %v2978_v54, 0 }
 0x244   : > { %v2999_v52 = vsel %vm2276_vm15, %v2992_v38, %v2998_v46 }
 0x245   : > { %v3000_v35 = vsel %vm2278_vm3, %v2993_v58, %v2999_v52 }
 0x246   : > { %v3001_v16 = vsel %vm2280_vm14, %v2994_v27, %v3000_v35 }
 0x247   : > { %3492 = vst.msk [vmem:[%s4490_s9 + $0x38] sm:$0xff] %vm825_vm7, %v3001_v16 }
 0x248   : > { %3667 = shalt.err (!%p3664_p3)
}
 0x249   : > { %s3706_s29 = smov 128   ;;  %s3707_s9 = smov 8  }
 0x24a   : > { %3588 = dma.vmem_to_hbm [thread:$0]  (%p3786_p5), %s3019_s17, 1024, %s3021_s18, %s3006_s19, %s3706_s29, %s3706_s29, %s3707_s9  }
 0x24b PF: > { %p3594_p4 = scmp.ge.s32.totalorder %s3704_s27, 2  ;;  %s3035_s14 = sand.u32 1, %s3692_s24  }
 0x24c   : > { %s3036_s16 = scalar_lea.sflag [#allocation5], %s3035_s14 }
 0x24d   : > { %p3591_p7 = pnand %p3594_p4, %p3790_p6 }
 0x24f   : > { %p3592_p8 = pneg %p3591_p7 }
 0x251   : > { %3685 = dma.done.wait (%p3592_p8), %s3036_s16, 1024  }
 0x252   : > { %3687 = vsyncadd (%p3592_p8), %s3036_s16, 4294966272  ;;  %p17_p9 = scmp.ge.s32.totalorder %s3773_s30, 4   ;;  %s4779_s24 = smov %s3696_s25 }
 0x253   : > { %s4780_s25 = smov %s3700_s26  ;;  %s4781_s26 = smov %s3784_s10 }
 0x254   : > { %s4782_s27 = smov %s3773_s30  ;;  %19 = sbr.rel (!%p17_p9) target bundleno = 3 (0x3), region = 136 }
 0x259   :  { %3042 = vsyncpa [#allocation5], 1 }
 0x25a   :  { %3044 = vsyncpa [#allocation5 + $0x1], 1 }

</bundles_post_ra>
